<compile_context>
chip_gen: v5e
topology: v5e:2x2
jax: 0.10.0
libtpu: 0.0.40
codegen_flags: <defaults>
</compile_context>

<pallas_src>
import functools

import jax
import jax.numpy as jnp
from jax.experimental import pallas as pl
from jax.experimental.pallas import tpu as pltpu

# ---- small, self-consistent hyper-params (module uses 384/6/6/256; scaled down) ----
N_EMBED = 128
N_HEAD = 4
HEAD_SIZE = N_EMBED // N_HEAD
N_LAYER = 2
BLOCK_SIZE = 16          # max context length (position table rows)
VOCAB_SIZE = 65
VOCAB_PAD = 128          # lane-dense lm_head output (multiple of 128)
LN_EPS = 1e-5


def _layer_norm(x, w, b):
    mu = jnp.mean(x, axis=-1, keepdims=True)
    var = jnp.mean((x - mu) ** 2, axis=-1, keepdims=True)
    return (x - mu) * jax.lax.rsqrt(var + LN_EPS) * w + b


# ---------------- fused Pallas kernel ----------------

def _gpt_fwd_kernel(x_ref,
                    ln1w, ln1b, wqkv, wo, bo, ln2w, ln2b, w1, b1, w2, b2,
                    lnfw, lnfb, wlm, blm,
                    out_ref, x_scr, *, b_block, seq_len):
    """Grid = (batch_blocks, N_LAYER).  Each step applies one transformer layer to a
    resident (rows, C) activation slab; the last layer step also runs ln_f + lm_head."""
    l = pl.program_id(1)

    @pl.when(l == 0)
    def _():
        x_scr[...] = x_ref[...]          # load fresh activation slab for this batch block

    x = x_scr[...]                       # (R, C), R = b_block * seq_len
    R = x.shape[0]

    # ---- multi-head causal self-attention on LN1(x) ----
    xn = _layer_norm(x, ln1w[...], ln1b[...])
    # fused QKV: one (R,C)@(C,3C) matmul instead of three short ones
    qkv = jnp.dot(xn, wqkv[...], preferred_element_type=jnp.float32)      # (R, 3C)

    row = jax.lax.broadcasted_iota(jnp.int32, (R, R), 0)
    col = jax.lax.broadcasted_iota(jnp.int32, (R, R), 1)
    if b_block == 1:
        mask = row >= col                                   # plain causal
    else:
        # block-diagonal causal mask (batch folded into M); seq_len is a power of 2
        shift = seq_len.bit_length() - 1
        lane = seq_len - 1
        mask = jnp.logical_and((row >> shift) == (col >> shift),
                               (row & lane) >= (col & lane))

    scale = 1.0 / (N_EMBED ** 0.5)       # reference scales by n_embed (C), not head_size
    att = jnp.zeros((R, N_EMBED), jnp.float32)
    for h in range(N_HEAD):
        lo = h * HEAD_SIZE
        qh = qkv[:, lo:lo + HEAD_SIZE]
        kh = qkv[:, N_EMBED + lo:N_EMBED + lo + HEAD_SIZE]
        vh = qkv[:, 2 * N_EMBED + lo:2 * N_EMBED + lo + HEAD_SIZE]
        # q @ k^T without materializing a transpose: contract both last dims
        s = jax.lax.dot_general(qh, kh, (((1,), (1,)), ((), ())),
                                preferred_element_type=jnp.float32) * scale
        s = jnp.where(mask, s, -1e30)    # finite mask value: no NaN risk for masked rows
        s = s - jnp.max(s, axis=-1, keepdims=True)
        p = jnp.exp(s)
        p = p * pl.reciprocal(jnp.sum(p, axis=-1, keepdims=True))   # exact (approx off for bit-accuracy)
        # TODO(synk): attention-prob dropout omitted (eval-mode forward).
        oh = jnp.dot(p, vh, preferred_element_type=jnp.float32)     # (R, head_size)
        # accumulate straight into the Wo projection: avoids lane-axis concat of heads
        att = att + jnp.dot(oh, wo[lo:lo + HEAD_SIZE, :],
                            preferred_element_type=jnp.float32)
    x = x + att + bo[...]                # residual + proj bias

    # ---- feed-forward on LN2(x) ----
    xn2 = _layer_norm(x, ln2w[...], ln2b[...])
    h1 = jnp.maximum(
        jnp.dot(xn2, w1[...], preferred_element_type=jnp.float32) + b1[...], 0.0)
    ff = jnp.dot(h1, w2[...], preferred_element_type=jnp.float32) + b2[...]
    # TODO(synk): FFN / attention-proj dropout omitted (eval-mode forward).
    x = x + ff
    x_scr[...] = x                       # carry activation to next layer step

    # ---- final LayerNorm + lane-dense lm_head, only on the last layer step ----
    @pl.when(l == N_LAYER - 1)
    def _():
        xf = _layer_norm(x, lnfw[...], lnfb[...])
        out_ref[...] = (jnp.dot(xf, wlm[...], preferred_element_type=jnp.float32)
                        + blm[...]).astype(out_ref.dtype)


# ---------------- wrapper ----------------

def _num_batch_blocks(batch):
    """v7x has 2 TensorCores/chip -> split the batch across a 'parallel' grid axis;
    1-TC chips (v5e/v6e) keep one fused block so weights are DMA'd exactly once."""
    try:
        kind = jax.devices()[0].device_kind.lower()
    except Exception:
        kind = ""
    if ("v7" in kind or "7x" in kind) and batch % 2 == 0:
        return 2
    return 1


_LAYER_W_NAMES = ("ln1w", "ln1b", "wqkv", "wo", "bo",
                  "ln2w", "ln2b", "w1", "b1", "w2", "b2")
_FINAL_W_NAMES = ("lnfw", "lnfb", "wlm", "blm")


def fused_forward(x2d, params, batch, seq_len):
    bt, c = x2d.shape
    vpad = params["wlm"].shape[1]

    nb = _num_batch_blocks(batch)
    b_block = batch // nb
    if b_block > 1 and (seq_len & (seq_len - 1)) != 0:
        nb, b_block = batch, 1           # shift-based mask needs power-of-two seq_len
    rows = b_block * seq_len

    layer_ws = [params[k] for k in _LAYER_W_NAMES]
    final_ws = [params[k] for k in _FINAL_W_NAMES]

    def lw_spec(w):                      # per-layer stacked weight: stream along layer axis
        nd = w.ndim
        return pl.BlockSpec((None,) + w.shape[1:],
                            lambda b, l, _nd=nd: (l,) + (0,) * (_nd - 1))

    def fw_spec(w):                      # final weights: constant block index -> resident
        nd = w.ndim
        return pl.BlockSpec(w.shape, lambda b, l, _nd=nd: (0,) * _nd)

    kernel = functools.partial(_gpt_fwd_kernel, b_block=b_block, seq_len=seq_len)

    return pl.pallas_call(
        kernel,
        out_shape=jax.ShapeDtypeStruct((bt, vpad), jnp.float32),
        grid=(nb, N_LAYER),
        in_specs=([pl.BlockSpec((rows, c), lambda b, l: (b, 0))]
                  + [lw_spec(w) for w in layer_ws]
                  + [fw_spec(w) for w in final_ws]),
        out_specs=pl.BlockSpec((rows, vpad), lambda b, l: (b, 0)),
        scratch_shapes=[pltpu.VMEM((rows, c), jnp.float32)],
        compiler_params=pltpu.CompilerParams(
            dimension_semantics=("parallel", "arbitrary")),
    )(x2d, *layer_ws, *final_ws)


def model_forward(idx, params):
    """Forward pass, targets=None path: returns logits (B, T, vocab)."""
    B, T = idx.shape
    tok = jnp.take(params["tok_emb"], idx, axis=0)          # embedding gather (glue)
    pos = params["pos_emb"][:T]                              # (T, C)
    x2d = (tok + pos[None, :, :]).astype(jnp.float32).reshape(B * T, N_EMBED)
    logits_pad = fused_forward(x2d, params, B, T)            # (B*T, VOCAB_PAD)
    return logits_pad.reshape(B, T, VOCAB_PAD)[:, :, :VOCAB_SIZE]


# ---------------- deterministic parameter init ----------------

def init_params(key):
    keys = iter(jax.random.split(key, 3 + 4 * N_LAYER))

    def nrm(shape):
        return jax.random.normal(next(keys), shape, jnp.float32) * 0.02

    wlm = jnp.zeros((N_EMBED, VOCAB_PAD), jnp.float32)
    wlm = wlm.at[:, :VOCAB_SIZE].set(nrm((N_EMBED, VOCAB_SIZE)))   # zero-padded vocab cols

    params = {
        "tok_emb": nrm((VOCAB_SIZE, N_EMBED)),
        "pos_emb": nrm((BLOCK_SIZE, N_EMBED)),
        "lnfw": jnp.ones((1, N_EMBED), jnp.float32),
        "lnfb": jnp.zeros((1, N_EMBED), jnp.float32),
        "wlm": wlm,
        "blm": jnp.zeros((1, VOCAB_PAD), jnp.float32),
        # per-layer weights stacked on a leading layer axis
        "ln1w": jnp.ones((N_LAYER, 1, N_EMBED), jnp.float32),
        "ln1b": jnp.zeros((N_LAYER, 1, N_EMBED), jnp.float32),
        "wqkv": jnp.stack([nrm((N_EMBED, 3 * N_EMBED)) for _ in range(N_LAYER)]),
        "wo":   jnp.stack([nrm((N_EMBED, N_EMBED)) for _ in range(N_LAYER)]),
        "bo":   jnp.zeros((N_LAYER, 1, N_EMBED), jnp.float32),
        "ln2w": jnp.ones((N_LAYER, 1, N_EMBED), jnp.float32),
        "ln2b": jnp.zeros((N_LAYER, 1, N_EMBED), jnp.float32),
        "w1":   jnp.stack([nrm((N_EMBED, 4 * N_EMBED)) for _ in range(N_LAYER)]),
        "b1":   jnp.zeros((N_LAYER, 1, 4 * N_EMBED), jnp.float32),
        "w2":   jnp.stack([nrm((4 * N_EMBED, N_EMBED)) for _ in range(N_LAYER)]),
        "b2":   jnp.zeros((N_LAYER, 1, N_EMBED), jnp.float32),
    }
    return params


# ---------------- pure-JAX reference (for verification) ----------------

def ref_forward(idx, params):
    B, T = idx.shape
    x = jnp.take(params["tok_emb"], idx, axis=0) + params["pos_emb"][:T][None]
    x = x.astype(jnp.float32)
    causal = jnp.tril(jnp.ones((T, T), bool))
    for l in range(N_LAYER):
        xn = _layer_norm(x, params["ln1w"][l], params["ln1b"][l])
        qkv = xn @ params["wqkv"][l]
        q, k, v = (qkv[..., :N_EMBED], qkv[..., N_EMBED:2 * N_EMBED],
                   qkv[..., 2 * N_EMBED:])
        outs = []
        for h in range(N_HEAD):
            sl = slice(h * HEAD_SIZE, (h + 1) * HEAD_SIZE)
            s = jnp.einsum("btd,bsd->bts", q[..., sl], k[..., sl]) / (N_EMBED ** 0.5)
            s = jnp.where(causal[None], s, -jnp.inf)
            p = jax.nn.softmax(s, axis=-1)
            outs.append(jnp.einsum("bts,bsd->btd", p, v[..., sl]))
        att = jnp.concatenate(outs, axis=-1) @ params["wo"][l] + params["bo"][l]
        x = x + att
        xn2 = _layer_norm(x, params["ln2w"][l], params["ln2b"][l])
        ff = (jnp.maximum(xn2 @ params["w1"][l] + params["b1"][l], 0.0)
              @ params["w2"][l] + params["b2"][l])
        x = x + ff
    xn = _layer_norm(x, params["lnfw"], params["lnfb"])
    return xn @ params["wlm"][:, :VOCAB_SIZE] + params["blm"][:, :VOCAB_SIZE]


if __name__ == "__main__":
    key = jax.random.PRNGKey(0)
    pkey, ikey = jax.random.split(key)
    params = init_params(pkey)

    B, T = 2, BLOCK_SIZE
    idx = jax.random.randint(ikey, (B, T), 0, VOCAB_SIZE, dtype=jnp.int32)

    logits = jax.block_until_ready(model_forward(idx, params))
    assert logits.shape == (B, T, VOCAB_SIZE), logits.shape

    ref = ref_forward(idx, params)
    max_err = float(jnp.max(jnp.abs(logits - ref)))
    assert jnp.allclose(logits, ref, atol=5e-4, rtol=5e-4), max_err

    print("KERNEL_OK")
</pallas_src>

<mosaic_0001>
module attributes {stable_mosaic.version = 11 : i64} {
  func.func @_gpt_fwd_kernel(%arg0: i32, %arg1: i32, %arg2: memref<32x128xf32, #tpu.memory_space<vmem>>, %arg3: memref<1x1x128xf32, #tpu.memory_space<vmem>>, %arg4: memref<1x1x128xf32, #tpu.memory_space<vmem>>, %arg5: memref<1x128x384xf32, #tpu.memory_space<vmem>>, %arg6: memref<1x128x128xf32, #tpu.memory_space<vmem>>, %arg7: memref<1x1x128xf32, #tpu.memory_space<vmem>>, %arg8: memref<1x1x128xf32, #tpu.memory_space<vmem>>, %arg9: memref<1x1x128xf32, #tpu.memory_space<vmem>>, %arg10: memref<1x128x512xf32, #tpu.memory_space<vmem>>, %arg11: memref<1x1x512xf32, #tpu.memory_space<vmem>>, %arg12: memref<1x512x128xf32, #tpu.memory_space<vmem>>, %arg13: memref<1x1x128xf32, #tpu.memory_space<vmem>>, %arg14: memref<1x128xf32, #tpu.memory_space<vmem>>, %arg15: memref<1x128xf32, #tpu.memory_space<vmem>>, %arg16: memref<128x128xf32, #tpu.memory_space<vmem>>, %arg17: memref<1x128xf32, #tpu.memory_space<vmem>>, %arg18: memref<32x128xf32, #tpu.memory_space<vmem>>, %arg19: memref<32x128xf32, #tpu.memory_space<vmem>>) attributes {dimension_semantics = [#tpu.dimension_semantics<parallel>, #tpu.dimension_semantics<arbitrary>], iteration_bounds = array<i64: 1, 2>, scalar_prefetch = 0 : i64, scratch_operands = 1 : i64, tpu.core_type = #tpu.core_type<tc>, window_params = [{transform_indices = @transform_0, window_bounds = array<i64: 32, 128>}, {transform_indices = @transform_1, window_bounds = array<i64: 1, 1, 128>}, {transform_indices = @transform_2, window_bounds = array<i64: 1, 1, 128>}, {transform_indices = @transform_3, window_bounds = array<i64: 1, 128, 384>}, {transform_indices = @transform_4, window_bounds = array<i64: 1, 128, 128>}, {transform_indices = @transform_5, window_bounds = array<i64: 1, 1, 128>}, {transform_indices = @transform_6, window_bounds = array<i64: 1, 1, 128>}, {transform_indices = @transform_7, window_bounds = array<i64: 1, 1, 128>}, {transform_indices = @transform_8, window_bounds = array<i64: 1, 128, 512>}, {transform_indices = @transform_9, window_bounds = array<i64: 1, 1, 512>}, {transform_indices = @transform_10, window_bounds = array<i64: 1, 512, 128>}, {transform_indices = @transform_11, window_bounds = array<i64: 1, 1, 128>}, {pipeline_mode = #tpu.pipeline_mode<synchronous>, transform_indices = @transform_12, window_bounds = array<i64: 1, 128>}, {pipeline_mode = #tpu.pipeline_mode<synchronous>, transform_indices = @transform_13, window_bounds = array<i64: 1, 128>}, {pipeline_mode = #tpu.pipeline_mode<synchronous>, transform_indices = @transform_14, window_bounds = array<i64: 128, 128>}, {pipeline_mode = #tpu.pipeline_mode<synchronous>, transform_indices = @transform_15, window_bounds = array<i64: 1, 128>}, {transform_indices = @transform_16, window_bounds = array<i64: 32, 128>}]} {
    %c0_i32 = arith.constant 0 : i32
    %0 = arith.cmpi eq, %arg1, %c0_i32 : i32
    %1 = arith.extui %0 : i1 to i32
    %c0_i32_0 = arith.constant 0 : i32
    %2 = arith.cmpi ne, %1, %c0_i32_0 : i32
    scf.if %2 {
      %c0_88 = arith.constant 0 : index
      %c0_89 = arith.constant 0 : index
      %191 = vector.load %arg2[%c0_88, %c0_89] : memref<32x128xf32, #tpu.memory_space<vmem>>, vector<32x128xf32>
      %c0_90 = arith.constant 0 : index
      %c0_91 = arith.constant 0 : index
      %192 = vector.load %arg19[%c0_90, %c0_91] : memref<32x128xf32, #tpu.memory_space<vmem>>, vector<32x128xf32>
      tpu.vector_store %arg19[%c0_90, %c0_91], %191 {strides = array<i32>} : memref<32x128xf32, #tpu.memory_space<vmem>>, vector<32x128xf32>,
    } else {
    }
    %c0 = arith.constant 0 : index
    %c0_1 = arith.constant 0 : index
    %3 = vector.load %arg19[%c0, %c0_1] : memref<32x128xf32, #tpu.memory_space<vmem>>, vector<32x128xf32>
    %c0_2 = arith.constant 0 : index
    %c0_3 = arith.constant 0 : index
    %c0_4 = arith.constant 0 : index
    %4 = vector.load %arg3[%c0_2, %c0_3, %c0_4] : memref<1x1x128xf32, #tpu.memory_space<vmem>>, vector<1x1x128xf32>
    %5 = vector.shape_cast %4 : vector<1x1x128xf32> to vector<1x128xf32>
    %c0_5 = arith.constant 0 : index
    %c0_6 = arith.constant 0 : index
    %c0_7 = arith.constant 0 : index
    %6 = vector.load %arg4[%c0_5, %c0_6, %c0_7] : memref<1x1x128xf32, #tpu.memory_space<vmem>>, vector<1x1x128xf32>
    %7 = vector.shape_cast %6 : vector<1x1x128xf32> to vector<1x128xf32>
    %cst = arith.constant dense<0.000000e+00> : vector<32xf32>
    %8 = vector.multi_reduction <add>, %3, %cst [1] : vector<32x128xf32> to vector<32xf32>
    %9 = vector.shape_cast %8 : vector<32xf32> to vector<32x1xf32>
    %cst_8 = arith.constant 1.280000e+02 : f32
    %10 = vector.broadcast %cst_8 : f32 to vector<32x1xf32>
    %11 = arith.divf %9, %10 : vector<32x1xf32>
    %12 = vector.broadcast %11 : vector<32x1xf32> to vector<32x128xf32>
    %13 = arith.subf %3, %12 : vector<32x128xf32>
    %14 = arith.mulf %13, %13 : vector<32x128xf32>
    %cst_9 = arith.constant dense<0.000000e+00> : vector<32xf32>
    %15 = vector.multi_reduction <add>, %14, %cst_9 [1] : vector<32x128xf32> to vector<32xf32>
    %16 = vector.shape_cast %15 : vector<32xf32> to vector<32x1xf32>
    %cst_10 = arith.constant 1.280000e+02 : f32
    %17 = vector.broadcast %cst_10 : f32 to vector<32x1xf32>
    %18 = arith.divf %16, %17 : vector<32x1xf32>
    %19 = vector.broadcast %11 : vector<32x1xf32> to vector<32x128xf32>
    %20 = arith.subf %3, %19 : vector<32x128xf32>
    %cst_11 = arith.constant 9.99999974E-6 : f32
    %21 = vector.broadcast %cst_11 : f32 to vector<32x1xf32>
    %22 = arith.addf %18, %21 : vector<32x1xf32>
    %23 = math.rsqrt %22 : vector<32x1xf32>
    %24 = vector.broadcast %23 : vector<32x1xf32> to vector<32x128xf32>
    %25 = arith.mulf %20, %24 : vector<32x128xf32>
    %26 = vector.broadcast %5 : vector<1x128xf32> to vector<32x128xf32>
    %27 = arith.mulf %25, %26 : vector<32x128xf32>
    %28 = vector.broadcast %7 : vector<1x128xf32> to vector<32x128xf32>
    %29 = arith.addf %27, %28 : vector<32x128xf32>
    %c0_12 = arith.constant 0 : index
    %c0_13 = arith.constant 0 : index
    %c0_14 = arith.constant 0 : index
    %30 = vector.load %arg5[%c0_12, %c0_13, %c0_14] : memref<1x128x384xf32, #tpu.memory_space<vmem>>, vector<1x128x384xf32>
    %31 = vector.shape_cast %30 : vector<1x128x384xf32> to vector<128x384xf32>
    %cst_15 = arith.constant dense<0.000000e+00> : vector<32x384xf32>
    %32 = tpu.matmul %29, %31, %cst_15 {dimension_numbers = #tpu.dot_dimension_numbers<[1], [0], [0], [1], [0, 0, 1, 1], [], []>} : vector<32x128xf32>, vector<128x384xf32>, vector<32x384xf32> -> vector<32x384xf32>
    %33 = tpu.iota {dimensions = array<i32: 0>} : vector<32x32xi32>
    %34 = tpu.iota {dimensions = array<i32: 1>} : vector<32x32xi32>
    %c4_i32 = arith.constant 4 : i32
    %35 = vector.broadcast %c4_i32 : i32 to vector<32x32xi32>
    %36 = arith.shrsi %33, %35 : vector<32x32xi32>
    %c4_i32_16 = arith.constant 4 : i32
    %37 = vector.broadcast %c4_i32_16 : i32 to vector<32x32xi32>
    %38 = arith.shrsi %34, %37 : vector<32x32xi32>
    %39 = arith.cmpi eq, %36, %38 : vector<32x32xi32>
    %c15_i32 = arith.constant 15 : i32
    %40 = vector.broadcast %c15_i32 : i32 to vector<32x32xi32>
    %41 = arith.andi %33, %40 : vector<32x32xi32>
    %c15_i32_17 = arith.constant 15 : i32
    %42 = vector.broadcast %c15_i32_17 : i32 to vector<32x32xi32>
    %43 = arith.andi %34, %42 : vector<32x32xi32>
    %44 = arith.cmpi sge, %41, %43 : vector<32x32xi32>
    %45 = arith.andi %39, %44 : vector<32x32xi1>
    %cst_18 = arith.constant 0.000000e+00 : f32
    %46 = vector.broadcast %cst_18 : f32 to vector<32x128xf32>
    %47 = vector.extract_strided_slice %32 {offsets = [0, 0], sizes = [32, 32], strides = [1, 1]} : vector<32x384xf32> to vector<32x32xf32>
    %48 = vector.extract_strided_slice %32 {offsets = [0, 128], sizes = [32, 32], strides = [1, 1]} : vector<32x384xf32> to vector<32x32xf32>
    %49 = vector.extract_strided_slice %32 {offsets = [0, 256], sizes = [32, 32], strides = [1, 1]} : vector<32x384xf32> to vector<32x32xf32>
    %cst_19 = arith.constant dense<0.000000e+00> : vector<32x32xf32>
    %50 = tpu.matmul %47, %48, %cst_19 {dimension_numbers = #tpu.dot_dimension_numbers<[1], [1], [0], [0], [0, 0, 1, 0], [], []>} : vector<32x32xf32>, vector<32x32xf32>, vector<32x32xf32> -> vector<32x32xf32>
    %cst_20 = arith.constant 0.0883883461 : f32
    %51 = vector.broadcast %cst_20 : f32 to vector<32x32xf32>
    %52 = arith.mulf %50, %51 : vector<32x32xf32>
    %cst_21 = arith.constant -1.000000e+30 : f32
    %53 = vector.broadcast %cst_21 : f32 to vector<32x32xf32>
    %54 = arith.select %45, %52, %53 : vector<32x32xi1>, vector<32x32xf32>
    %cst_22 = arith.constant dense<0xFF800000> : vector<32xf32>
    %55 = vector.multi_reduction <maximumf>, %54, %cst_22 [1] : vector<32x32xf32> to vector<32xf32>
    %56 = vector.shape_cast %55 : vector<32xf32> to vector<32x1xf32>
    %57 = vector.broadcast %56 : vector<32x1xf32> to vector<32x32xf32>
    %58 = arith.subf %54, %57 : vector<32x32xf32>
    %59 = math.exp %58 : vector<32x32xf32>
    %cst_23 = arith.constant dense<0.000000e+00> : vector<32xf32>
    %60 = vector.multi_reduction <add>, %59, %cst_23 [1] : vector<32x32xf32> to vector<32xf32>
    %61 = vector.shape_cast %60 : vector<32xf32> to vector<32x1xf32>
    %62 = tpu.reciprocal %61 : vector<32x1xf32> -> vector<32x1xf32>
    %63 = vector.broadcast %62 : vector<32x1xf32> to vector<32x32xf32>
    %64 = arith.mulf %59, %63 : vector<32x32xf32>
    %cst_24 = arith.constant dense<0.000000e+00> : vector<32x32xf32>
    %65 = tpu.matmul %64, %49, %cst_24 {dimension_numbers = #tpu.dot_dimension_numbers<[1], [0], [0], [1], [0, 0, 1, 1], [], []>} : vector<32x32xf32>, vector<32x32xf32>, vector<32x32xf32> -> vector<32x32xf32>
    %c0_25 = arith.constant 0 : index
    %c0_26 = arith.constant 0 : index
    %c0_27 = arith.constant 0 : index
    %66 = vector.load %arg6[%c0_25, %c0_26, %c0_27] : memref<1x128x128xf32, #tpu.memory_space<vmem>>, vector<1x32x128xf32>
    %67 = vector.shape_cast %66 : vector<1x32x128xf32> to vector<32x128xf32>
    %cst_28 = arith.constant dense<0.000000e+00> : vector<32x128xf32>
    %68 = tpu.matmul %65, %67, %cst_28 {dimension_numbers = #tpu.dot_dimension_numbers<[1], [0], [0], [1], [0, 0, 1, 1], [], []>} : vector<32x32xf32>, vector<32x128xf32>, vector<32x128xf32> -> vector<32x128xf32>
    %69 = arith.addf %46, %68 : vector<32x128xf32>
    %70 = vector.extract_strided_slice %32 {offsets = [0, 32], sizes = [32, 32], strides = [1, 1]} : vector<32x384xf32> to vector<32x32xf32>
    %71 = vector.extract_strided_slice %32 {offsets = [0, 160], sizes = [32, 32], strides = [1, 1]} : vector<32x384xf32> to vector<32x32xf32>
    %72 = vector.extract_strided_slice %32 {offsets = [0, 288], sizes = [32, 32], strides = [1, 1]} : vector<32x384xf32> to vector<32x32xf32>
    %cst_29 = arith.constant dense<0.000000e+00> : vector<32x32xf32>
    %73 = tpu.matmul %70, %71, %cst_29 {dimension_numbers = #tpu.dot_dimension_numbers<[1], [1], [0], [0], [0, 0, 1, 0], [], []>} : vector<32x32xf32>, vector<32x32xf32>, vector<32x32xf32> -> vector<32x32xf32>
    %cst_30 = arith.constant 0.0883883461 : f32
    %74 = vector.broadcast %cst_30 : f32 to vector<32x32xf32>
    %75 = arith.mulf %73, %74 : vector<32x32xf32>
    %cst_31 = arith.constant -1.000000e+30 : f32
    %76 = vector.broadcast %cst_31 : f32 to vector<32x32xf32>
    %77 = arith.select %45, %75, %76 : vector<32x32xi1>, vector<32x32xf32>
    %cst_32 = arith.constant dense<0xFF800000> : vector<32xf32>
    %78 = vector.multi_reduction <maximumf>, %77, %cst_32 [1] : vector<32x32xf32> to vector<32xf32>
    %79 = vector.shape_cast %78 : vector<32xf32> to vector<32x1xf32>
    %80 = vector.broadcast %79 : vector<32x1xf32> to vector<32x32xf32>
    %81 = arith.subf %77, %80 : vector<32x32xf32>
    %82 = math.exp %81 : vector<32x32xf32>
    %cst_33 = arith.constant dense<0.000000e+00> : vector<32xf32>
    %83 = vector.multi_reduction <add>, %82, %cst_33 [1] : vector<32x32xf32> to vector<32xf32>
    %84 = vector.shape_cast %83 : vector<32xf32> to vector<32x1xf32>
    %85 = tpu.reciprocal %84 : vector<32x1xf32> -> vector<32x1xf32>
    %86 = vector.broadcast %85 : vector<32x1xf32> to vector<32x32xf32>
    %87 = arith.mulf %82, %86 : vector<32x32xf32>
    %cst_34 = arith.constant dense<0.000000e+00> : vector<32x32xf32>
    %88 = tpu.matmul %87, %72, %cst_34 {dimension_numbers = #tpu.dot_dimension_numbers<[1], [0], [0], [1], [0, 0, 1, 1], [], []>} : vector<32x32xf32>, vector<32x32xf32>, vector<32x32xf32> -> vector<32x32xf32>
    %c0_35 = arith.constant 0 : index
    %c32 = arith.constant 32 : index
    %c0_36 = arith.constant 0 : index
    %89 = vector.load %arg6[%c0_35, %c32, %c0_36] : memref<1x128x128xf32, #tpu.memory_space<vmem>>, vector<1x32x128xf32>
    %90 = vector.shape_cast %89 : vector<1x32x128xf32> to vector<32x128xf32>
    %cst_37 = arith.constant dense<0.000000e+00> : vector<32x128xf32>
    %91 = tpu.matmul %88, %90, %cst_37 {dimension_numbers = #tpu.dot_dimension_numbers<[1], [0], [0], [1], [0, 0, 1, 1], [], []>} : vector<32x32xf32>, vector<32x128xf32>, vector<32x128xf32> -> vector<32x128xf32>
    %92 = arith.addf %69, %91 : vector<32x128xf32>
    %93 = vector.extract_strided_slice %32 {offsets = [0, 64], sizes = [32, 32], strides = [1, 1]} : vector<32x384xf32> to vector<32x32xf32>
    %94 = vector.extract_strided_slice %32 {offsets = [0, 192], sizes = [32, 32], strides = [1, 1]} : vector<32x384xf32> to vector<32x32xf32>
    %95 = vector.extract_strided_slice %32 {offsets = [0, 320], sizes = [32, 32], strides = [1, 1]} : vector<32x384xf32> to vector<32x32xf32>
    %cst_38 = arith.constant dense<0.000000e+00> : vector<32x32xf32>
    %96 = tpu.matmul %93, %94, %cst_38 {dimension_numbers = #tpu.dot_dimension_numbers<[1], [1], [0], [0], [0, 0, 1, 0], [], []>} : vector<32x32xf32>, vector<32x32xf32>, vector<32x32xf32> -> vector<32x32xf32>
    %cst_39 = arith.constant 0.0883883461 : f32
    %97 = vector.broadcast %cst_39 : f32 to vector<32x32xf32>
    %98 = arith.mulf %96, %97 : vector<32x32xf32>
    %cst_40 = arith.constant -1.000000e+30 : f32
    %99 = vector.broadcast %cst_40 : f32 to vector<32x32xf32>
    %100 = arith.select %45, %98, %99 : vector<32x32xi1>, vector<32x32xf32>
    %cst_41 = arith.constant dense<0xFF800000> : vector<32xf32>
    %101 = vector.multi_reduction <maximumf>, %100, %cst_41 [1] : vector<32x32xf32> to vector<32xf32>
    %102 = vector.shape_cast %101 : vector<32xf32> to vector<32x1xf32>
    %103 = vector.broadcast %102 : vector<32x1xf32> to vector<32x32xf32>
    %104 = arith.subf %100, %103 : vector<32x32xf32>
    %105 = math.exp %104 : vector<32x32xf32>
    %cst_42 = arith.constant dense<0.000000e+00> : vector<32xf32>
    %106 = vector.multi_reduction <add>, %105, %cst_42 [1] : vector<32x32xf32> to vector<32xf32>
    %107 = vector.shape_cast %106 : vector<32xf32> to vector<32x1xf32>
    %108 = tpu.reciprocal %107 : vector<32x1xf32> -> vector<32x1xf32>
    %109 = vector.broadcast %108 : vector<32x1xf32> to vector<32x32xf32>
    %110 = arith.mulf %105, %109 : vector<32x32xf32>
    %cst_43 = arith.constant dense<0.000000e+00> : vector<32x32xf32>
    %111 = tpu.matmul %110, %95, %cst_43 {dimension_numbers = #tpu.dot_dimension_numbers<[1], [0], [0], [1], [0, 0, 1, 1], [], []>} : vector<32x32xf32>, vector<32x32xf32>, vector<32x32xf32> -> vector<32x32xf32>
    %c0_44 = arith.constant 0 : index
    %c64 = arith.constant 64 : index
    %c0_45 = arith.constant 0 : index
    %112 = vector.load %arg6[%c0_44, %c64, %c0_45] : memref<1x128x128xf32, #tpu.memory_space<vmem>>, vector<1x32x128xf32>
    %113 = vector.shape_cast %112 : vector<1x32x128xf32> to vector<32x128xf32>
    %cst_46 = arith.constant dense<0.000000e+00> : vector<32x128xf32>
    %114 = tpu.matmul %111, %113, %cst_46 {dimension_numbers = #tpu.dot_dimension_numbers<[1], [0], [0], [1], [0, 0, 1, 1], [], []>} : vector<32x32xf32>, vector<32x128xf32>, vector<32x128xf32> -> vector<32x128xf32>
    %115 = arith.addf %92, %114 : vector<32x128xf32>
    %116 = vector.extract_strided_slice %32 {offsets = [0, 96], sizes = [32, 32], strides = [1, 1]} : vector<32x384xf32> to vector<32x32xf32>
    %117 = vector.extract_strided_slice %32 {offsets = [0, 224], sizes = [32, 32], strides = [1, 1]} : vector<32x384xf32> to vector<32x32xf32>
    %118 = vector.extract_strided_slice %32 {offsets = [0, 352], sizes = [32, 32], strides = [1, 1]} : vector<32x384xf32> to vector<32x32xf32>
    %cst_47 = arith.constant dense<0.000000e+00> : vector<32x32xf32>
    %119 = tpu.matmul %116, %117, %cst_47 {dimension_numbers = #tpu.dot_dimension_numbers<[1], [1], [0], [0], [0, 0, 1, 0], [], []>} : vector<32x32xf32>, vector<32x32xf32>, vector<32x32xf32> -> vector<32x32xf32>
    %cst_48 = arith.constant 0.0883883461 : f32
    %120 = vector.broadcast %cst_48 : f32 to vector<32x32xf32>
    %121 = arith.mulf %119, %120 : vector<32x32xf32>
    %cst_49 = arith.constant -1.000000e+30 : f32
    %122 = vector.broadcast %cst_49 : f32 to vector<32x32xf32>
    %123 = arith.select %45, %121, %122 : vector<32x32xi1>, vector<32x32xf32>
    %cst_50 = arith.constant dense<0xFF800000> : vector<32xf32>
    %124 = vector.multi_reduction <maximumf>, %123, %cst_50 [1] : vector<32x32xf32> to vector<32xf32>
    %125 = vector.shape_cast %124 : vector<32xf32> to vector<32x1xf32>
    %126 = vector.broadcast %125 : vector<32x1xf32> to vector<32x32xf32>
    %127 = arith.subf %123, %126 : vector<32x32xf32>
    %128 = math.exp %127 : vector<32x32xf32>
    %cst_51 = arith.constant dense<0.000000e+00> : vector<32xf32>
    %129 = vector.multi_reduction <add>, %128, %cst_51 [1] : vector<32x32xf32> to vector<32xf32>
    %130 = vector.shape_cast %129 : vector<32xf32> to vector<32x1xf32>
    %131 = tpu.reciprocal %130 : vector<32x1xf32> -> vector<32x1xf32>
    %132 = vector.broadcast %131 : vector<32x1xf32> to vector<32x32xf32>
    %133 = arith.mulf %128, %132 : vector<32x32xf32>
    %cst_52 = arith.constant dense<0.000000e+00> : vector<32x32xf32>
    %134 = tpu.matmul %133, %118, %cst_52 {dimension_numbers = #tpu.dot_dimension_numbers<[1], [0], [0], [1], [0, 0, 1, 1], [], []>} : vector<32x32xf32>, vector<32x32xf32>, vector<32x32xf32> -> vector<32x32xf32>
    %c0_53 = arith.constant 0 : index
    %c96 = arith.constant 96 : index
    %c0_54 = arith.constant 0 : index
    %135 = vector.load %arg6[%c0_53, %c96, %c0_54] : memref<1x128x128xf32, #tpu.memory_space<vmem>>, vector<1x32x128xf32>
    %136 = vector.shape_cast %135 : vector<1x32x128xf32> to vector<32x128xf32>
    %cst_55 = arith.constant dense<0.000000e+00> : vector<32x128xf32>
    %137 = tpu.matmul %134, %136, %cst_55 {dimension_numbers = #tpu.dot_dimension_numbers<[1], [0], [0], [1], [0, 0, 1, 1], [], []>} : vector<32x32xf32>, vector<32x128xf32>, vector<32x128xf32> -> vector<32x128xf32>
    %138 = arith.addf %115, %137 : vector<32x128xf32>
    %139 = arith.addf %3, %138 : vector<32x128xf32>
    %c0_56 = arith.constant 0 : index
    %c0_57 = arith.constant 0 : index
    %c0_58 = arith.constant 0 : index
    %140 = vector.load %arg7[%c0_56, %c0_57, %c0_58] : memref<1x1x128xf32, #tpu.memory_space<vmem>>, vector<1x1x128xf32>
    %141 = vector.shape_cast %140 : vector<1x1x128xf32> to vector<1x128xf32>
    %142 = vector.broadcast %141 : vector<1x128xf32> to vector<32x128xf32>
    %143 = arith.addf %139, %142 : vector<32x128xf32>
    %c0_59 = arith.constant 0 : index
    %c0_60 = arith.constant 0 : index
    %c0_61 = arith.constant 0 : index
    %144 = vector.load %arg8[%c0_59, %c0_60, %c0_61] : memref<1x1x128xf32, #tpu.memory_space<vmem>>, vector<1x1x128xf32>
    %145 = vector.shape_cast %144 : vector<1x1x128xf32> to vector<1x128xf32>
    %c0_62 = arith.constant 0 : index
    %c0_63 = arith.constant 0 : index
    %c0_64 = arith.constant 0 : index
    %146 = vector.load %arg9[%c0_62, %c0_63, %c0_64] : memref<1x1x128xf32, #tpu.memory_space<vmem>>, vector<1x1x128xf32>
    %147 = vector.shape_cast %146 : vector<1x1x128xf32> to vector<1x128xf32>
    %cst_65 = arith.constant dense<0.000000e+00> : vector<32xf32>
    %148 = vector.multi_reduction <add>, %143, %cst_65 [1] : vector<32x128xf32> to vector<32xf32>
    %149 = vector.shape_cast %148 : vector<32xf32> to vector<32x1xf32>
    %cst_66 = arith.constant 1.280000e+02 : f32
    %150 = vector.broadcast %cst_66 : f32 to vector<32x1xf32>
    %151 = arith.divf %149, %150 : vector<32x1xf32>
    %152 = vector.broadcast %151 : vector<32x1xf32> to vector<32x128xf32>
    %153 = arith.subf %143, %152 : vector<32x128xf32>
    %154 = arith.mulf %153, %153 : vector<32x128xf32>
    %cst_67 = arith.constant dense<0.000000e+00> : vector<32xf32>
    %155 = vector.multi_reduction <add>, %154, %cst_67 [1] : vector<32x128xf32> to vector<32xf32>
    %156 = vector.shape_cast %155 : vector<32xf32> to vector<32x1xf32>
    %cst_68 = arith.constant 1.280000e+02 : f32
    %157 = vector.broadcast %cst_68 : f32 to vector<32x1xf32>
    %158 = arith.divf %156, %157 : vector<32x1xf32>
    %159 = vector.broadcast %151 : vector<32x1xf32> to vector<32x128xf32>
    %160 = arith.subf %143, %159 : vector<32x128xf32>
    %cst_69 = arith.constant 9.99999974E-6 : f32
    %161 = vector.broadcast %cst_69 : f32 to vector<32x1xf32>
    %162 = arith.addf %158, %161 : vector<32x1xf32>
    %163 = math.rsqrt %162 : vector<32x1xf32>
    %164 = vector.broadcast %163 : vector<32x1xf32> to vector<32x128xf32>
    %165 = arith.mulf %160, %164 : vector<32x128xf32>
    %166 = vector.broadcast %145 : vector<1x128xf32> to vector<32x128xf32>
    %167 = arith.mulf %165, %166 : vector<32x128xf32>
    %168 = vector.broadcast %147 : vector<1x128xf32> to vector<32x128xf32>
    %169 = arith.addf %167, %168 : vector<32x128xf32>
    %c0_70 = arith.constant 0 : index
    %c0_71 = arith.constant 0 : index
    %c0_72 = arith.constant 0 : index
    %170 = vector.load %arg10[%c0_70, %c0_71, %c0_72] : memref<1x128x512xf32, #tpu.memory_space<vmem>>, vector<1x128x512xf32>
    %171 = vector.shape_cast %170 : vector<1x128x512xf32> to vector<128x512xf32>
    %cst_73 = arith.constant dense<0.000000e+00> : vector<32x512xf32>
    %172 = tpu.matmul %169, %171, %cst_73 {dimension_numbers = #tpu.dot_dimension_numbers<[1], [0], [0], [1], [0, 0, 1, 1], [], []>} : vector<32x128xf32>, vector<128x512xf32>, vector<32x512xf32> -> vector<32x512xf32>
    %c0_74 = arith.constant 0 : index
    %c0_75 = arith.constant 0 : index
    %c0_76 = arith.constant 0 : index
    %173 = vector.load %arg11[%c0_74, %c0_75, %c0_76] : memref<1x1x512xf32, #tpu.memory_space<vmem>>, vector<1x1x512xf32>
    %174 = vector.shape_cast %173 : vector<1x1x512xf32> to vector<1x512xf32>
    %175 = vector.broadcast %174 : vector<1x512xf32> to vector<32x512xf32>
    %176 = arith.addf %172, %175 : vector<32x512xf32>
    %cst_77 = arith.constant 0.000000e+00 : f32
    %177 = vector.broadcast %cst_77 : f32 to vector<32x512xf32>
    %178 = arith.maximumf %176, %177 : vector<32x512xf32>
    %c0_78 = arith.constant 0 : index
    %c0_79 = arith.constant 0 : index
    %c0_80 = arith.constant 0 : index
    %179 = vector.load %arg12[%c0_78, %c0_79, %c0_80] : memref<1x512x128xf32, #tpu.memory_space<vmem>>, vector<1x512x128xf32>
    %180 = vector.shape_cast %179 : vector<1x512x128xf32> to vector<512x128xf32>
    %cst_81 = arith.constant dense<0.000000e+00> : vector<32x128xf32>
    %181 = tpu.matmul %178, %180, %cst_81 {dimension_numbers = #tpu.dot_dimension_numbers<[1], [0], [0], [1], [0, 0, 1, 1], [], []>} : vector<32x512xf32>, vector<512x128xf32>, vector<32x128xf32> -> vector<32x128xf32>
    %c0_82 = arith.constant 0 : index
    %c0_83 = arith.constant 0 : index
    %c0_84 = arith.constant 0 : index
    %182 = vector.load %arg13[%c0_82, %c0_83, %c0_84] : memref<1x1x128xf32, #tpu.memory_space<vmem>>, vector<1x1x128xf32>
    %183 = vector.shape_cast %182 : vector<1x1x128xf32> to vector<1x128xf32>
    %184 = vector.broadcast %183 : vector<1x128xf32> to vector<32x128xf32>
    %185 = arith.addf %181, %184 : vector<32x128xf32>
    %186 = arith.addf %143, %185 : vector<32x128xf32>
    %c0_85 = arith.constant 0 : index
    %c0_86 = arith.constant 0 : index
    %187 = vector.load %arg19[%c0_85, %c0_86] : memref<32x128xf32, #tpu.memory_space<vmem>>, vector<32x128xf32>
    tpu.vector_store %arg19[%c0_85, %c0_86], %186 {strides = array<i32>} : memref<32x128xf32, #tpu.memory_space<vmem>>, vector<32x128xf32>,
    %c1_i32 = arith.constant 1 : i32
    %188 = arith.cmpi eq, %arg1, %c1_i32 : i32
    %189 = arith.extui %188 : i1 to i32
    %c0_i32_87 = arith.constant 0 : i32
    %190 = arith.cmpi ne, %189, %c0_i32_87 : i32
    scf.if %190 {
      %c0_88 = arith.constant 0 : index
      %c0_89 = arith.constant 0 : index
      %191 = vector.load %arg14[%c0_88, %c0_89] : memref<1x128xf32, #tpu.memory_space<vmem>>, vector<1x128xf32>
      %c0_90 = arith.constant 0 : index
      %c0_91 = arith.constant 0 : index
      %192 = vector.load %arg15[%c0_90, %c0_91] : memref<1x128xf32, #tpu.memory_space<vmem>>, vector<1x128xf32>
      %cst_92 = arith.constant dense<0.000000e+00> : vector<32xf32>
      %193 = vector.multi_reduction <add>, %186, %cst_92 [1] : vector<32x128xf32> to vector<32xf32>
      %194 = vector.shape_cast %193 : vector<32xf32> to vector<32x1xf32>
      %cst_93 = arith.constant 1.280000e+02 : f32
      %195 = vector.broadcast %cst_93 : f32 to vector<32x1xf32>
      %196 = arith.divf %194, %195 : vector<32x1xf32>
      %197 = vector.broadcast %196 : vector<32x1xf32> to vector<32x128xf32>
      %198 = arith.subf %186, %197 : vector<32x128xf32>
      %199 = arith.mulf %198, %198 : vector<32x128xf32>
      %cst_94 = arith.constant dense<0.000000e+00> : vector<32xf32>
      %200 = vector.multi_reduction <add>, %199, %cst_94 [1] : vector<32x128xf32> to vector<32xf32>
      %201 = vector.shape_cast %200 : vector<32xf32> to vector<32x1xf32>
      %cst_95 = arith.constant 1.280000e+02 : f32
      %202 = vector.broadcast %cst_95 : f32 to vector<32x1xf32>
      %203 = arith.divf %201, %202 : vector<32x1xf32>
      %204 = vector.broadcast %196 : vector<32x1xf32> to vector<32x128xf32>
      %205 = arith.subf %186, %204 : vector<32x128xf32>
      %cst_96 = arith.constant 9.99999974E-6 : f32
      %206 = vector.broadcast %cst_96 : f32 to vector<32x1xf32>
      %207 = arith.addf %203, %206 : vector<32x1xf32>
      %208 = math.rsqrt %207 : vector<32x1xf32>
      %209 = vector.broadcast %208 : vector<32x1xf32> to vector<32x128xf32>
      %210 = arith.mulf %205, %209 : vector<32x128xf32>
      %211 = vector.broadcast %191 : vector<1x128xf32> to vector<32x128xf32>
      %212 = arith.mulf %210, %211 : vector<32x128xf32>
      %213 = vector.broadcast %192 : vector<1x128xf32> to vector<32x128xf32>
      %214 = arith.addf %212, %213 : vector<32x128xf32>
      %c0_97 = arith.constant 0 : index
      %c0_98 = arith.constant 0 : index
      %215 = vector.load %arg16[%c0_97, %c0_98] : memref<128x128xf32, #tpu.memory_space<vmem>>, vector<128x128xf32>
      %cst_99 = arith.constant dense<0.000000e+00> : vector<32x128xf32>
      %216 = tpu.matmul %214, %215, %cst_99 {dimension_numbers = #tpu.dot_dimension_numbers<[1], [0], [0], [1], [0, 0, 1, 1], [], []>} : vector<32x128xf32>, vector<128x128xf32>, vector<32x128xf32> -> vector<32x128xf32>
      %c0_100 = arith.constant 0 : index
      %c0_101 = arith.constant 0 : index
      %217 = vector.load %arg17[%c0_100, %c0_101] : memref<1x128xf32, #tpu.memory_space<vmem>>, vector<1x128xf32>
      %218 = vector.broadcast %217 : vector<1x128xf32> to vector<32x128xf32>
      %219 = arith.addf %216, %218 : vector<32x128xf32>
      %c0_102 = arith.constant 0 : index
      %c0_103 = arith.constant 0 : index
      %220 = vector.load %arg18[%c0_102, %c0_103] : memref<32x128xf32, #tpu.memory_space<vmem>>, vector<32x128xf32>
      tpu.vector_store %arg18[%c0_102, %c0_103], %219 {strides = array<i32>} : memref<32x128xf32, #tpu.memory_space<vmem>>, vector<32x128xf32>,
    } else {
    }
    return
  }
  func.func @transform_0(%arg0: i32, %arg1: i32) -> (i32, i32) {
    %c0_i32 = arith.constant 0 : i32
    %c0_i32_0 = arith.constant 0 : i32
    return %arg0, %c0_i32 : i32, i32
  }
  func.func @transform_1(%arg0: i32, %arg1: i32) -> (i32, i32, i32) {
    %c0_i32 = arith.constant 0 : i32
    %c0_i32_0 = arith.constant 0 : i32
    %c0_i32_1 = arith.constant 0 : i32
    return %arg1, %c0_i32, %c0_i32_0 : i32, i32, i32
  }
  func.func @transform_2(%arg0: i32, %arg1: i32) -> (i32, i32, i32) {
    %c0_i32 = arith.constant 0 : i32
    %c0_i32_0 = arith.constant 0 : i32
    %c0_i32_1 = arith.constant 0 : i32
    return %arg1, %c0_i32, %c0_i32_0 : i32, i32, i32
  }
  func.func @transform_3(%arg0: i32, %arg1: i32) -> (i32, i32, i32) {
    %c0_i32 = arith.constant 0 : i32
    %c0_i32_0 = arith.constant 0 : i32
    %c0_i32_1 = arith.constant 0 : i32
    return %arg1, %c0_i32, %c0_i32_0 : i32, i32, i32
  }
  func.func @transform_4(%arg0: i32, %arg1: i32) -> (i32, i32, i32) {
    %c0_i32 = arith.constant 0 : i32
    %c0_i32_0 = arith.constant 0 : i32
    %c0_i32_1 = arith.constant 0 : i32
    return %arg1, %c0_i32, %c0_i32_0 : i32, i32, i32
  }
  func.func @transform_5(%arg0: i32, %arg1: i32) -> (i32, i32, i32) {
    %c0_i32 = arith.constant 0 : i32
    %c0_i32_0 = arith.constant 0 : i32
    %c0_i32_1 = arith.constant 0 : i32
    return %arg1, %c0_i32, %c0_i32_0 : i32, i32, i32
  }
  func.func @transform_6(%arg0: i32, %arg1: i32) -> (i32, i32, i32) {
    %c0_i32 = arith.constant 0 : i32
    %c0_i32_0 = arith.constant 0 : i32
    %c0_i32_1 = arith.constant 0 : i32
    return %arg1, %c0_i32, %c0_i32_0 : i32, i32, i32
  }
  func.func @transform_7(%arg0: i32, %arg1: i32) -> (i32, i32, i32) {
    %c0_i32 = arith.constant 0 : i32
    %c0_i32_0 = arith.constant 0 : i32
    %c0_i32_1 = arith.constant 0 : i32
    return %arg1, %c0_i32, %c0_i32_0 : i32, i32, i32
  }
  func.func @transform_8(%arg0: i32, %arg1: i32) -> (i32, i32, i32) {
    %c0_i32 = arith.constant 0 : i32
    %c0_i32_0 = arith.constant 0 : i32
    %c0_i32_1 = arith.constant 0 : i32
    return %arg1, %c0_i32, %c0_i32_0 : i32, i32, i32
  }
  func.func @transform_9(%arg0: i32, %arg1: i32) -> (i32, i32, i32) {
    %c0_i32 = arith.constant 0 : i32
    %c0_i32_0 = arith.constant 0 : i32
    %c0_i32_1 = arith.constant 0 : i32
    return %arg1, %c0_i32, %c0_i32_0 : i32, i32, i32
  }
  func.func @transform_10(%arg0: i32, %arg1: i32) -> (i32, i32, i32) {
    %c0_i32 = arith.constant 0 : i32
    %c0_i32_0 = arith.constant 0 : i32
    %c0_i32_1 = arith.constant 0 : i32
    return %arg1, %c0_i32, %c0_i32_0 : i32, i32, i32
  }
  func.func @transform_11(%arg0: i32, %arg1: i32) -> (i32, i32, i32) {
    %c0_i32 = arith.constant 0 : i32
    %c0_i32_0 = arith.constant 0 : i32
    %c0_i32_1 = arith.constant 0 : i32
    return %arg1, %c0_i32, %c0_i32_0 : i32, i32, i32
  }
  func.func @transform_12(%arg0: i32, %arg1: i32) -> (i32, i32) {
    %c0_i32 = arith.constant 0 : i32
    %c0_i32_0 = arith.constant 0 : i32
    %c0_i32_1 = arith.constant 0 : i32
    return %c0_i32, %c0_i32_0 : i32, i32
  }
  func.func @transform_13(%arg0: i32, %arg1: i32) -> (i32, i32) {
    %c0_i32 = arith.constant 0 : i32
    %c0_i32_0 = arith.constant 0 : i32
    %c0_i32_1 = arith.constant 0 : i32
    return %c0_i32, %c0_i32_0 : i32, i32
  }
  func.func @transform_14(%arg0: i32, %arg1: i32) -> (i32, i32) {
    %c0_i32 = arith.constant 0 : i32
    %c0_i32_0 = arith.constant 0 : i32
    %c0_i32_1 = arith.constant 0 : i32
    return %c0_i32, %c0_i32_0 : i32, i32
  }
  func.func @transform_15(%arg0: i32, %arg1: i32) -> (i32, i32) {
    %c0_i32 = arith.constant 0 : i32
    %c0_i32_0 = arith.constant 0 : i32
    %c0_i32_1 = arith.constant 0 : i32
    return %c0_i32, %c0_i32_0 : i32, i32
  }
  func.func @transform_16(%arg0: i32, %arg1: i32) -> (i32, i32) {
    %c0_i32 = arith.constant 0 : i32
    %c0_i32_0 = arith.constant 0 : i32
    return %arg0, %c0_i32 : i32, i32
  }
}

</mosaic_0001>

<bundles_post_ra>
// kernel: tpu_custom_call.1
= control target key start
LH: loop header
LB: loop body
LE: loop exit
PB: predicated region body
PF: predicated region fallthrough
CT: control target
= control target key end

     0   :  { %s5197_s0 = inlined_call_operand.hbm [shape: f32[32,128], index: 0, kind: input, shape index: {}]   ;;  %s5198_s1 = inlined_call_operand.hbm [shape: f32[2,1,128], index: 1, kind: input, shape index: {}]   ;;  %s5199_s2 = inlined_call_operand.hbm [shape: f32[2,1,128], index: 2, kind: input, shape index: {}]   ;;  %s5200_s3 = inlined_call_operand.hbm [shape: f32[2,128,384], index: 3, kind: input, shape index: {}]   ;;  %s5201_s4 = inlined_call_operand.hbm [shape: f32[2,128,128], index: 4, kind: input, shape index: {}]   ;;  %s5202_s5 = inlined_call_operand.hbm [shape: f32[2,1,128], index: 5, kind: input, shape index: {}]   ;;  %s5203_s6 = inlined_call_operand.hbm [shape: f32[2,1,128], index: 6, kind: input, shape index: {}]   ;;  %s5204_s7 = inlined_call_operand.hbm [shape: f32[2,1,128], index: 7, kind: input, shape index: {}]   ;;  %s5205_s8 = inlined_call_operand.hbm [shape: f32[2,128,512], index: 8, kind: input, shape index: {}]   ;;  %s5206_s9 = inlined_call_operand.vmem [shape: f32[2,1,512], index: 9, kind: input, shape index: {}]   ;;  %s5207_s10 = inlined_call_operand.hbm [shape: f32[2,512,128], index: 10, kind: input, shape index: {}]   ;;  %s5208_s11 = inlined_call_operand.vmem [shape: f32[2,1,128], index: 11, kind: input, shape index: {}]   ;;  %s5209_s12 = inlined_call_operand.vmem [shape: f32[1,128], index: 12, kind: input, shape index: {}]   ;;  %s5210_s13 = inlined_call_operand.vmem [shape: f32[1,128], index: 13, kind: input, shape index: {}]   ;;  %s5211_s14 = inlined_call_operand.hbm [shape: f32[128,128], index: 14, kind: input, shape index: {}]   ;;  %s5212_s15 = inlined_call_operand.vmem [shape: f32[1,128], index: 15, kind: input, shape index: {}]   ;;  %s5213_s16 = inlined_call_operand.hbm [shape: f32[32,128], index: 16, kind: output, shape index: {}]  }
   0x1   :  { %5226 = sst [smem:[#allocation35_spill]] %s5197_s0 }
   0x2   :  { %5227 = sst [smem:[#allocation36_spill]] %s5198_s1 }
   0x3   :  { %5228 = sst [smem:[#allocation37_spill]] %s5199_s2 }
   0x4   :  { %5229 = sst [smem:[#allocation38_spill]] %s5200_s3 }
   0x5   :  { %5230 = sst [smem:[#allocation39_spill]] %s5206_s9 }
   0x6   :  { %5231 = sst [smem:[#allocation40_spill]] %s5208_s11 }
   0x7   :  { %5232 = sst [smem:[#allocation41_spill]] %s5209_s12 }
   0x8   :  { %5233 = sst [smem:[#allocation42_spill]] %s5210_s13 }
   0x9   :  { %5234 = sst [smem:[#allocation43_spill]] %s5211_s14 }
   0xa   :  { %5235 = sst [smem:[#allocation44_spill]] %s5212_s15 }
   0xb   :  { %5236 = sst [smem:[#allocation45_spill]] %s5213_s16 }
   0xc   :  { %21 = vsyncpa [#allocation4], 0 }
   0xd   :  { %22 = vsyncpa [#allocation7], 0 }
   0xe   :  { %24 = vsyncpa [#allocation7 + $0x1], 0 }
   0xf   :  { %25 = vsyncpa [#allocation10], 0 }
  0x10   :  { %27 = vsyncpa [#allocation10 + $0x1], 0 }
  0x11   :  { %28 = vsyncpa [#allocation13], 0 }
  0x12   :  { %30 = vsyncpa [#allocation13 + $0x1], 0 }
  0x13   :  { %31 = vsyncpa [#allocation16], 0 }
  0x14   :  { %33 = vsyncpa [#allocation16 + $0x1], 0 }
  0x15   :  { %34 = vsyncpa [#allocation19], 0 }
  0x16   :  { %36 = vsyncpa [#allocation19 + $0x1], 0 }
  0x17   :  { %37 = vsyncpa [#allocation5], 0  ;;  %s4128_s21 = smov 0   ;;  %s4130_s22 = smov 0  }
  0x18   :  { %s4132_s23 = smov 0   ;;  %s4134_s24 = smov 0  }
  0x19   :  { %s4136_s25 = smov 0   ;;  %s4138_s26 = smov 0  }
  0x1a LB: > { %5237 = sst [smem:[#allocation30_spill]] %s4014_s23  ;;  %s4157_s27 = sadd.s32 4294967295, %s4026_s26   ;;  %s4026_s26 = sphi %s4138_s26, %s43_s26   ;;  %s4022_s25 = sphi %s4136_s25, %s5288_s25   ;;  %s4018_s24 = sphi %s4134_s24, %s5287_s24   ;;  %s4014_s23 = sphi %s4132_s23, %s5283_s23   ;;  %s4010_s22 = sphi %s4130_s22, %s5286_s22   ;;  %s4006_s21 = sphi %s4128_s21, %s5285_s21  }
  0x1b   : > { %5238 = sst [smem:[#allocation31_spill]] %s4018_s24  ;;  %s52_s28 = sadd.s32 1, %s4022_s25 }
  0x1c   : > { %5239 = sst [smem:[#allocation32_spill]] %s4026_s26  ;;  %p53_p0 = scmp.ge.s32.totalorder %s52_s28, 2 }
  0x1d   : > { %s88_s29 = sadd.s32 1, %s4014_s23  ;;  %p95_p1 = scmp.ne.s32.totalorder %s4014_s23, %s4010_s22 }
  0x1e   : > { %p96_p2 = scmp.eq.s32.totalorder %s4026_s26, 0  ;;  %s5290_s28 = smov (%p53_p0, %s52_s28), 0 }
  0x1f   : > { %5240 = sst [smem:[#allocation33_spill]] %s5290_s28  ;;  %p101_p4 = scmp.ne.s32.totalorder %s4010_s22, %s4006_s21 }
  0x20   : > { %p4166_p3 = por %p96_p2, %p95_p1  ;;  %s85_s0 = ssub.s32 %s4022_s25, %s5290_s28 }
  0x21   : > { %p102_p5 = scmp.eq.s32.totalorder %s4157_s27, 0  ;;  %p86_p6 = scmp.eq.s32.totalorder %s85_s0, 0 }
  0x22   : > { %p3169_p7 = scmp.ge.s32.totalorder %s4026_s26, 1  ;;  %p482_p9 = scmp.lt.s32.totalorder %s4026_s26, 3 }
  0x23   : > { %p4177_p8 = por %p102_p5, %p101_p4  ;;  %s5245_s14 = sld [smem:[#allocation43_spill]] }
  0x24   : > { %s4183_s18 = scalar_select %p86_p6, %s4014_s23, %s88_s29  }
  0x25   : > { %p4185_p10 = pnand %p3169_p7, %p482_p9  ;;  %s4028_s29 = smov [#allocation20]  }
  0x26   : > { %5243 = sst [smem:[#allocation34_spill]] %s4183_s18  ;;  %s518_s18 = sshll.u32 %s4028_s29, 4  ;;  %s519_s18 = int_to_ptr.vmem [resolvable:$true] %s518_s18 }
  0x27   : > { %p3352_p11 = pneg %p4185_p10  ;;  %p3389_p13 = scmp.lt.s32.totalorder %s4026_s26, 2 }
  0x28   : > { %s5215_s16 = smov 128   ;;  %s5217_s15 = smov 8  }
  0x29   : > { %s516_s0 = sshll.u32 %s5245_s14, 4  ;;  %p4196_p12 = pnand %p3352_p11, %p102_p5  ;;  %s517_s0 = int_to_ptr.hbm [resolvable:$true] %s516_s0 }
  0x2a   : > { %p4208_p0 = pnand %p3389_p13, %p4166_p3  ;;  %s4213_s21 = sand.u32 1, %s4026_s26  }
  0x2b   : > { %3358 = dma.hbm_to_vmem [thread:$0]  (!%p4196_p12), %s517_s0, 2048, %s519_s18, [#allocation19], %s5215_s16, %s5215_s16, %s5217_s15  }
  0x2c   : > { %s4216_s29 = sand.u32 1, %s4014_s23   ;;  %s5248_s1 = sld [smem:[#allocation36_spill]] }
  0x2d   : > { %s538_s18 = scalar_lea.vmem [#allocation6], %s4216_s29  ;;  %s5222_s16 = scalar_lea.sflag [#allocation7], %s4213_s21 }
  0x2e   : > { %s545_s30 = sshll.u32 %s538_s18, 4  ;;  %s3319_s15 = smul.u32 384, %s4216_s29  ;;  %s546_s30 = int_to_ptr.vmem [resolvable:$true] %s545_s30 }
  0x2f   : > { %s3320_s23 = smul.u32 384, %s4022_s25  ;;  %s5249_s3 = sld [smem:[#allocation38_spill]] }
  0x30   : > { %s573_s26 = scalar_lea.vmem [#allocation9], %s3319_s15  ;;  %s5224_s9 = scalar_lea.sflag [#allocation10], %s4213_s21 }
  0x31   : > { %s4031_s11 = smov 384   ;;  %s4032_s24 = smov 24  }
  0x32   : > { %s541_s12 = scalar_lea.hbm %s5248_s1, %s4022_s25  ;;  %s619_s15 = scalar_lea.hbm %s5202_s5, %s4022_s25 }
  0x33   : > { %s543_s0 = sshll.u32 %s541_s12, 4  ;;  %s581_s12 = sshll.u32 %s573_s26, 4  ;;  %s544_s0 = int_to_ptr.hbm [resolvable:$true] %s543_s0  ;;  %s582_s12 = int_to_ptr.vmem [resolvable:$true] %s581_s12 }
  0x34   : > { %3362 = dma.hbm_to_vmem [thread:$0]  (!%p4208_p0), %s544_s0, 16, %s546_s30, %s5222_s16  }
  0x35   : > { %s578_s1 = scalar_lea.hbm %s5249_s3, %s3320_s23  ;;  %s616_s23 = scalar_lea.vmem [#allocation12], %s4216_s29 }
  0x36   : > { %s579_s18 = sshll.u32 %s578_s1, 4  ;;  %s623_s26 = sshll.u32 %s616_s23, 4  ;;  %s580_s18 = int_to_ptr.hbm [resolvable:$true] %s579_s18  ;;  %s624_s26 = int_to_ptr.vmem [resolvable:$true] %s623_s26 }
  0x37   : > { %3368 = dma.hbm_to_vmem [thread:$0]  (!%p4208_p0), %s580_s18, 6144, %s582_s12, %s5224_s9, %s4031_s11, %s4031_s11, %s4032_s24  }
  0x38   : > { %s621_s13 = sshll.u32 %s619_s15, 4  ;;  %s5223_s1 = scalar_lea.sflag [#allocation13], %s4213_s21  ;;  %s622_s13 = int_to_ptr.hbm [resolvable:$true] %s621_s13 }
  0x39   : > { %3374 = dma.hbm_to_vmem [thread:$0]  (!%p4208_p0), %s622_s13, 16, %s624_s26, %s5223_s1  }
  0x3a   : > { %s653_s11 = scalar_lea.hbm %s5204_s7, %s4022_s25  ;;  %s650_s12 = scalar_lea.vmem [#allocation15], %s4216_s29 }
  0x3b   : > { %s655_s24 = sshll.u32 %s653_s11, 4  ;;  %s657_s18 = sshll.u32 %s650_s12, 4  ;;  %s656_s24 = int_to_ptr.hbm [resolvable:$true] %s655_s24  ;;  %s658_s18 = int_to_ptr.vmem [resolvable:$true] %s657_s18 }
  0x3c   : > { %s5225_s30 = scalar_lea.sflag [#allocation16], %s4213_s21  ;;  %s5250_s23 = sld [smem:[#allocation35_spill]] }
  0x3d   : > { %3380 = dma.hbm_to_vmem [thread:$0]  (!%p4208_p0), %s656_s24, 16, %s658_s18, %s5225_s30  }
  0x3e   : > { %s4033_s26 = smov [#allocation3]   ;;  %s5251_s2 = sld [smem:[#allocation37_spill]] }
  0x3f   : > { %s498_s13 = sshll.u32 %s4033_s26, 4  ;;  %s5252_s9 = smov 8   ;;  %s499_s13 = int_to_ptr.vmem [resolvable:$true] %s498_s13 }
  0x40   : > { %s5253_s3 = smov 128   ;;  %s555_s24 = scalar_lea.vmem [#allocation8], %s4216_s29 }
  0x41   : > { %s562_s18 = sshll.u32 %s555_s24, 4  ;;  %s3174_s0 = sshll.u32 %s4216_s29, 7  ;;  %s563_s18 = int_to_ptr.vmem [resolvable:$true] %s562_s18 }
  0x42   : > { %s496_s16 = sshll.u32 %s5250_s23, 4  ;;  %s5254_s15 = scalar_lea.sflag [#allocation7], %s4213_s21  ;;  %s497_s16 = int_to_ptr.hbm [resolvable:$true] %s496_s16 }
  0x43   : > { %3355 = dma.hbm_to_vmem [thread:$0]  (!%p4196_p12), %s497_s16, 512, %s499_s13, [#allocation4], %s5253_s3, %s5253_s3, %s5252_s9  }
  0x44   : > { %s558_s12 = scalar_lea.hbm %s5251_s2, %s4022_s25  ;;  %s3260_s23 = sshll.u32 %s4022_s25, 7 }
  0x45   : > { %s560_s1 = sshll.u32 %s558_s12, 4  ;;  %s600_s14 = scalar_lea.hbm %s5201_s4, %s3260_s23  ;;  %s561_s1 = int_to_ptr.hbm [resolvable:$true] %s560_s1 }
  0x46   : > { %3365 = dma.hbm_to_vmem [thread:$0]  (!%p4208_p0), %s561_s1, 16, %s563_s18, %s5254_s15  }
  0x47   : > { %s595_s11 = scalar_lea.vmem [#allocation11], %s3174_s0  ;;  %s601_s13 = sshll.u32 %s600_s14, 4  ;;  %s602_s13 = int_to_ptr.hbm [resolvable:$true] %s601_s13 }
  0x48   : > { %s603_s16 = sshll.u32 %s595_s11, 4  ;;  %s5255_s12 = scalar_lea.sflag [#allocation10], %s4213_s21  ;;  %s604_s16 = int_to_ptr.vmem [resolvable:$true] %s603_s16 }
  0x49   : > { %3371 = dma.hbm_to_vmem [thread:$0]  (!%p4208_p0), %s602_s13, 2048, %s604_s16, %s5255_s12, %s5253_s3, %s5253_s3, %s5252_s9  }
  0x4a   : > { %s636_s18 = scalar_lea.hbm %s5203_s6, %s4022_s25  ;;  %s633_s15 = scalar_lea.vmem [#allocation14], %s4216_s29 }
  0x4b   : > { %s640_s26 = sshll.u32 %s633_s15, 4  ;;  %s638_s23 = sshll.u32 %s636_s18, 4  ;;  %s641_s26 = int_to_ptr.vmem [resolvable:$true] %s640_s26  ;;  %s639_s23 = int_to_ptr.hbm [resolvable:$true] %s638_s23 }
  0x4c   : > { %s3177_s0 = sshll.u32 %s4216_s29, 9  ;;  %s5256_s28 = scalar_lea.sflag [#allocation13], %s4213_s21 }
  0x4d   : > { %3377 = dma.hbm_to_vmem [thread:$0]  (!%p4208_p0), %s639_s23, 16, %s641_s26, %s5256_s28  }
  0x4e   : > { %s3261_s14 = sshll.u32 %s4022_s25, 9  ;;  %s668_s13 = scalar_lea.vmem [#allocation17], %s3177_s0 }
  0x4f   : > { %s673_s16 = scalar_lea.hbm %s5205_s8, %s3261_s14  ;;  %s676_s12 = sshll.u32 %s668_s13, 4  ;;  %s677_s12 = int_to_ptr.vmem [resolvable:$true] %s676_s12 }
  0x50   : > { %s674_s1 = sshll.u32 %s673_s16, 4  ;;  %s4034_s24 = smov 512   ;;  %s675_s1 = int_to_ptr.hbm [resolvable:$true] %s674_s1 }
  0x51   : > { %s4035_s18 = smov 32   ;;  %s5257_s15 = scalar_lea.sflag [#allocation16], %s4213_s21 }
  0x52   : > { %3383 = dma.hbm_to_vmem [thread:$0]  (!%p4208_p0), %s675_s1, 8192, %s677_s12, %s5257_s15, %s4034_s24, %s4034_s24, %s4035_s18  }
  0x53   : > { %s702_s26 = scalar_lea.hbm %s5207_s10, %s3261_s14  ;;  %s697_s28 = scalar_lea.vmem [#allocation18], %s3177_s0 }
  0x54   : > { %s703_s23 = sshll.u32 %s702_s26, 4  ;;  %s705_s30 = sshll.u32 %s697_s28, 4  ;;  %s704_s23 = int_to_ptr.hbm [resolvable:$true] %s703_s23  ;;  %s706_s30 = int_to_ptr.vmem [resolvable:$true] %s705_s30 }
  0x55   : > { %s694_s11 = scalar_lea.sflag [#allocation19], %s4213_s21  ;;  %723 = sbr.rel (%p4185_p10) target bundleno = 2853 (0xb25), region = 84 }
  0x56   : > { %3386 = dma.hbm_to_vmem [thread:$0]  (!%p4208_p0), %s704_s23, 8192, %s706_s30, %s694_s11, %s5253_s3, %s5253_s3, %s5252_s9  }
  0x5a   : > { %3973 = dma.done.wait (%p102_p5), [#allocation4], 512  }
  0x5b   : > { %3975 = vsyncadd (%p102_p5), [#allocation4], 4294966784  ;;  %s730_s2 = sand.u32 1, %s4157_s27   ;;  %s4322_s0 = sand.u32 1, %s4010_s22  }
  0x5c   : > { %s731_s20 = scalar_lea.sflag [#allocation7], %s730_s2  ;;  %s733_s21 = scalar_lea.vmem [#allocation6], %s4322_s0 }
  0x5d   : > { %3977 = dma.done.wait (%p4177_p8), %s731_s20, 32  }
  0x5e   : > { %3979 = vsyncadd (%p4177_p8), %s731_s20, 4294967264  ;;  %s3321_s3 = smul.u32 384, %s4322_s0  ;;  %s742_s9 = scalar_lea.vmem [#allocation8], %s4322_s0 }
  0x5f   : > { %s749_s19 = scalar_lea.sflag [#allocation10], %s730_s2 }
  0x60   : > { %s4331_s14 = scalar_lea.vmem [#allocation9], %s3321_s3 }
  0x61   : > { %3981 = dma.done.wait (%p4177_p8), %s749_s19, 8192  }
  0x62   : > { %3983 = vsyncadd (%p4177_p8), %s749_s19, 4294959104  ;;  %s3185_s16 = sshll.u32 %s4322_s0, 7  ;;  %s769_s12 = scalar_lea.sflag [#allocation13], %s730_s2 }
  0x63   : > { %s4338_s13 = scalar_lea.vmem [#allocation11], %s3185_s16  ;;  %s771_s1 = scalar_lea.vmem [#allocation12], %s4322_s0 }
  0x64   : > { %3985 = dma.done.wait (%p4177_p8), %s769_s12, 32  }
  0x65   : > { %3987 = vsyncadd (%p4177_p8), %s769_s12, 4294967264  ;;  %s780_s24 = scalar_lea.vmem [#allocation14], %s4322_s0  ;;  %s787_s18 = scalar_lea.sflag [#allocation16], %s730_s2 }
  0x66   : > { %s789_s15 = scalar_lea.vmem [#allocation15], %s4322_s0 }
  0x67   : > { %3989 = dma.done.wait (%p4177_p8), %s787_s18, 8208  }
  0x68   : > { %3991 = vsyncadd (%p4177_p8), %s787_s18, 4294959088  ;;  %s3186_s29 = sshll.u32 %s4322_s0, 9  ;;  %s806_s23 = scalar_lea.sflag [#allocation19], %s730_s2 }
  0x69   : > { %s4352_s26 = scalar_lea.vmem [#allocation17], %s3186_s29  ;;  %s4354_s28 = scalar_lea.vmem [#allocation18], %s3186_s29 }
  0x6a   : > { %3993 = dma.done.wait (%p4177_p8), %s806_s23, 8192  }
  0x6b   : > { %3995 = vsyncadd (%p4177_p8), %s806_s23, 4294959104 }
  0x6c   : > { %3997 = dma.done.wait (%p102_p5), [#allocation19], 2048  }
  0x6d   : > { %3999 = vsyncadd (%p102_p5), [#allocation19], 4294965248  ;;  %s5258_s30 = sld [smem:[#allocation31_spill]] }
  0x6e   : > { %s5259_s19 = sld [smem:[#allocation40_spill]] }
  0x6f   : > { %s5260_s18 = sld [smem:[#allocation39_spill]] }
  0x73   : > { %p902_p1 = scmp.lt.s32.totalorder %s5258_s30, 1  ;;  %p3190_p2 = scmp.ne.s32.totalorder %s5258_s30, 0 }
  0x75   : > { %s4366_s11 = scalar_select %p902_p1, %s5258_s30, 1 }
  0x76   : > { %913 = sbr.rel (%p3190_p2) target bundleno = 128 (0x80), region = 132 }
  0x77   : > { %s3189_s2 = sshll.u32 %s4366_s11, 2  ;;  %s908_s16 = scalar_lea.vmem %s5259_s19, %s4366_s11 }
  0x78   : > { %s4376_s29 = scalar_lea.vmem %s5260_s18, %s3189_s2 }
  0x7b   : > { %v914_v0 = vld [vmem:[#allocation3] sm:$0xff]  ;;  %v915_v1 = vld [vmem:[#allocation3 + $0x8] sm:$0xff]  ;;  %v916_v2 = vld [vmem:[#allocation3 + $0x10] sm:$0xff] }
  0x7c   : > { %918 = vst [vmem:[#allocation2 + $0x10] sm:$0xff] %v914_v0  ;;  %v917_v3 = vld [vmem:[#allocation3 + $0x18] sm:$0xff] }
  0x7d   : > { %919 = vst [vmem:[#allocation2] sm:$0xff] %v915_v1 }
  0x7e   : > { %920 = vst [vmem:[#allocation2 + $0x18] sm:$0xff] %v916_v2 }
  0x7f   : > { %921 = vst [vmem:[#allocation2 + $0x8] sm:$0xff] %v917_v3 }
  0x80 PF: > { %v4036_v8 = vmov 128.0   ;;  %v1074_v11 = vld [vmem:[%s4331_s14 + $0x168] sm:$0xff]  ;;  %v1075_v12 = vld [vmem:[%s4331_s14 + $0x170] sm:$0xff]  ;;  %v1076_v13 = vld [vmem:[%s4331_s14 + $0x178] sm:$0xff]  ;;  %vm1193_vm13 = vcmask 261120  }
  0x81   : > { %3493 = vrcp.f32 %v4036_v8  ;;  %1077 = vmatpush.msra.mxu0 %v1074_v11  ;;  %1106 = vmatpush.msra.mxu1 %v1075_v12  ;;  %v1071_v14 = vld [vmem:[%s4331_s14 + $0x150] sm:$0xff]  ;;  %v1072_v15 = vld [vmem:[%s4331_s14 + $0x158] sm:$0xff]  ;;  %v1073_v16 = vld [vmem:[%s4331_s14 + $0x160] sm:$0xff] }
  0x82   : > { %1135 = vmatpush.msra.mxu2 %v1076_v13  ;;  %v1068_v37 = vld [vmem:[%s4331_s14 + $0x138] sm:$0xff]  ;;  %v1069_v38 = vld [vmem:[%s4331_s14 + $0x140] sm:$0xff]  ;;  %v1070_v39 = vld [vmem:[%s4331_s14 + $0x148] sm:$0xff] }
  0x83   : > { %v922_v5 = vld [vmem:[#allocation2 + $0x10] sm:$0xff]  ;;  %1078 = vmatpush.msra.mxu0 %v1071_v14  ;;  %1107 = vmatpush.msra.mxu1 %v1072_v15  ;;  %v1065_v40 = vld [vmem:[%s4331_s14 + $0x120] sm:$0xff]  ;;  %v1064_v45 = vld [vmem:[%s4331_s14 + $0x118] sm:$0xff] }
  0x84   : > { %928 = vadd.xlane.f32.xlu0 %v922_v5  ;;  %v923_v7 = vld [vmem:[#allocation2] sm:$0xff]  ;;  %1136 = vmatpush.msra.mxu2 %v1073_v16  ;;  %v1066_v41 = vld [vmem:[%s4331_s14 + $0x128] sm:$0xff]  ;;  %v1067_v42 = vld [vmem:[%s4331_s14 + $0x130] sm:$0xff] }
  0x85   : > { %v924_v4 = vld [vmem:[#allocation2 + $0x18] sm:$0xff]  ;;  %1079 = vmatpush.msra.mxu0 %v1068_v37  ;;  %1108 = vmatpush.msra.mxu1 %v1069_v38  ;;  %v1062_v43 = vld [vmem:[%s4331_s14 + $0x108] sm:$0xff]  ;;  %v1061_v48 = vld [vmem:[%s4331_s14 + $0x100] sm:$0xff] }
  0x86   : > { %932 = vadd.xlane.f32.xlu1 %v924_v4  ;;  %v925_v6 = vld [vmem:[#allocation2 + $0x8] sm:$0xff]  ;;  %1137 = vmatpush.msra.mxu2 %v1070_v39  ;;  %v1063_v44 = vld [vmem:[%s4331_s14 + $0x110] sm:$0xff]  ;;  %v1060_v47 = vld [vmem:[%s4331_s14 + $0xf8] sm:$0xff] }
  0x87   : > { %v3494_v9 = vpop.eup %3493  ;;  %1080 = vmatpush.msra.mxu0 %v1065_v40  ;;  %1109 = vmatpush.msra.mxu1 %v1066_v41  ;;  %v1059_v46 = vld [vmem:[%s4331_s14 + $0xf0] sm:$0xff]  ;;  %v1056_v49 = vld [vmem:[%s4331_s14 + $0xd8] sm:$0xff]  ;;  %v1057_v50 = vld [vmem:[%s4331_s14 + $0xe0] sm:$0xff] }
  0x88   : > { %v937_v10 = vmul.f32 128.0, %v3494_v9  ;;  %vm941_vm0 = vweird.f32 %v3494_v9  ;;  %1138 = vmatpush.msra.mxu2 %v1067_v42  ;;  %v1058_v51 = vld [vmem:[%s4331_s14 + $0xe8] sm:$0xff]  ;;  %v1053_v52 = vld [vmem:[%s4331_s14 + $0xc0] sm:$0xff]  ;;  %v1055_v54 = vld [vmem:[%s4331_s14 + $0xd0] sm:$0xff] }
  0x89   : > { %1081 = vmatpush.msra.mxu0 %v1062_v43  ;;  %1110 = vmatpush.msra.mxu1 %v1063_v44  ;;  %v1054_v53 = vld [vmem:[%s4331_s14 + $0xc8] sm:$0xff]  ;;  %v1051_v56 = vld [vmem:[%s4331_s14 + $0xb0] sm:$0xff]  ;;  %v1052_v57 = vld [vmem:[%s4331_s14 + $0xb8] sm:$0xff] }
  0x8a   : > { %v938_v17 = vsub.f32 1.0, %v937_v10  ;;  %1139 = vmatpush.msra.mxu2 %v1064_v45  ;;  %v1050_v55 = vld [vmem:[%s4331_s14 + $0xa8] sm:$0xff]  ;;  %v1047_v58 = vld [vmem:[%s4331_s14 + $0x90] sm:$0xff]  ;;  %v1048_v59 = vld [vmem:[%s4331_s14 + $0x98] sm:$0xff] }
  0x8b   : > { %1082 = vmatpush.msra.mxu0 %v1059_v46  ;;  %1111 = vmatpush.msra.mxu1 %v1060_v47  ;;  %v1049_v60 = vld [vmem:[%s4331_s14 + $0xa0] sm:$0xff]  ;;  %v1044_v61 = vld [vmem:[%s4331_s14 + $0x78] sm:$0xff]  ;;  %v1046_v63 = vld [vmem:[%s4331_s14 + $0x88] sm:$0xff] }
  0x8c   : > { %930 = vadd.xlane.f32.xlu0 %v923_v7  ;;  %v939_v18 = vmul.f32 %v3494_v9, %v938_v17  ;;  %1140 = vmatpush.msra.mxu2 %v1061_v48  ;;  %v1045_v62 = vld [vmem:[%s4331_s14 + $0x80] sm:$0xff]  ;;  %v1042_v1 = vld [vmem:[%s4331_s14 + $0x68] sm:$0xff]  ;;  %v1043_v2 = vld [vmem:[%s4331_s14 + $0x70] sm:$0xff] }
  0x8d   : > { %1083 = vmatpush.msra.mxu0 %v1056_v49  ;;  %1112 = vmatpush.msra.mxu1 %v1057_v50  ;;  %v1041_v0 = vld [vmem:[%s4331_s14 + $0x60] sm:$0xff]  ;;  %v1038_v3 = vld [vmem:[%s4331_s14 + $0x48] sm:$0xff]  ;;  %v1031_v14 = vld [vmem:[%s4331_s14 + $0x10] sm:$0xff] }
  0x8e   : > { %934 = vadd.xlane.f32.xlu1 %v925_v6  ;;  %v940_v19 = vadd.f32 %v3494_v9, %v939_v18  ;;  %1141 = vmatpush.msra.mxu2 %v1058_v51  ;;  %v1037_v8 = vld [vmem:[%s4331_s14 + $0x40] sm:$0xff]  ;;  %v1034_v11 = vld [vmem:[%s4331_s14 + $0x28] sm:$0xff]  ;;  %v3487_v46 = vld [vmem:[%s733_s21] ss:$0 sm:$0xff]  ;;  %s4037_s21 = smov 96  }
  0x8f   : > { %1084 = vmatpush.msra.mxu0 %v1053_v52  ;;  %1113 = vmatpush.msra.mxu1 %v1054_v53  ;;  %v1033_v10 = vld [vmem:[%s4331_s14 + $0x20] sm:$0xff]  ;;  %v1030_v13 = vld [vmem:[%s4331_s14 + $0x8] sm:$0xff]  ;;  %v3488_v50 = vld [vmem:[%s742_s9] ss:$0 sm:$0xff]  ;;  %s4038_s9 = smov 64  }
  0x90   : > { %v4385_v20 = vsel %vm941_vm0, %v3494_v9, %v940_v19  ;;  %1142 = vmatpush.msra.mxu2 %v1055_v54  ;;  %v1032_v9 = vld [vmem:[%s4331_s14 + $0x18] sm:$0xff]  ;;  %v1029_v12 = vld [vmem:[%s4331_s14] sm:$0xff] }
  0x91   : > { %1085 = vmatpush.msra.mxu0 %v1050_v55  ;;  %1114 = vmatpush.msra.mxu1 %v1051_v56 }
  0x92   : > { %1143 = vmatpush.msra.mxu2 %v1052_v57 }
  0x93   : > { %1086 = vmatpush.msra.mxu0 %v1047_v58  ;;  %1115 = vmatpush.msra.mxu1 %v1048_v59 }
  0x94   : > { %1144 = vmatpush.msra.mxu2 %v1049_v60 }
  0x95   : > { %1087 = vmatpush.msra.mxu0 %v1044_v61  ;;  %1116 = vmatpush.msra.mxu1 %v1045_v62 }
  0x96   : > { %1145 = vmatpush.msra.mxu2 %v1046_v63 }
  0x97   : > { %1088 = vmatpush.msra.mxu0 %v1041_v0  ;;  %1117 = vmatpush.msra.mxu1 %v1042_v1 }
  0x98   : > { %1146 = vmatpush.msra.mxu2 %v1043_v2 }
  0x99   : > { %1089 = vmatpush.msra.mxu0 %v1038_v3 }
  0xf7   : > { %v929_v22 = vpop.xlane.xlu0 %928 }
  0xf8   : > { %v943_v24 = vmul.f32 %v4385_v20, %v929_v22 }
  0xf9   : > { %v933_v21 = vpop.xlane.xlu1 %932 }
  0xfa   : > { %v945_v23 = vmul.f32 %v4385_v20, %v933_v21  ;;  %v4391_v26 = vsub.f32 %v922_v5, %v943_v24  ;;  %v1040_v5 = vld [vmem:[%s4331_s14 + $0x58] sm:$0xff] }
  0xfb   : > { %1147 = vmatpush.msra.mxu2 %v1040_v5 }
  0xfc   : > { %v4389_v25 = vsub.f32 %v924_v4, %v945_v23  ;;  %v951_v28 = vmul.f32 %v4391_v26, %v4391_v26  ;;  %v1039_v4 = vld [vmem:[%s4331_s14 + $0x50] sm:$0xff] }
  0xfd   : > { %1118 = vmatpush.msra.mxu1 %v1039_v4  ;;  %1148 = vmatpush.msra.mxu2 %v1037_v8 }
  0xfe   : > { %v953_v27 = vmul.f32 %v4389_v25, %v4389_v25  ;;  %955 = vadd.xlane.f32.xlu2 %v951_v28 }
  0xff   : > { %v931_v30 = vpop.xlane.xlu0 %930  ;;  %1149 = vmatpush.msra.mxu2 %v1034_v11 }
 0x100   : > { %959 = vadd.xlane.f32.xlu0 %v953_v27  ;;  %v944_v32 = vmul.f32 %v4385_v20, %v931_v30 }
 0x101   : > { %v935_v29 = vpop.xlane.xlu1 %934  ;;  %1150 = vmatpush.msra.mxu2 %v1031_v14 }
 0x102   : > { %v946_v31 = vmul.f32 %v4385_v20, %v935_v29  ;;  %v4401_v34 = vsub.f32 %v923_v7, %v944_v32  ;;  %v1036_v7 = vld [vmem:[%s4331_s14 + $0x38] sm:$0xff] }
 0x103   : > { %1119 = vmatpush.msra.mxu1 %v1036_v7 }
 0x104   : > { %v4399_v33 = vsub.f32 %v925_v6, %v946_v31  ;;  %v952_v36 = vmul.f32 %v4401_v34, %v4401_v34  ;;  %v1035_v6 = vld [vmem:[%s4331_s14 + $0x30] sm:$0xff]  ;;  %s4039_s14 = smov 32  }
 0x105   : > { %1090 = vmatpush.msra.mxu0 %v1035_v6  ;;  %1120 = vmatpush.msra.mxu1 %v1033_v10 }
 0x106   : > { %v954_v35 = vmul.f32 %v4399_v33, %v4399_v33  ;;  %957 = vadd.xlane.f32.xlu2 %v952_v36 }
 0x107   : > { %1091 = vmatpush.msra.mxu0 %v1032_v9  ;;  %1121 = vmatpush.msra.mxu1 %v1030_v13 }
 0x108   : > { %961 = vadd.xlane.f32.xlu1 %v954_v35 }
 0x109   : > { %1092 = vmatpush.msra.mxu0 %v1029_v12 }
 0x171   : > { %v956_v15 = vpop.xlane.xlu2 %955 }
 0x172   : > { %v963_v17 = vmul.f32 %v956_v15, %v4385_v20 }
 0x173   : > { %v960_v16 = vpop.xlane.xlu0 %959 }
 0x174   : > { %v965_v18 = vmul.f32 %v960_v16, %v4385_v20  ;;  %v967_v19 = vadd.f32 1e-05, %v963_v17 }
 0x176   : > { %v969_v21 = vadd.f32 1e-05, %v965_v18  ;;  %3495 = vrsqrt.f32 %v967_v19  ;;  %vm977_vm2 = vweird.f32 %v967_v19 }
 0x178   : > { %3497 = vrsqrt.f32 %v969_v21  ;;  %vm997_vm4 = vweird.f32 %v969_v21 }
 0x179   : > { %v958_v23 = vpop.xlane.xlu2 %957 }
 0x17a   : > { %v964_v27 = vmul.f32 %v958_v23, %v4385_v20 }
 0x17b   : > { %v962_v22 = vpop.xlane.xlu1 %961 }
 0x17c   : > { %v966_v24 = vmul.f32 %v962_v22, %v4385_v20  ;;  %v3496_v28 = vpop.eup %3495  ;;  %v968_v30 = vadd.f32 1e-05, %v964_v27 }
 0x17d   : > { %v972_v32 = vmul.f32 %v3496_v28, %v967_v19  ;;  %vm978_vm1 = vweird.f32 %v3496_v28 }
 0x17e   : > { %v970_v29 = vadd.f32 1e-05, %v966_v24  ;;  %v3498_v31 = vpop.eup %3497  ;;  %vm979_vm3 = vmor %vm977_vm2, %vm978_vm1  ;;  %vm987_vm8 = vweird.f32 %v968_v30 }
 0x17f   : > { %v992_v35 = vmul.f32 %v3498_v31, %v969_v21  ;;  %v973_v36 = vmul.f32 %v3496_v28, %v972_v32  ;;  %vm998_vm5 = vweird.f32 %v3498_v31  ;;  %v1164_v21 = vlaneseq }
 0x180   : > { %3499 = vrsqrt.f32 %v970_v29  ;;  %vm4458_vm7 = vmor %vm997_vm4, %vm998_vm5  ;;  %vm1007_vm10 = vweird.f32 %v970_v29 }
 0x181   : > { %3501 = vrsqrt.f32 %v968_v30  ;;  %v974_v37 = vmul.f32 0.5, %v973_v36  ;;  %v993_v38 = vmul.f32 %v3498_v31, %v992_v35  ;;  %v1165_v22 = vshrl.u32 %v1164_v21, 7 }
 0x182   : > { %v1170_v23 = vand.u32 127, %v1164_v21 }
 0x183   : > { %v975_v39 = vsub.f32 1.5, %v974_v37  ;;  %v994_v43 = vmul.f32 0.5, %v993_v38  ;;  %v1171_v24 = vshra.s32 %v1165_v22, 4 }
 0x184   : > { %v1175_v27 = vshra.s32 %v1170_v23, 4 }
 0x185   : > { %v976_v42 = vmul.f32 %v3496_v28, %v975_v39  ;;  %v995_v51 = vsub.f32 1.5, %v994_v43 }
 0x186   : > { %v3500_v40 = vpop.eup %3499  ;;  %vm1176_vm14 = vcmp.eq.s32.totalorder %v1171_v24, %v1175_v27 }
 0x187   : > { %v3502_v41 = vpop.eup %3501  ;;  %v1002_v44 = vmul.f32 %v3500_v40, %v970_v29  ;;  %v980_v47 = vsel %vm979_vm3, %v3496_v28, %v976_v42  ;;  %v996_v57 = vmul.f32 %v3498_v31, %v995_v51  ;;  %vm1008_vm11 = vweird.f32 %v3500_v40 }
 0x188   : > { %v982_v45 = vmul.f32 %v3502_v41, %v968_v30  ;;  %v1011_v49 = vmul.f32 %v980_v47, %v4391_v26  ;;  %vm988_vm6 = vweird.f32 %v3502_v41  ;;  %vm1009_vm12 = vmor %vm1007_vm10, %vm1008_vm11  ;;  %v1180_v28 = vand.u32 15, %v1165_v22 }
 0x189   : > { %v1003_v52 = vmul.f32 %v3500_v40, %v1002_v44  ;;  %vm989_vm9 = vmor %vm987_vm8, %vm988_vm6  ;;  %v1000_v62 = vsel %vm4458_vm7, %v3498_v31, %v996_v57  ;;  %v1184_v29 = vand.u32 15, %v1170_v23  ;;  %v1166_v30 = vadd.s32 8, %v1165_v22 }
 0x18a   : > { %v983_v48 = vmul.f32 %v3502_v41, %v982_v45  ;;  %v1018_v54 = vmul.f32 %v3487_v46, %v1011_v49  ;;  %v1013_v2 = vmul.f32 %v1000_v62, %v4389_v25 }
 0x18b   : > { %v1004_v59 = vmul.f32 0.5, %v1003_v52  ;;  %vm1185_vm15 = vcmp.ge.s32.totalorder %v1180_v28, %v1184_v29  ;;  %v1172_v36 = vshra.s32 %v1166_v30, 4  ;;  %v1181_v37 = vand.u32 15, %v1166_v30  ;;  %v1394_v30 = vld [vmem:[%s4338_s13 + $0x10] sm:$0xff] }
 0x18c   : > { %v984_v53 = vmul.f32 0.5, %v983_v48  ;;  %v1025_v56 = vadd.f32 %v3488_v50, %v1018_v54  ;;  %v1020_v4 = vmul.f32 %v3487_v46, %v1013_v2  ;;  %vm4507_vm0 = vmand %vm1176_vm14, %vm1185_vm15  ;;  %v1168_v48 = vadd.s32 24, %v1165_v22 }
 0x18d   : > { %v1005_v63 = vsub.f32 1.5, %v1004_v59  ;;  %vm1177_vm1 = vcmp.eq.s32.totalorder %v1172_v36, %v1175_v27  ;;  %vm1186_vm2 = vcmp.ge.s32.totalorder %v1181_v37, %v1184_v29 }
 0x18e   : > { %v985_v55 = vsub.f32 1.5, %v984_v53  ;;  %1093 = vmatmul.f32.vlgmr.msra.gmra.mxu0 %v1025_v56  ;;  %1122 = vmatmul.f32.vlgmr.msra.gmra.mxu1 %v1025_v56  ;;  %v1027_v6 = vadd.f32 %v3488_v50, %v1020_v4  ;;  %vm4514_vm3 = vmand %vm1177_vm1, %vm1186_vm2  ;;  %v1174_v52 = vshra.s32 %v1168_v48, 4  ;;  %v1183_v53 = vand.u32 15, %v1168_v48 }
 0x18f   : > { %1151 = vmatmul.f32.vlgmr.msra.gmra.mxu2 %v1025_v56  ;;  %v1006_v3 = vmul.f32 %v3500_v40, %v1005_v63 }
 0x190   : > { %v986_v60 = vmul.f32 %v3502_v41, %v985_v55  ;;  %vm1179_vm7 = vcmp.eq.s32.totalorder %v1174_v52, %v1175_v27  ;;  %vm1188_vm8 = vcmp.ge.s32.totalorder %v1183_v53, %v1184_v29 }
 0x191   : > { %v1010_v5 = vsel %vm1009_vm12, %v3500_v40, %v1006_v3  ;;  %v1167_v40 = vadd.s32 16, %v1165_v22 }
 0x192   : > { %v990_v26 = vsel %vm989_vm9, %v3502_v41, %v986_v60  ;;  %vm4528_vm9 = vmand %vm1179_vm7, %vm1188_vm8 }
 0x193   : > { %v1012_v61 = vmul.f32 %v990_v26, %v4401_v34  ;;  %v1014_v34 = vmul.f32 %v1010_v5, %v4399_v33  ;;  %v1173_v44 = vshra.s32 %v1167_v40, 4  ;;  %v1182_v45 = vand.u32 15, %v1167_v40 }
 0x195   : > { %v1019_v0 = vmul.f32 %v3487_v46, %v1012_v61  ;;  %v1021_v7 = vmul.f32 %v3487_v46, %v1014_v34  ;;  %vm1178_vm4 = vcmp.eq.s32.totalorder %v1173_v44, %v1175_v27  ;;  %vm1187_vm5 = vcmp.ge.s32.totalorder %v1182_v45, %v1184_v29 }
 0x196   : > { %vm4521_vm6 = vmand %vm1178_vm4, %vm1187_vm5 }
 0x197   : > { %v1026_v1 = vadd.f32 %v3488_v50, %v1019_v0  ;;  %v1028_v8 = vadd.f32 %v3488_v50, %v1021_v7 }
 0x199   : > { %1096 = vmatmul.f32.gmra.mxu0 %v1026_v1  ;;  %1125 = vmatmul.f32.gmra.mxu1 %v1026_v1 }
 0x19a   : > { %1154 = vmatmul.f32.gmra.mxu2 %v1026_v1 }
 0x1a1   : > { %1099 = vmatmul.f32.gmra.mxu0 %v1027_v6  ;;  %1128 = vmatmul.f32.gmra.mxu1 %v1027_v6 }
 0x1a2   : > { %1157 = vmatmul.f32.gmra.mxu2 %v1027_v6 }
 0x1a9   : > { %1102 = vmatmul.f32.gmra.mxu0 %v1028_v8  ;;  %1131 = vmatmul.f32.gmra.mxu1 %v1028_v8 }
 0x1aa   : > { %1160 = vmatmul.f32.gmra.mxu2 %v1028_v8 }
 0x20b   : > { %v4467_v9 = vpop.f32.mrf.mxu1  ;;  %v4483_v15 = vpop.f32.mrf.mxu0 }
 0x212   : > { %v1152_v25 = vpop.f32.mrf.mxu2 }
 0x216   : > { %v4469_v10 = vpop.f32.mrf.mxu1  ;;  %v4495_v17 = vpop.f32.mrf.mxu0 }
 0x21d   : > { %v1155_v11 = vpop.f32.mrf.mxu2 }
 0x21e   : > { %v4471_v12 = vpop.f32.mrf.mxu1  ;;  %v4473_v13 = vpack.i.bf16 %v1152_v25, %v1155_v11  ;;  %v4499_v18 = vpop.f32.mrf.mxu0 }
 0x225   : > { %v4479_v14 = vpop.f32.mrf.mxu2 }
 0x226   : > { %v4475_v33 = vpop.f32.mrf.mxu1  ;;  %v4503_v19 = vpop.f32.mrf.mxu0 }
 0x227   : > { %3191 = vmatpush.xpose.msk.msra.mxu3 %vm1193_vm13, %v4475_v33 }
 0x22b   : > { %3192 = vmatpush.xpose.msk.msra.mxu3 %vm1193_vm13, %v4471_v12 }
 0x22d   : > { %v4487_v16 = vpop.f32.mrf.mxu2 }
 0x22f   : > { %3193 = vmatpush.xpose.msk.msra.mxu3 %vm1193_vm13, %v4469_v10 }
 0x233   : > { %3194 = vmatpush.xpose.msk.msra.mxu3 %vm1193_vm13, %v4467_v9 }
 0x236   : > { %3195 = vmatmul.msk.f32.vlgmr.msra.gmra.mxu3 %vm1193_vm13, %v4483_v15 }
 0x237   : > { %1375 = vmatpush.msrb.mxu3 %v4487_v16 }
 0x239   : > { %1376 = vmatpush.msrb.mxu3 %v4479_v14 }
 0x23b   : > { %1377 = vmatpush.msrb.mxu3 %v1155_v11 }
 0x23d   : > { %1378 = vmatpush.msrb.mxu3 %v1152_v25 }
 0x23e   : > { %3196 = vmatmul.msk.f32.gmra.mxu3 %vm1193_vm13, %v4495_v17 }
 0x246   : > { %3197 = vmatmul.msk.f32.gmra.mxu3 %vm1193_vm13, %v4499_v18 }
 0x24e   : > { %3198 = vmatmul.msk.f32.gmra.mxu3 %vm1193_vm13, %v4503_v19 }
 0x2b9   : > { %v1235_v31 = vpop.f32.mrf.mxu3 }
 0x2ba   : > { %v1247_v35 = vmul.f32 0.088388346, %v1235_v31 }
 0x2bc   : > { %v1251_v38 = vsel %vm4507_vm0, %v1247_v35, -1e+30 }
 0x2bd   : > { %v1255_v39 = vsel %vm1193_vm13, %v1251_v38, -inf }
 0x2be   : > { %1256 = vmax.xlane.f32.xlu2 %v1255_v39 }
 0x2c1   : > { %v1238_v41 = vpop.f32.mrf.mxu3 }
 0x2c2   : > { %v1248_v43 = vmul.f32 0.088388346, %v1238_v41 }
 0x2c4   : > { %v1252_v46 = vsel %vm4514_vm3, %v1248_v43, -1e+30 }
 0x2c5   : > { %v1258_v47 = vsel %vm1193_vm13, %v1252_v46, -inf }
 0x2c6   : > { %1259 = vmax.xlane.f32.xlu0 %v1258_v47 }
 0x2c9   : > { %v1241_v49 = vpop.f32.mrf.mxu3 }
 0x2ca   : > { %v1249_v51 = vmul.f32 0.088388346, %v1241_v49 }
 0x2cc   : > { %v1253_v54 = vsel %vm4521_vm6, %v1249_v51, -1e+30 }
 0x2cd   : > { %v1261_v55 = vsel %vm1193_vm13, %v1253_v54, -inf }
 0x2ce   : > { %1262 = vmax.xlane.f32.xlu1 %v1261_v55 }
 0x2d1   : > { %v1244_v56 = vpop.f32.mrf.mxu3 }
 0x2d2   : > { %v1250_v58 = vmul.f32 0.088388346, %v1244_v56 }
 0x2d4   : > { %v1254_v59 = vsel %vm4528_vm9, %v1250_v58, -1e+30 }
 0x2d5   : > { %v1264_v60 = vsel %vm1193_vm13, %v1254_v59, -inf }
 0x2d6   : > { %1265 = vmax.xlane.f32.xlu2 %v1264_v60 }
 0x331   : > { %v1257_v26 = vpop.xlane.xlu2 %1256 }
 0x332   : > { %v1267_v61 = vsub.f32 %v1251_v38, %v1257_v26 }
 0x334   : > { %v1271_v62 = vmul.f32 1.442695, %v1267_v61 }
 0x336   : > { %3503 = vpow2.f32 %v1271_v62 }
 0x339   : > { %v1260_v63 = vpop.xlane.xlu0 %1259 }
 0x33a   : > { %v1268_v0 = vsub.f32 %v1252_v46, %v1260_v63 }
 0x33c   : > { %v4535_v1 = vpop.eup %3503  ;;  %v1273_v2 = vmul.f32 1.442695, %v1268_v0 }
 0x33d   : > { %v1279_v3 = vsel %vm1193_vm13, %v4535_v1, 0.0 }
 0x33e   : > { %3505 = vpow2.f32 %v1273_v2  ;;  %1280 = vadd.xlane.f32.xlu0 %v1279_v3 }
 0x341   : > { %v1263_v4 = vpop.xlane.xlu1 %1262 }
 0x342   : > { %v1269_v5 = vsub.f32 %v1253_v54, %v1263_v4 }
 0x344   : > { %v4539_v6 = vpop.eup %3505  ;;  %v1275_v34 = vmul.f32 1.442695, %v1269_v5 }
 0x345   : > { %v1282_v7 = vsel %vm1193_vm13, %v4539_v6, 0.0 }
 0x346   : > { %3507 = vpow2.f32 %v1275_v34  ;;  %1283 = vadd.xlane.f32.xlu1 %v1282_v7 }
 0x349   : > { %v1266_v8 = vpop.xlane.xlu2 %1265 }
 0x34a   : > { %v1270_v25 = vsub.f32 %v1254_v59, %v1266_v8 }
 0x34c   : > { %v4543_v11 = vpop.eup %3507  ;;  %v1277_v21 = vmul.f32 1.442695, %v1270_v25 }
 0x34d   : > { %v1285_v22 = vsel %vm1193_vm13, %v4543_v11, 0.0 }
 0x34e   : > { %3509 = vpow2.f32 %v1277_v21  ;;  %1286 = vadd.xlane.f32.xlu2 %v1285_v22 }
 0x354   : > { %v4547_v23 = vpop.eup %3509 }
 0x355   : > { %v1288_v24 = vsel %vm1193_vm13, %v4547_v23, 0.0 }
 0x356   : > { %1289 = vadd.xlane.f32.xlu0 %v1288_v24 }
 0x35f   : > { %1410 = vrot.lane.b32.xlu1 %v4475_v33, %s4037_s21 }
 0x366   : > { %1408 = vrot.lane.b32.xlu2 %v4471_v12, %s4037_s21 }
 0x367   : > { %1396 = vrot.lane.b32.xlu1 %v4483_v15, %s4037_s21 }
 0x36a   : > { %1406 = vrot.lane.b32.xlu0 %v4469_v10, %s4037_s21 }
 0x36e   : > { %1404 = vrot.lane.b32.xlu2 %v4467_v9, %s4037_s21 }
 0x36f   : > { %1718 = vrot.lane.b32.xlu1 %v4475_v33, %s4038_s9 }
 0x372   : > { %1398 = vrot.lane.b32.xlu0 %v4495_v17, %s4037_s21 }
 0x376   : > { %1400 = vrot.lane.b32.xlu2 %v4499_v18, %s4037_s21 }
 0x377   : > { %1716 = vrot.lane.b32.xlu1 %v4471_v12, %s4038_s9 }
 0x37a   : > { %1402 = vrot.lane.b32.xlu0 %v4503_v19, %s4037_s21 }
 0x37e   : > { %1985 = vrot.lane.b32.xlu2 %v4475_v33, %s4039_s14 }
 0x37f   : > { %1981 = vrot.lane.b32.xlu1 %v4469_v10, %s4039_s14 }
 0x382   : > { %1983 = vrot.lane.b32.xlu0 %v4471_v12, %s4039_s14 }
 0x386   : > { %1714 = vrot.lane.b32.xlu2 %v4469_v10, %s4038_s9 }
 0x387   : > { %1704 = vrot.lane.b32.xlu1 %v4483_v15, %s4038_s9 }
 0x38a   : > { %1712 = vrot.lane.b32.xlu0 %v4467_v9, %s4038_s9 }
 0x38e   : > { %1979 = vrot.lane.b32.xlu2 %v4467_v9, %s4039_s14 }
 0x38f   : > { %1973 = vrot.lane.b32.xlu1 %v4495_v17, %s4039_s14 }
 0x392   : > { %1971 = vrot.lane.b32.xlu0 %v4483_v15, %s4039_s14  ;;  %v1395_v15 = vld [vmem:[%s4338_s13 + $0x18] sm:$0xff] }
 0x393   : > { %1687 = vmatpush.msra.mxu3 %v1395_v15 }
 0x395   : > { %1688 = vmatpush.msra.mxu3 %v1394_v30 }
 0x396   : > { %1706 = vrot.lane.b32.xlu2 %v4495_v17, %s4038_s9 }
 0x397   : > { %1710 = vrot.lane.b32.xlu1 %v4503_v19, %s4038_s9 }
 0x39a   : > { %1708 = vrot.lane.b32.xlu0 %v4499_v18, %s4038_s9 }
 0x39e   : > { %1975 = vrot.lane.b32.xlu2 %v4499_v18, %s4039_s14  ;;  %v1393_v18 = vld [vmem:[%s4338_s13 + $0x8] sm:$0xff] }
 0x39f   : > { %1689 = vmatpush.msra.mxu3 %v1393_v18 }
 0x3a2   : > { %1977 = vrot.lane.b32.xlu0 %v4503_v19, %s4039_s14  ;;  %v1392_v19 = vld [vmem:[%s4338_s13] sm:$0xff] }
 0x3a3   : > { %1690 = vmatpush.msra.mxu3 %v1392_v19 }
 0x3b1   : > { %v1281_v9 = vpop.xlane.xlu0 %1280 }
 0x3b2   : > { %3511 = vrcp.f32 %v1281_v9  ;;  %v1302_v27 = vand.u32 2147483648, %v1281_v9  ;;  %v1300_v29 = vand.u32 2147483647, %v1281_v9  ;;  %vm1296_vm11 = vweird.f32 %v1281_v9 }
 0x3b4   : > { %v1303_v36 = vor.u32 1.1754944e-38, %v1302_v27  ;;  %vm1301_vm14 = vcmp.eq.f32.partialorder %v1300_v29, 8.507059e+37 }
 0x3b8   : > { %v3512_v10 = vpop.eup %3511 }
 0x3b9   : > { %v1292_v12 = vmul.f32 %v3512_v10, %v1281_v9  ;;  %v1284_v33 = vpop.xlane.xlu1 %1283  ;;  %vm1297_vm10 = vweird.f32 %v3512_v10 }
 0x3ba   : > { %3513 = vrcp.f32 %v1284_v33  ;;  %vm1298_vm12 = vmor %vm1296_vm11, %vm1297_vm10  ;;  %v1316_v44 = vand.u32 2147483648, %v1284_v33  ;;  %v1314_v46 = vand.u32 2147483647, %v1284_v33  ;;  %vm1310_vm1 = vweird.f32 %v1284_v33 }
 0x3bb   : > { %v1293_v17 = vsub.f32 1.0, %v1292_v12 }
 0x3bc   : > { %v1317_v49 = vor.u32 1.1754944e-38, %v1316_v44  ;;  %vm1315_vm4 = vcmp.eq.f32.partialorder %v1314_v46, 8.507059e+37 }
 0x3bd   : > { %v1294_v28 = vmul.f32 %v3512_v10, %v1293_v17 }
 0x3bf   : > { %v1295_v31 = vadd.f32 %v3512_v10, %v1294_v28 }
 0x3c0   : > { %v3514_v35 = vpop.eup %3513 }
 0x3c1   : > { %v1306_v37 = vmul.f32 %v3514_v35, %v1284_v33  ;;  %v1287_v38 = vpop.xlane.xlu2 %1286  ;;  %v1299_v39 = vsel %vm1298_vm12, %v3512_v10, %v1295_v31  ;;  %vm1311_vm15 = vweird.f32 %v3514_v35 }
 0x3c2   : > { %3515 = vrcp.f32 %v1287_v38  ;;  %v1304_v40 = vsel %vm1301_vm14, %v1303_v36, %v1299_v39  ;;  %vm1312_vm2 = vmor %vm1310_vm1, %vm1311_vm15  ;;  %v1330_v59 = vand.u32 2147483648, %v1287_v38  ;;  %v1328_v26 = vand.u32 2147483647, %v1287_v38 }
 0x3c3   : > { %v1307_v41 = vsub.f32 1.0, %v1306_v37  ;;  %v1347_v43 = vmul.f32 %v4535_v1, %v1304_v40  ;;  %vm1324_vm7 = vweird.f32 %v1287_v38 }
 0x3c4   : > { %v1331_v63 = vor.u32 1.1754944e-38, %v1330_v59  ;;  %vm1329_vm10 = vcmp.eq.f32.partialorder %v1328_v26, 8.507059e+37 }
 0x3c5   : > { %v1308_v45 = vmul.f32 %v3514_v35, %v1307_v41  ;;  %3199 = vmatmul.msk.f32.vlgmr.msrb.gmra.mxu3 %vm1193_vm13, %v1347_v43 }
 0x3c7   : > { %v1309_v47 = vadd.f32 %v3514_v35, %v1308_v45 }
 0x3c8   : > { %v3516_v48 = vpop.eup %3515 }
 0x3c9   : > { %v1320_v51 = vmul.f32 %v3516_v48, %v1287_v38  ;;  %v1290_v52 = vpop.xlane.xlu0 %1289  ;;  %v1409_v53 = vpop.permute.xlu2 %1408  ;;  %v1313_v54 = vsel %vm1312_vm2, %v3514_v35, %v1309_v47  ;;  %vm1325_vm5 = vweird.f32 %v3516_v48 }
 0x3ca   : > { %3517 = vrcp.f32 %v1290_v52  ;;  %v1318_v55 = vsel %vm1315_vm4, %v1317_v49, %v1313_v54  ;;  %vm1326_vm8 = vmor %vm1324_vm7, %vm1325_vm5  ;;  %v1344_v34 = vand.u32 2147483648, %v1290_v52  ;;  %v1342_v8 = vand.u32 2147483647, %v1290_v52 }
 0x3cb   : > { %v1321_v56 = vsub.f32 1.0, %v1320_v51  ;;  %v1348_v58 = vmul.f32 %v4539_v6, %v1318_v55  ;;  %vm1338_vm12 = vweird.f32 %v1290_v52 }
 0x3cc   : > { %v1345_v21 = vor.u32 1.1754944e-38, %v1344_v34  ;;  %vm1343_vm15 = vcmp.eq.f32.partialorder %v1342_v8, 8.507059e+37 }
 0x3cd   : > { %v1322_v60 = vmul.f32 %v3516_v48, %v1321_v56  ;;  %3200 = vmatmul.msk.f32.gmra.mxu3 %vm1193_vm13, %v1348_v58 }
 0x3cf   : > { %v1323_v61 = vadd.f32 %v3516_v48, %v1322_v60 }
 0x3d0   : > { %v3518_v62 = vpop.eup %3517 }
 0x3d1   : > { %v1334_v0 = vmul.f32 %v3518_v62, %v1290_v52  ;;  %v1411_v1 = vpop.permute.xlu1 %1410  ;;  %v1405_v2 = vpop.permute.xlu2 %1404  ;;  %v1327_v3 = vsel %vm1326_vm8, %v3516_v48, %v1323_v61  ;;  %vm1339_vm11 = vweird.f32 %v3518_v62 }
 0x3d2   : > { %3203 = vmatpush.xpose.msk.msrb.mxu0 %vm1193_vm13, %v1411_v1  ;;  %3263 = vmatpush.xpose.msk.msrb.mxu2 %vm1193_vm13, %v1411_v1  ;;  %v1332_v4 = vsel %vm1329_vm10, %v1331_v63, %v1327_v3  ;;  %vm1340_vm14 = vmor %vm1338_vm12, %vm1339_vm11 }
 0x3d3   : > { %v1335_v5 = vsub.f32 1.0, %v1334_v0  ;;  %v1349_v6 = vmul.f32 %v4543_v11, %v1332_v4 }
 0x3d5   : > { %v1336_v7 = vmul.f32 %v3518_v62, %v1335_v5  ;;  %3201 = vmatmul.msk.f32.gmra.mxu3 %vm1193_vm13, %v1349_v6 }
 0x3d6   : > { %3204 = vmatpush.xpose.msk.msrb.mxu0 %vm1193_vm13, %v1409_v53  ;;  %3264 = vmatpush.xpose.msk.msrb.mxu2 %vm1193_vm13, %v1409_v53 }
 0x3d7   : > { %v1337_v25 = vadd.f32 %v3518_v62, %v1336_v7 }
 0x3d9   : > { %v1397_v22 = vpop.permute.xlu1 %1396  ;;  %v1401_v24 = vpop.permute.xlu2 %1400  ;;  %v1341_v9 = vsel %vm1340_vm14, %v3518_v62, %v1337_v25 }
 0x3da   : > { %v1346_v10 = vsel %vm1343_vm15, %v1345_v21, %v1341_v9 }
 0x3db   : > { %v1350_v11 = vmul.f32 %v4547_v23, %v1346_v10 }
 0x3dc   : > { %v1407_v12 = vpop.permute.xlu0 %1406 }
 0x3dd   : > { %3202 = vmatmul.msk.f32.gmra.mxu3 %vm1193_vm13, %v1350_v11  ;;  %3205 = vmatpush.xpose.msk.msrb.mxu0 %vm1193_vm13, %v1407_v12  ;;  %v4678_v11 = vpack.i.bf16 %v4479_v14, %v4487_v16 }
 0x3de   : > { %3265 = vmatpush.xpose.msk.msrb.mxu2 %vm1193_vm13, %v1407_v12 }
 0x3e1   : > { %v1719_v33 = vpop.permute.xlu1 %1718  ;;  %3206 = vmatpush.xpose.msk.msrb.mxu0 %vm1193_vm13, %v1405_v2  ;;  %v1986_v15 = vpop.permute.xlu2 %1985 }
 0x3e2   : > { %3266 = vmatpush.xpose.msk.msrb.mxu2 %vm1193_vm13, %v1405_v2  ;;  %3239 = vmatpush.xpose.msk.msrb.mxu3 %vm1193_vm13, %v1986_v15 }
 0x3e4   : > { %v1399_v17 = vpop.permute.xlu0 %1398  ;;  %3207 = vmatmul.msk.f32.vlgmr.msrb.gmra.mxu0 %vm1193_vm13, %v1397_v22 }
 0x3e5   : > { %3223 = vmatpush.xpose.msk.msra.mxu0 %vm1193_vm13, %v1719_v33  ;;  %3209 = vmatmul.msk.f32.vlgmr.msrb.gmra.mxu2 %vm1193_vm13, %v1401_v24 }
 0x3e9   : > { %v1717_v23 = vpop.permute.xlu1 %1716  ;;  %v1715_v28 = vpop.permute.xlu2 %1714 }
 0x3ea   : > { %3224 = vmatpush.xpose.msk.msra.mxu0 %vm1193_vm13, %v1717_v23 }
 0x3ec   : > { %v1403_v27 = vpop.permute.xlu0 %1402  ;;  %3208 = vmatmul.msk.f32.gmra.mxu0 %vm1193_vm13, %v1399_v17 }
 0x3ed   : > { %3210 = vmatmul.msk.f32.gmra.mxu2 %vm1193_vm13, %v1403_v27 }
 0x3ee   : > { %3225 = vmatpush.xpose.msk.msra.mxu0 %vm1193_vm13, %v1715_v28 }
 0x3f1   : > { %v1982_v30 = vpop.permute.xlu1 %1981  ;;  %v1980_v18 = vpop.permute.xlu2 %1979 }
 0x3f4   : > { %v1984_v29 = vpop.permute.xlu0 %1983 }
 0x3f5   : > { %3240 = vmatpush.xpose.msk.msrb.mxu3 %vm1193_vm13, %v1984_v29 }
 0x3f9   : > { %3241 = vmatpush.xpose.msk.msrb.mxu3 %vm1193_vm13, %v1982_v30  ;;  %v1705_v19 = vpop.permute.xlu1 %1704  ;;  %v1707_v36 = vpop.permute.xlu2 %1706 }
 0x3fc   : > { %v1713_v31 = vpop.permute.xlu0 %1712 }
 0x3fd   : > { %3226 = vmatpush.xpose.msk.msra.mxu0 %vm1193_vm13, %v1713_v31  ;;  %3242 = vmatpush.xpose.msk.msrb.mxu3 %vm1193_vm13, %v1980_v18 }
 0x400   : > { %3227 = vmatmul.msk.f32.vlgmr.msra.gmra.mxu0 %vm1193_vm13, %v1705_v19 }
 0x401   : > { %v1974_v37 = vpop.permute.xlu1 %1973  ;;  %v1976_v62 = vpop.permute.xlu2 %1975 }
 0x404   : > { %v1972_v35 = vpop.permute.xlu0 %1971 }
 0x408   : > { %3228 = vmatmul.msk.f32.gmra.mxu0 %vm1193_vm13, %v1707_v36 }
 0x409   : > { %v1711_v39 = vpop.permute.xlu1 %1710 }
 0x40c   : > { %v1709_v38 = vpop.permute.xlu0 %1708 }
 0x410   : > { %3229 = vmatmul.msk.f32.gmra.mxu0 %vm1193_vm13, %v1709_v38 }
 0x414   : > { %v1978_v1 = vpop.permute.xlu0 %1977 }
 0x418   : > { %3230 = vmatmul.msk.f32.gmra.mxu0 %vm1193_vm13, %v1711_v39 }
 0x448   : > { %v1380_v40 = vpop.f32.mrf.mxu3 }
 0x449   : > { %3219 = vmatmul.msk.f32.vlgmr.msra.gmra.mxu3 %vm1193_vm13, %v1380_v40 }
 0x450   : > { %v1383_v41 = vpop.f32.mrf.mxu3 }
 0x451   : > { %3220 = vmatmul.msk.f32.gmra.mxu3 %vm1193_vm13, %v1383_v41 }
 0x458   : > { %v1386_v43 = vpop.f32.mrf.mxu3 }
 0x459   : > { %3221 = vmatmul.msk.f32.gmra.mxu3 %vm1193_vm13, %v1386_v43 }
 0x460   : > { %v1389_v44 = vpop.f32.mrf.mxu3 }
 0x461   : > { %v1445_v45 = vpop.f32.mrf.mxu0  ;;  %3222 = vmatmul.msk.f32.gmra.mxu3 %vm1193_vm13, %v1389_v44 }
 0x462   : > { %v1457_v46 = vmul.f32 0.088388346, %v1445_v45 }
 0x464   : > { %v1461_v47 = vsel %vm4507_vm0, %v1457_v46, -1e+30 }
 0x465   : > { %v1465_v48 = vsel %vm1193_vm13, %v1461_v47, -inf }
 0x466   : > { %1466 = vmax.xlane.f32.xlu2 %v1465_v48 }
 0x468   : > { %v1451_v49 = vpop.f32.mrf.mxu2 }
 0x469   : > { %v1459_v51 = vmul.f32 0.088388346, %v1451_v49  ;;  %v1448_v52 = vpop.f32.mrf.mxu0  ;;  %3243 = vmatmul.msk.f32.vlgmr.msrb.gmra.mxu3 %vm1193_vm13, %v1972_v35 }
 0x46a   : > { %v1458_v53 = vmul.f32 0.088388346, %v1448_v52 }
 0x46b   : > { %v1463_v54 = vsel %vm4521_vm6, %v1459_v51, -1e+30 }
 0x46c   : > { %v1471_v55 = vsel %vm1193_vm13, %v1463_v54, -inf  ;;  %v1462_v56 = vsel %vm4514_vm3, %v1458_v53, -1e+30 }
 0x46d   : > { %1472 = vmax.xlane.f32.xlu0 %v1471_v55  ;;  %v1468_v58 = vsel %vm1193_vm13, %v1462_v56, -inf }
 0x46e   : > { %1469 = vmax.xlane.f32.xlu1 %v1468_v58 }
 0x470   : > { %v1454_v59 = vpop.f32.mrf.mxu2 }
 0x471   : > { %v1460_v60 = vmul.f32 0.088388346, %v1454_v59  ;;  %3244 = vmatmul.msk.f32.gmra.mxu3 %vm1193_vm13, %v1974_v37 }
 0x473   : > { %v1464_v26 = vsel %vm4528_vm9, %v1460_v60, -1e+30 }
 0x474   : > { %v1474_v61 = vsel %vm1193_vm13, %v1464_v26, -inf }
 0x475   : > { %1475 = vmax.xlane.f32.xlu2 %v1474_v61 }
 0x479   : > { %3245 = vmatmul.msk.f32.gmra.mxu3 %vm1193_vm13, %v1976_v62 }
 0x47d   : > { %v1753_v63 = vpop.f32.mrf.mxu0 }
 0x47e   : > { %v1765_v0 = vmul.f32 0.088388346, %v1753_v63 }
 0x480   : > { %v1769_v2 = vsel %vm4507_vm0, %v1765_v0, -1e+30 }
 0x481   : > { %3246 = vmatmul.msk.f32.gmra.mxu3 %vm1193_vm13, %v1978_v1  ;;  %v1773_v3 = vsel %vm1193_vm13, %v1769_v2, -inf }
 0x482   : > { %1774 = vmax.xlane.f32.xlu1 %v1773_v3 }
 0x485   : > { %v1756_v4 = vpop.f32.mrf.mxu0 }
 0x486   : > { %v1766_v5 = vmul.f32 0.088388346, %v1756_v4 }
 0x488   : > { %v4660_v6 = vsel %vm4514_vm3, %v1766_v5, -1e+30 }
 0x489   : > { %v1776_v34 = vsel %vm1193_vm13, %v4660_v6, -inf }
 0x48a   : > { %1777 = vmax.xlane.f32.xlu0 %v1776_v34 }
 0x48d   : > { %v1759_v7 = vpop.f32.mrf.mxu0 }
 0x48e   : > { %v1767_v8 = vmul.f32 0.088388346, %v1759_v7 }
 0x490   : > { %v4666_v25 = vsel %vm4521_vm6, %v1767_v8, -1e+30 }
 0x491   : > { %v1779_v21 = vsel %vm1193_vm13, %v4666_v25, -inf }
 0x492   : > { %1780 = vmax.xlane.f32.xlu1 %v1779_v21 }
 0x495   : > { %v1762_v22 = vpop.f32.mrf.mxu0 }
 0x496   : > { %v1768_v24 = vmul.f32 0.088388346, %v1762_v22 }
 0x498   : > { %v4672_v9 = vsel %vm4528_vm9, %v1768_v24, -1e+30 }
 0x499   : > { %v1782_v10 = vsel %vm1193_vm13, %v4672_v9, -inf }
 0x49a   : > { %1783 = vmax.xlane.f32.xlu1 %v1782_v10 }
 0x49e   : > { %3458 = vrot.lane.b32.xlu0 %v4678_v11, %s4037_s21 }
 0x4b3   : > { %3463 = vrot.lane.b32.xlu1 %v4473_v13, %s4037_s21 }
 0x4cc   : > { %v4684_v12 = vpop.f32.mrf.mxu3 }
 0x4d4   : > { %v4686_v33 = vpop.f32.mrf.mxu3 }
 0x4d9   : > { %v1467_v15 = vpop.xlane.xlu2 %1466 }
 0x4da   : > { %v1477_v17 = vsub.f32 %v1461_v47, %v1467_v15 }
 0x4dc   : > { %v1481_v23 = vmul.f32 1.442695, %v1477_v17  ;;  %v4688_v27 = vpop.f32.mrf.mxu3 }
 0x4de   : > { %3519 = vpow2.f32 %v1481_v23 }
 0x4e0   : > { %v1473_v28 = vpop.xlane.xlu0 %1472 }
 0x4e1   : > { %v1479_v29 = vsub.f32 %v1463_v54, %v1473_v28  ;;  %v1470_v14 = vpop.xlane.xlu1 %1469 }
 0x4e2   : > { %v1478_v18 = vsub.f32 %v1462_v56, %v1470_v14 }
 0x4e3   : > { %v1485_v16 = vmul.f32 1.442695, %v1479_v29 }
 0x4e4   : > { %v4690_v30 = vpop.eup %3519  ;;  %v4692_v31 = vpop.f32.mrf.mxu3  ;;  %v1483_v35 = vmul.f32 1.442695, %v1478_v18 }
 0x4e5   : > { %3521 = vpow2.f32 %v1485_v16  ;;  %v1489_v19 = vsel %vm1193_vm13, %v4690_v30, 0.0 }
 0x4e6   : > { %1490 = vadd.xlane.f32.xlu2 %v1489_v19  ;;  %3523 = vpow2.f32 %v1483_v35 }
 0x4e8   : > { %v1476_v36 = vpop.xlane.xlu2 %1475 }
 0x4e9   : > { %v1480_v38 = vsub.f32 %v1464_v26, %v1476_v36 }
 0x4eb   : > { %v4696_v37 = vpop.eup %3521  ;;  %v1487_v41 = vmul.f32 1.442695, %v1480_v38 }
 0x4ec   : > { %v2020_v39 = vpop.f32.mrf.mxu3  ;;  %v1495_v40 = vsel %vm1193_vm13, %v4696_v37, 0.0  ;;  %v4700_v43 = vpop.eup %3523 }
 0x4ed   : > { %3525 = vpow2.f32 %v1487_v41  ;;  %v1492_v47 = vsel %vm1193_vm13, %v4700_v43, 0.0 }
 0x4ee   : > { %1496 = vadd.xlane.f32.xlu2 %v1495_v40 }
 0x4f3   : > { %v4710_v53 = vpop.eup %3525 }
 0x4f4   : > { %v2023_v44 = vpop.f32.mrf.mxu3  ;;  %v1498_v58 = vsel %vm1193_vm13, %v4710_v53, 0.0 }
 0x4f5   : > { %v2033_v45 = vmul.f32 0.088388346, %v2023_v44  ;;  %v1775_v46 = vpop.xlane.xlu1 %1774 }
 0x4f6   : > { %v1785_v48 = vsub.f32 %v1769_v2, %v1775_v46  ;;  %1493 = vadd.xlane.f32.xlu2 %v1492_v47  ;;  %v2032_v2 = vmul.f32 0.088388346, %v2020_v39 }
 0x4f7   : > { %v4706_v49 = vsel %vm4514_vm3, %v2033_v45, -1e+30 }
 0x4f8   : > { %v1789_v51 = vmul.f32 1.442695, %v1785_v48  ;;  %v2043_v52 = vsel %vm1193_vm13, %v4706_v49, -inf  ;;  %v4738_v7 = vsel %vm4507_vm0, %v2032_v2, -1e+30 }
 0x4f9   : > { %2044 = vmax.xlane.f32.xlu0 %v2043_v52  ;;  %v2040_v57 = vsel %vm1193_vm13, %v4738_v7, -inf }
 0x4fa   : > { %3527 = vpow2.f32 %v1789_v51 }
 0x4fc   : > { %v2026_v54 = vpop.f32.mrf.mxu3 }
 0x4fd   : > { %v2034_v55 = vmul.f32 0.088388346, %v2026_v54  ;;  %v1778_v56 = vpop.xlane.xlu0 %1777 }
 0x4fe   : > { %v1786_v59 = vsub.f32 %v4660_v6, %v1778_v56  ;;  %1499 = vadd.xlane.f32.xlu2 %v1498_v58 }
 0x4ff   : > { %v4717_v42 = vsel %vm4521_vm6, %v2034_v55, -1e+30 }
 0x500   : > { %v1791_v60 = vmul.f32 1.442695, %v1786_v59  ;;  %v2046_v26 = vsel %vm1193_vm13, %v4717_v42, -inf  ;;  %v4721_v61 = vpop.eup %3527 }
 0x501   : > { %2047 = vmax.xlane.f32.xlu0 %v2046_v26  ;;  %v1797_v1 = vsel %vm1193_vm13, %v4721_v61, 0.0 }
 0x502   : > { %3529 = vpow2.f32 %v1791_v60 }
 0x504   : > { %v2029_v62 = vpop.f32.mrf.mxu3 }
 0x505   : > { %v2035_v63 = vmul.f32 0.088388346, %v2029_v62  ;;  %v1781_v0 = vpop.xlane.xlu1 %1780 }
 0x506   : > { %v1787_v3 = vsub.f32 %v4666_v25, %v1781_v0  ;;  %1798 = vadd.xlane.f32.xlu2 %v1797_v1 }
 0x507   : > { %v4728_v50 = vsel %vm4528_vm9, %v2035_v63, -1e+30 }
 0x508   : > { %v4730_v4 = vpop.eup %3529  ;;  %v1793_v5 = vmul.f32 1.442695, %v1787_v3  ;;  %v2049_v6 = vsel %vm1193_vm13, %v4728_v50, -inf }
 0x509   : > { %2050 = vmax.xlane.f32.xlu1 %v2049_v6  ;;  %v1800_v34 = vsel %vm1193_vm13, %v4730_v4, 0.0 }
 0x50a   : > { %1801 = vadd.xlane.f32.xlu0 %v1800_v34  ;;  %3531 = vpow2.f32 %v1793_v5 }
 0x50d   : > { %v4746_v10 = vpop.xlane.xlu1 %1783 }
 0x50e   : > { %2041 = vmax.xlane.f32.xlu2 %v2040_v57 }
 0x510   : > { %v3459_v8 = vpop.permute.xlu0 %3458  ;;  %v4742_v21 = vpop.eup %3531 }
 0x511   : > { %v3460_v25 = vunpack.i.l.bf16 %v3459_v8  ;;  %v3461_v22 = vunpack.i.h.bf16 %v3459_v8  ;;  %v1803_v24 = vsel %vm1193_vm13, %v4742_v21, 0.0 }
 0x513   : > { %1601 = vmatpush.msrb.mxu1 %v3460_v25 }
 0x515   : > { %1602 = vmatpush.msrb.mxu1 %v3461_v22 }
 0x516   : > { %1804 = vadd.xlane.f32.xlu2 %v1803_v24 }
 0x51e   : > { %3478 = vrot.lane.b32.xlu0 %v4678_v11, %s4039_s14 }
 0x522   : > { %3468 = vrot.lane.b32.xlu1 %v4678_v11, %s4038_s9 }
 0x525   : > { %v3464_v32 = vpop.permute.xlu1 %3463 }
 0x526   : > { %3483 = vrot.lane.b32.xlu0 %v4473_v13, %s4039_s14  ;;  %v3465_v15 = vunpack.i.l.bf16 %v3464_v32  ;;  %v3466_v17 = vunpack.i.h.bf16 %v3464_v32 }
 0x528   : > { %1603 = vmatpush.msrb.mxu1 %v3465_v15 }
 0x52a   : > { %1604 = vmatpush.msrb.mxu1 %v3466_v17 }
 0x559   : > { %v1491_v23 = vpop.xlane.xlu2 %1490 }
 0x55a   : > { %3533 = vrcp.f32 %v1491_v23  ;;  %v1512_v18 = vand.u32 2147483648, %v1491_v23  ;;  %v1510_v35 = vand.u32 2147483647, %v1491_v23  ;;  %vm1506_vm3 = vweird.f32 %v1491_v23 }
 0x55c   : > { %v1513_v36 = vor.u32 1.1754944e-38, %v1512_v18  ;;  %vm1511_vm9 = vcmp.eq.f32.partialorder %v1510_v35, 8.507059e+37 }
 0x560   : > { %v3534_v28 = vpop.eup %3533 }
 0x561   : > { %v1502_v29 = vmul.f32 %v3534_v28, %v1491_v23  ;;  %v4754_v14 = vpop.xlane.xlu2 %1496  ;;  %vm1507_vm0 = vweird.f32 %v3534_v28 }
 0x562   : > { %3535 = vrcp.f32 %v4754_v14  ;;  %vm1508_vm6 = vmor %vm1506_vm3, %vm1507_vm0  ;;  %v1540_v57 = vand.u32 2147483648, %v4754_v14  ;;  %vm1534_vm8 = vweird.f32 %v4754_v14  ;;  %v1538_v32 = vand.u32 2147483647, %v4754_v14 }
 0x563   : > { %v1503_v16 = vsub.f32 1.0, %v1502_v29 }
 0x564   : > { %v1541_v29 = vor.u32 1.1754944e-38, %v1540_v57  ;;  %vm1539_vm11 = vcmp.eq.f32.partialorder %v1538_v32, 8.507059e+37 }
 0x565   : > { %v1504_v19 = vmul.f32 %v3534_v28, %v1503_v16 }
 0x567   : > { %v1505_v11 = vadd.f32 %v3534_v28, %v1504_v19 }
 0x568   : > { %v3536_v41 = vpop.eup %3535 }
 0x569   : > { %v1494_v38 = vpop.xlane.xlu2 %1493  ;;  %v1509_v39 = vsel %vm1508_vm6, %v3534_v28, %v1505_v11  ;;  %v1530_v47 = vmul.f32 %v3536_v41, %v4754_v14  ;;  %vm1535_vm7 = vweird.f32 %v3536_v41 }
 0x56a   : > { %3537 = vrcp.f32 %v1494_v38  ;;  %v1514_v40 = vsel %vm1511_vm9, %v1513_v36, %v1509_v39  ;;  %v1524_v26 = vand.u32 2147483647, %v1494_v38  ;;  %vm1520_vm2 = vweird.f32 %v1494_v38  ;;  %vm1536_vm10 = vmor %vm1534_vm8, %vm1535_vm7 }
 0x56b   : > { %v1557_v44 = vmul.f32 %v4690_v30, %v1514_v40  ;;  %v1531_v55 = vsub.f32 1.0, %v1530_v47  ;;  %v1526_v30 = vand.u32 2147483648, %v1494_v38 }
 0x56c   : > { %v2045_v45 = vpop.xlane.xlu0 %2044  ;;  %vm1525_vm5 = vcmp.eq.f32.partialorder %v1524_v26, 8.507059e+37 }
 0x56d   : > { %v2053_v46 = vsub.f32 %v4706_v49, %v2045_v45  ;;  %3211 = vmatmul.msk.f32.vlgmr.msrb.gmra.mxu1 %vm1193_vm13, %v1557_v44  ;;  %v1532_v49 = vmul.f32 %v3536_v41, %v1531_v55  ;;  %v1527_v3 = vor.u32 1.1754944e-38, %v1526_v30  ;;  %v1788_v55 = vsub.f32 %v4672_v9, %v4746_v10 }
 0x56f   : > { %v2058_v48 = vmul.f32 1.442695, %v2053_v46  ;;  %v1533_v34 = vadd.f32 %v3536_v41, %v1532_v49 }
 0x570   : > { %v3538_v51 = vpop.eup %3537 }
 0x571   : > { %v1516_v52 = vmul.f32 %v3538_v51, %v1494_v38  ;;  %3539 = vpow2.f32 %v2058_v48  ;;  %v4761_v54 = vpop.xlane.xlu2 %1499  ;;  %vm1521_vm1 = vweird.f32 %v3538_v51  ;;  %v1537_v23 = vsel %vm1536_vm10, %v3536_v41, %v1533_v34 }
 0x572   : > { %3541 = vrcp.f32 %v4761_v54  ;;  %vm1522_vm4 = vmor %vm1520_vm2, %vm1521_vm1  ;;  %v1542_v19 = vsel %vm1539_vm11, %v1541_v29, %v1537_v23  ;;  %v1554_v35 = vand.u32 2147483648, %v4761_v54  ;;  %vm1548_vm14 = vweird.f32 %v4761_v54 }
 0x573   : > { %v1517_v56 = vsub.f32 1.0, %v1516_v52  ;;  %v1559_v36 = vmul.f32 %v4696_v37, %v1542_v19  ;;  %v1552_v38 = vand.u32 2147483647, %v4761_v54  ;;  %v1621_v52 = vld [vmem:[%s4338_s13 + $0x38] sm:$0xff] }
 0x574   : > { %v2048_v58 = vpop.xlane.xlu0 %2047  ;;  %v1555_v41 = vor.u32 1.1754944e-38, %v1554_v35  ;;  %1646 = vmatpush.msra.mxu2 %v1621_v52 }
 0x575   : > { %v1518_v59 = vmul.f32 %v3538_v51, %v1517_v56  ;;  %v2054_v60 = vsub.f32 %v4717_v42, %v2048_v58  ;;  %vm1553_vm0 = vcmp.eq.f32.partialorder %v1552_v38, 8.507059e+37  ;;  %v1795_v56 = vmul.f32 1.442695, %v1788_v55  ;;  %v1618_v58 = vld [vmem:[%s4338_s13 + $0x20] sm:$0xff] }
 0x577   : > { %v4765_v62 = vpop.eup %3539  ;;  %v2060_v63 = vmul.f32 1.442695, %v2054_v60  ;;  %v1519_v0 = vadd.f32 %v3538_v51, %v1518_v59 }
 0x578   : > { %v3542_v1 = vpop.eup %3541  ;;  %v2067_v2 = vsel %vm1193_vm13, %v4765_v62, 0.0 }
 0x579   : > { %v1544_v5 = vmul.f32 %v3542_v1, %v4761_v54  ;;  %3543 = vpow2.f32 %v2060_v63  ;;  %2068 = vadd.xlane.f32.xlu1 %v2067_v2  ;;  %v4770_v6 = vpop.xlane.xlu2 %1798  ;;  %v1523_v42 = vsel %vm1522_vm4, %v3538_v51, %v1519_v0  ;;  %vm1549_vm12 = vweird.f32 %v3542_v1  ;;  %v1620_v54 = vld [vmem:[%s4338_s13 + $0x30] sm:$0xff] }
 0x57a   : > { %v1528_v25 = vsel %vm1525_vm5, %v1527_v3, %v1523_v42  ;;  %vm1550_vm15 = vmor %vm1548_vm14, %vm1549_vm12  ;;  %1647 = vmatpush.msra.mxu2 %v1620_v54  ;;  %vm1814_vm9 = vweird.f32 %v4770_v6  ;;  %v1818_v29 = vand.u32 2147483647, %v4770_v6 }
 0x57b   : > { %v1545_v8 = vsub.f32 1.0, %v1544_v5  ;;  %v1558_v24 = vmul.f32 %v4700_v43, %v1528_v25 }
 0x57c   : > { %v2051_v22 = vpop.xlane.xlu1 %2050  ;;  %vm1819_vm5 = vcmp.eq.f32.partialorder %v1818_v29, 8.507059e+37 }
 0x57d   : > { %v2055_v15 = vsub.f32 %v4728_v50, %v2051_v22  ;;  %v1546_v17 = vmul.f32 %v3542_v1, %v1545_v8  ;;  %3212 = vmatmul.msk.f32.gmra.mxu1 %vm1193_vm13, %v1558_v24  ;;  %v1802_v60 = vpop.xlane.xlu0 %1801 }
 0x57e   : > { %vm1828_vm2 = vweird.f32 %v1802_v60  ;;  %v1832_v19 = vand.u32 2147483647, %v1802_v60 }
 0x57f   : > { %v4778_v28 = vpop.eup %3543  ;;  %v2062_v16 = vmul.f32 1.442695, %v2055_v15  ;;  %v1547_v50 = vadd.f32 %v3542_v1, %v1546_v17  ;;  %v1820_v15 = vand.u32 2147483648, %v4770_v6 }
 0x580   : > { %v2070_v18 = vsel %vm1193_vm13, %v4778_v28, 0.0  ;;  %vm1833_vm7 = vcmp.eq.f32.partialorder %v1832_v19, 8.507059e+37 }
 0x581   : > { %3545 = vpow2.f32 %v2062_v16  ;;  %2071 = vadd.xlane.f32.xlu1 %v2070_v18  ;;  %v2042_v43 = vpop.xlane.xlu2 %2041  ;;  %v1551_v39 = vsel %vm1550_vm15, %v3542_v1, %v1547_v50  ;;  %v1834_v16 = vand.u32 2147483648, %v1802_v60 }
 0x582   : > { %v2052_v14 = vsub.f32 %v4738_v7, %v2042_v43  ;;  %v1556_v44 = vsel %vm1553_vm0, %v1555_v41, %v1551_v39 }
 0x583   : > { %v1560_v37 = vmul.f32 %v4710_v53, %v1556_v44  ;;  %v1619_v53 = vld [vmem:[%s4338_s13 + $0x28] sm:$0xff]  ;;  %v1835_v38 = vor.u32 1.1754944e-38, %v1834_v16 }
 0x584   : > { %v2056_v11 = vmul.f32 1.442695, %v2052_v14  ;;  %1648 = vmatpush.msra.mxu2 %v1619_v53 }
 0x585   : > { %3213 = vmatmul.msk.f32.gmra.mxu1 %vm1193_vm13, %v1559_v36 }
 0x586   : > { %3547 = vpow2.f32 %v2056_v11  ;;  %1649 = vmatpush.msra.mxu2 %v1618_v58 }
 0x587   : > { %v4788_v40 = vpop.eup %3545  ;;  %3549 = vpow2.f32 %v1795_v56 }
 0x588   : > { %v2073_v7 = vsel %vm1193_vm13, %v4788_v40, 0.0  ;;  %3551 = vrcp.f32 %v4770_v6 }
 0x589   : > { %2074 = vadd.xlane.f32.xlu1 %v2073_v7  ;;  %3553 = vrcp.f32 %v1802_v60  ;;  %v4812_v26 = vpop.xlane.xlu2 %1804 }
 0x58a   : > { %3555 = vrcp.f32 %v4812_v26  ;;  %vm1842_vm8 = vweird.f32 %v4812_v26 }
 0x58c   : > { %v4792_v45 = vpop.eup %3547 }
 0x58d   : > { %v2064_v46 = vsel %vm1193_vm13, %v4792_v45, 0.0  ;;  %3214 = vmatmul.msk.f32.gmra.mxu1 %vm1193_vm13, %v1560_v37  ;;  %v4806_v59 = vpop.eup %3549 }
 0x58e   : > { %2065 = vadd.xlane.f32.xlu2 %v2064_v46  ;;  %v1806_v30 = vsel %vm1193_vm13, %v4806_v59, 0.0  ;;  %v3552_v49 = vpop.eup %3551  ;;  %v1848_v46 = vand.u32 2147483648, %v4812_v26 }
 0x58f   : > { %v3554_v9 = vpop.eup %3553  ;;  %v1810_v10 = vmul.f32 %v3552_v49, %v4770_v6  ;;  %vm1815_vm3 = vweird.f32 %v3552_v49  ;;  %v1821_v6 = vor.u32 1.1754944e-38, %v1820_v15 }
 0x590   : > { %v1824_v0 = vmul.f32 %v3554_v9, %v1802_v60  ;;  %v4819_v5 = vpop.eup %3555  ;;  %vm1829_vm6 = vweird.f32 %v3554_v9  ;;  %v4835_v18 = vpop.permute.xlu0 %3478  ;;  %vm4837_vm1 = vmor %vm1814_vm9, %vm1815_vm3 }
 0x591   : > { %v1811_v1 = vsub.f32 1.0, %v1810_v10  ;;  %v1838_v57 = vmul.f32 %v4819_v5, %v4812_v26  ;;  %vm1830_vm4 = vmor %vm1828_vm2, %vm1829_vm6  ;;  %vm1843_vm10 = vweird.f32 %v4819_v5  ;;  %v3480_v60 = vunpack.i.l.bf16 %v4835_v18 }
 0x592   : > { %v1825_v3 = vsub.f32 1.0, %v1824_v0  ;;  %vm4873_vm14 = vmor %vm1842_vm8, %vm1843_vm10 }
 0x593   : > { %v1812_v42 = vmul.f32 %v3552_v49, %v1811_v1  ;;  %v1839_v23 = vsub.f32 1.0, %v1838_v57 }
 0x594   : > { %v3469_v47 = vpop.permute.xlu1 %3468  ;;  %v1826_v34 = vmul.f32 %v3554_v9, %v1825_v3 }
 0x595   : > { %v3470_v48 = vunpack.i.l.bf16 %v3469_v47  ;;  %v3471_v51 = vunpack.i.h.bf16 %v3469_v47  ;;  %v1813_v22 = vadd.f32 %v3552_v49, %v1812_v42  ;;  %v1840_v36 = vmul.f32 %v4819_v5, %v1839_v23 }
 0x596   : > { %v1827_v17 = vadd.f32 %v3554_v9, %v1826_v34  ;;  %v1849_v34 = vor.u32 1.1754944e-38, %v1848_v46 }
 0x597   : > { %1905 = vmatpush.msrb.mxu0 %v3470_v48  ;;  %3267 = vmatpush.msra.mxu1 %v3470_v48  ;;  %v1817_v14 = vsel %vm4837_vm1, %v3552_v49, %v1813_v22  ;;  %v1841_v56 = vadd.f32 %v4819_v5, %v1840_v36 }
 0x598   : > { %v1831_v11 = vsel %vm1830_vm4, %v3554_v9, %v1827_v17  ;;  %v1822_v7 = vsel %vm1819_vm5, %v1821_v6, %v1817_v14  ;;  %v1846_v9 = vand.u32 2147483647, %v4812_v26  ;;  %v3484_v10 = vpop.permute.xlu0 %3483 }
 0x599   : > { %1906 = vmatpush.msrb.mxu0 %v3471_v51  ;;  %3268 = vmatpush.msra.mxu1 %v3471_v51  ;;  %v1836_v37 = vsel %vm1833_vm7, %v1835_v38, %v1831_v11  ;;  %v1845_v42 = vsel %vm4873_vm14, %v4819_v5, %v1841_v56  ;;  %v3485_v26 = vunpack.i.l.bf16 %v3484_v10  ;;  %v3486_v23 = vunpack.i.h.bf16 %v3484_v10  ;;  %v1922_v10 = vld [vmem:[%s4338_s13 + $0x40] sm:$0xff] }
 0x59a   : > { %v1866_v49 = vmul.f32 %v4730_v4, %v1836_v37  ;;  %v3481_v4 = vunpack.i.h.bf16 %v4835_v18  ;;  %vm1847_vm3 = vcmp.eq.f32.partialorder %v1846_v9, 8.507059e+37  ;;  %v1923_v9 = vld [vmem:[%s4338_s13 + $0x48] sm:$0xff] }
 0x5a6   : > { %3473 = vrot.lane.b32.xlu2 %v4473_v13, %s4038_s9 }
 0x5cf   : > { %1807 = vadd.xlane.f32.xlu2 %v1806_v30 }
 0x5ea   : > { %v1606_v13 = vpop.f32.mrf.mxu1 }
 0x5eb   : > { %3215 = vmatmul.msk.f32.vlgmr.msra.gmra.mxu2 %vm1193_vm13, %v1606_v13  ;;  %v1865_v13 = vmul.f32 %v4721_v61, %v1822_v7  ;;  %v2189_v61 = vld [vmem:[%s4338_s13 + $0x60] sm:$0xff] }
 0x5ec   : > { %v4816_v63 = vpop.xlane.xlu1 %2068 }
 0x5ed   : > { %3557 = vrcp.f32 %v4816_v63  ;;  %v2101_v29 = vand.u32 2147483648, %v4816_v63  ;;  %vm2095_vm9 = vweird.f32 %v4816_v63  ;;  %v2099_v16 = vand.u32 2147483647, %v4816_v63 }
 0x5ef   : > { %vm2100_vm2 = vcmp.eq.f32.partialorder %v2099_v16, 8.507059e+37 }
 0x5f3   : > { %v4829_v32 = vpop.eup %3557 }
 0x5f4   : > { %v4824_v8 = vpop.xlane.xlu1 %2071  ;;  %v2091_v50 = vmul.f32 %v4829_v32, %v4816_v63  ;;  %vm2096_vm6 = vweird.f32 %v4829_v32 }
 0x5f5   : > { %vm2097_vm1 = vmor %vm2095_vm9, %vm2096_vm6  ;;  %vm2109_vm5 = vweird.f32 %v4824_v8  ;;  %v2113_v11 = vand.u32 2147483647, %v4824_v8 }
 0x5f6   : > { %v2092_v47 = vsub.f32 1.0, %v2091_v50  ;;  %v2102_v50 = vor.u32 1.1754944e-38, %v2101_v29 }
 0x5f7   : > { %vm2114_vm8 = vcmp.eq.f32.partialorder %v2113_v11, 8.507059e+37  ;;  %v3576_v11 = vld [vmem:[#allocation2] sm:$0xff] }
 0x5f8   : > { %v2093_v0 = vmul.f32 %v4829_v32, %v2092_v47 }
 0x5fa   : > { %v1609_v2 = vpop.f32.mrf.mxu1  ;;  %v2094_v15 = vadd.f32 %v4829_v32, %v2093_v0  ;;  %v2192_v0 = vld [vmem:[%s4338_s13 + $0x78] sm:$0xff] }
 0x5fb   : > { %3216 = vmatmul.msk.f32.gmra.mxu2 %vm1193_vm13, %v1609_v2 }
 0x5fc   : > { %v4850_v48 = vpop.xlane.xlu1 %2074  ;;  %v2098_v14 = vsel %vm2097_vm1, %v4829_v32, %v2094_v15 }
 0x5fd   : > { %v2129_v7 = vand.u32 2147483648, %v4850_v48 }
 0x5ff   : > { %v2130_v37 = vor.u32 1.1754944e-38, %v2129_v7  ;;  %v3577_v7 = vld [vmem:[#allocation2 + $0x18] sm:$0xff] }
 0x601   : > { %v4826_v25 = vpop.xlane.xlu2 %2065 }
 0x602   : > { %3559 = vrcp.f32 %v4826_v25  ;;  %v1612_v24 = vpop.f32.mrf.mxu1  ;;  %v2087_v53 = vand.u32 2147483648, %v4826_v25  ;;  %v2085_v30 = vand.u32 2147483647, %v4826_v25  ;;  %vm2081_vm12 = vweird.f32 %v4826_v25 }
 0x603   : > { %3217 = vmatmul.msk.f32.gmra.mxu2 %vm1193_vm13, %v1612_v24  ;;  %3561 = vrcp.f32 %v4824_v8  ;;  %v1850_v24 = vsel %vm1847_vm3, %v1849_v34, %v1845_v42 }
 0x604   : > { %3563 = vrcp.f32 %v4850_v48  ;;  %v2088_v3 = vor.u32 1.1754944e-38, %v2087_v53  ;;  %vm2086_vm0 = vcmp.eq.f32.partialorder %v2085_v30, 8.507059e+37  ;;  %v1867_v18 = vmul.f32 %v4742_v21, %v1850_v24 }
 0x605   : > { %v2115_v21 = vand.u32 2147483648, %v4824_v8 }
 0x607   : > { %v2116_v38 = vor.u32 1.1754944e-38, %v2115_v21 }
 0x608   : > { %v3560_v35 = vpop.eup %3559 }
 0x609   : > { %v2077_v39 = vmul.f32 %v3560_v35, %v4826_v25  ;;  %v3474_v41 = vpop.permute.xlu2 %3473  ;;  %v4852_v54 = vpop.eup %3561  ;;  %vm2082_vm11 = vweird.f32 %v3560_v35 }
 0x60a   : > { %v3475_v44 = vunpack.i.l.bf16 %v3474_v41  ;;  %v1615_v52 = vpop.f32.mrf.mxu1  ;;  %v3476_v55 = vunpack.i.h.bf16 %v3474_v41  ;;  %v2105_v1 = vmul.f32 %v4852_v54, %v4824_v8  ;;  %vm2083_vm15 = vmor %vm2081_vm12, %vm2082_vm11  ;;  %v3564_v17 = vpop.eup %3563  ;;  %vm2110_vm4 = vweird.f32 %v4852_v54 }
 0x60b   : > { %v2078_v51 = vsub.f32 1.0, %v2077_v39  ;;  %3218 = vmatmul.msk.f32.gmra.mxu2 %vm1193_vm13, %v1615_v52  ;;  %v2119_v19 = vmul.f32 %v3564_v17, %v4850_v48  ;;  %vm2111_vm7 = vmor %vm2109_vm5, %vm2110_vm4  ;;  %vm2124_vm10 = vweird.f32 %v3564_v17  ;;  %vm2123_vm11 = vweird.f32 %v4850_v48 }
 0x60c   : > { %1907 = vmatpush.msrb.mxu0 %v3475_v44  ;;  %3269 = vmatpush.msra.mxu1 %v3475_v44  ;;  %v2106_v22 = vsub.f32 1.0, %v2105_v1  ;;  %vm2125_vm12 = vmor %vm2123_vm11, %vm2124_vm10  ;;  %v2191_v1 = vld [vmem:[%s4338_s13 + $0x70] sm:$0xff] }
 0x60d   : > { %v2079_v58 = vmul.f32 %v3560_v35, %v2078_v51 }
 0x60e   : > { %1908 = vmatpush.msrb.mxu0 %v3476_v55  ;;  %3270 = vmatpush.msra.mxu1 %v3476_v55  ;;  %v2107_v43 = vmul.f32 %v4852_v54, %v2106_v22 }
 0x60f   : > { %v2080_v2 = vadd.f32 %v3560_v35, %v2079_v58  ;;  %3231 = vmatmul.msk.f32.vlgmr.msrb.gmra.mxu0 %vm1193_vm13, %v1865_v13  ;;  %3232 = vmatmul.msk.f32.vlgmr.msra.gmra.mxu1 %vm1193_vm13, %v1866_v49  ;;  %v1924_v49 = vld [vmem:[%s4338_s13 + $0x50] sm:$0xff] }
 0x610   : > { %2172 = vmatpush.msra.mxu0 %v3480_v60  ;;  %v2108_v63 = vadd.f32 %v4852_v54, %v2107_v43  ;;  %v1925_v60 = vld [vmem:[%s4338_s13 + $0x58] sm:$0xff]  ;;  %2217 = vmatpush.msrb.mxu1 %v2192_v0 }
 0x611   : > { %v2084_v57 = vsel %vm2083_vm15, %v3560_v35, %v2080_v2  ;;  %v2103_v35 = vsel %vm2100_vm2, %v2102_v50, %v2098_v14  ;;  %1950 = vmatpush.msrb.mxu2 %v1925_v60  ;;  %v2190_v2 = vld [vmem:[%s4338_s13 + $0x68] sm:$0xff]  ;;  %v3489_v43 = vld [vmem:[%s771_s1] ss:$0 sm:$0xff] }
 0x612   : > { %v2089_v25 = vsel %vm2086_vm0, %v2088_v3, %v2084_v57  ;;  %2173 = vmatpush.msra.mxu0 %v3481_v4  ;;  %v2133_v6 = vmul.f32 %v4765_v62, %v2103_v35  ;;  %v2112_v36 = vsel %vm2111_vm7, %v4852_v54, %v2108_v63  ;;  %v2127_v62 = vand.u32 2147483647, %v4850_v48  ;;  %2218 = vmatpush.msrb.mxu1 %v2191_v1  ;;  %v2408_v0 = vld [vmem:[%s4352_s26 + $0x1f0] sm:$0xff]  ;;  %v2409_v1 = vld [vmem:[%s4352_s26 + $0x1f8] sm:$0xff] }
 0x613   : > { %v2132_v5 = vmul.f32 %v4792_v45, %v2089_v25  ;;  %v2120_v45 = vsub.f32 1.0, %v2119_v19  ;;  %v2117_v39 = vsel %vm2114_vm8, %v2116_v38, %v2112_v36  ;;  %1951 = vmatpush.msrb.mxu2 %v1924_v49  ;;  %v3575_v19 = vld [vmem:[#allocation2 + $0x10] sm:$0xff] }
 0x614   : > { %2174 = vmatpush.msra.mxu0 %v3485_v26  ;;  %v2134_v44 = vmul.f32 %v4778_v28, %v2117_v39  ;;  %vm2128_vm14 = vcmp.eq.f32.partialorder %v2127_v62, 8.507059e+37  ;;  %2219 = vmatpush.msrb.mxu1 %v2190_v2  ;;  %v2402_v2 = vld [vmem:[%s4352_s26 + $0x1c0] sm:$0xff] }
 0x615   : > { %v2121_v32 = vmul.f32 %v3564_v17, %v2120_v45  ;;  %1952 = vmatpush.msrb.mxu2 %v1923_v9  ;;  %v2406_v9 = vld [vmem:[%s4352_s26 + $0x1e0] sm:$0xff] }
 0x616   : > { %2175 = vmatpush.msra.mxu0 %v3486_v23  ;;  %2220 = vmatpush.msrb.mxu1 %v2189_v61  ;;  %v2403_v61 = vld [vmem:[%s4352_s26 + $0x1c8] sm:$0xff] }
 0x617   : > { %3247 = vmatmul.msk.f32.vlgmr.msra.gmra.mxu0 %vm1193_vm13, %v2132_v5  ;;  %3233 = vmatmul.msk.f32.gmra.mxu1 %vm1193_vm13, %v1867_v18  ;;  %v2122_v41 = vadd.f32 %v3564_v17, %v2121_v32 }
 0x618   : > { %1953 = vmatpush.msrb.mxu2 %v1922_v10  ;;  %v2407_v10 = vld [vmem:[%s4352_s26 + $0x1e8] sm:$0xff]  ;;  %2478 = vmatpush.msrb.mxu0 %v2408_v0  ;;  %v2356_v0 = vld [vmem:[%s4352_s26 + $0x50] sm:$0xff] }
 0x619   : > { %v2126_v8 = vsel %vm2125_vm12, %v3564_v17, %v2122_v41  ;;  %2449 = vmatpush.msra.mxu3 %v2407_v10  ;;  %2507 = vmatpush.msra.mxu1 %v2409_v1  ;;  %v2355_v10 = vld [vmem:[%s4352_s26 + $0x48] sm:$0xff]  ;;  %v2357_v1 = vld [vmem:[%s4352_s26 + $0x58] sm:$0xff] }
 0x61a   : > { %v2131_v46 = vsel %vm2128_vm14, %v2130_v37, %v2126_v8  ;;  %2420 = vmatpush.msra.mxu2 %v2406_v9  ;;  %v2354_v9 = vld [vmem:[%s4352_s26 + $0x40] sm:$0xff] }
 0x61b   : > { %v2135_v47 = vmul.f32 %v4788_v40, %v2131_v46  ;;  %2450 = vmatpush.msra.mxu3 %v2403_v61  ;;  %v2351_v61 = vld [vmem:[%s4352_s26 + $0x28] sm:$0xff] }
 0x61c   : > { %2421 = vmatpush.msra.mxu2 %v2402_v2  ;;  %v2350_v2 = vld [vmem:[%s4352_s26 + $0x20] sm:$0xff] }
 0x61f   : > { %3248 = vmatmul.msk.f32.gmra.mxu0 %vm1193_vm13, %v2133_v6 }
 0x627   : > { %3249 = vmatmul.msk.f32.gmra.mxu0 %vm1193_vm13, %v2134_v44 }
 0x62f   : > { %3250 = vmatmul.msk.f32.gmra.mxu0 %vm1193_vm13, %v2135_v47 }
 0x642   : > { %v1808_v51 = vpop.xlane.xlu2 %1807 }
 0x643   : > { %3565 = vrcp.f32 %v1808_v51  ;;  %v1862_v28 = vand.u32 2147483648, %v1808_v51  ;;  %v1860_v55 = vand.u32 2147483647, %v1808_v51  ;;  %vm1856_vm0 = vweird.f32 %v1808_v51 }
 0x645   : > { %v1863_v58 = vor.u32 1.1754944e-38, %v1862_v28  ;;  %vm1861_vm6 = vcmp.eq.f32.partialorder %v1860_v55, 8.507059e+37 }
 0x649   : > { %v3566_v52 = vpop.eup %3565 }
 0x64a   : > { %v1852_v54 = vmul.f32 %v3566_v52, %v1808_v51  ;;  %vm1857_vm15 = vweird.f32 %v3566_v52  ;;  %v3578_v51 = vld [vmem:[#allocation2 + $0x8] sm:$0xff] }
 0x64b   : > { %vm1858_vm3 = vmor %vm1856_vm0, %vm1857_vm15 }
 0x64c   : > { %v1853_v53 = vsub.f32 1.0, %v1852_v54 }
 0x64e   : > { %v1854_v48 = vmul.f32 %v3566_v52, %v1853_v53 }
 0x650   : > { %v1855_v56 = vadd.f32 %v3566_v52, %v1854_v48 }
 0x652   : > { %v1859_v40 = vsel %vm1858_vm3, %v3566_v52, %v1855_v56 }
 0x653   : > { %v1864_v30 = vsel %vm1861_vm6, %v1863_v58, %v1859_v40 }
 0x654   : > { %v1868_v13 = vmul.f32 %v4806_v59, %v1864_v30 }
 0x656   : > { %3234 = vmatmul.msk.f32.gmra.mxu1 %vm1193_vm13, %v1868_v13 }
 0x66e   : > { %v1651_v22 = vpop.f32.mrf.mxu2 }
 0x66f   : > { %v1693_v23 = vadd.f32 %v4684_v12, %v1651_v22  ;;  %v2400_v22 = vld [vmem:[%s4352_s26 + $0x1b0] sm:$0xff] }
 0x67e   : > { %v1654_v24 = vpop.f32.mrf.mxu2 }
 0x67f   : > { %v1696_v50 = vadd.f32 %v4686_v33, %v1654_v24  ;;  %v2401_v24 = vld [vmem:[%s4352_s26 + $0x1b8] sm:$0xff] }
 0x686   : > { %v1657_v15 = vpop.f32.mrf.mxu2 }
 0x687   : > { %v1699_v32 = vadd.f32 %v4688_v27, %v1657_v15  ;;  %v2394_v15 = vld [vmem:[%s4352_s26 + $0x180] sm:$0xff] }
 0x68c   : > { %v1910_v59 = vpop.f32.mrf.mxu0  ;;  %v1913_v4 = vpop.f32.mrf.mxu1 }
 0x68d   : > { %3235 = vmatmul.msk.f32.vlgmr.msrb.gmra.mxu2 %vm1193_vm13, %v1910_v59  ;;  %v2404_v59 = vld [vmem:[%s4352_s26 + $0x1d0] sm:$0xff] }
 0x68e   : > { %v1660_v17 = vpop.f32.mrf.mxu2  ;;  %2479 = vmatpush.msrb.mxu0 %v2404_v59  ;;  %v2352_v59 = vld [vmem:[%s4352_s26 + $0x30] sm:$0xff] }
 0x68f   : > { %v1702_v8 = vadd.f32 %v4692_v31, %v1660_v17  ;;  %v2395_v17 = vld [vmem:[%s4352_s26 + $0x188] sm:$0xff] }
 0x690   : > { %2480 = vmatpush.msrb.mxu0 %v2400_v22 }
 0x694   : > { %v2177_v3 = vpop.f32.mrf.mxu0  ;;  %v1916_v42 = vpop.f32.mrf.mxu1 }
 0x695   : > { %3236 = vmatmul.msk.f32.gmra.mxu2 %vm1193_vm13, %v1913_v4  ;;  %3251 = vmatmul.msk.f32.vlgmr.msrb.gmra.mxu1 %vm1193_vm13, %v2177_v3  ;;  %v2405_v4 = vld [vmem:[%s4352_s26 + $0x1d8] sm:$0xff] }
 0x696   : > { %2508 = vmatpush.msra.mxu1 %v2405_v4  ;;  %v2353_v4 = vld [vmem:[%s4352_s26 + $0x38] sm:$0xff] }
 0x698   : > { %2509 = vmatpush.msra.mxu1 %v2401_v24 }
 0x69c   : > { %v2180_v34 = vpop.f32.mrf.mxu0 }
 0x69d   : > { %3237 = vmatmul.msk.f32.gmra.mxu2 %vm1193_vm13, %v1916_v42  ;;  %3252 = vmatmul.msk.f32.gmra.mxu1 %vm1193_vm13, %v2180_v34 }
 0x6a4   : > { %v2183_v57 = vpop.f32.mrf.mxu0 }
 0x6a5   : > { %3253 = vmatmul.msk.f32.gmra.mxu1 %vm1193_vm13, %v2183_v57 }
 0x6ac   : > { %v2186_v26 = vpop.f32.mrf.mxu0 }
 0x6ad   : > { %3254 = vmatmul.msk.f32.gmra.mxu1 %vm1193_vm13, %v2186_v26  ;;  %v2398_v26 = vld [vmem:[%s4352_s26 + $0x1a0] sm:$0xff] }
 0x6ae   : > { %2422 = vmatpush.msra.mxu2 %v2398_v26  ;;  %v2349_v26 = vld [vmem:[%s4352_s26 + $0x18] sm:$0xff] }
 0x6b0   : > { %2423 = vmatpush.msra.mxu2 %v2394_v15 }
 0x6d3   : > { %v1919_v25 = vpop.f32.mrf.mxu1 }
 0x6d4   : > { %3238 = vmatmul.msk.f32.gmra.mxu2 %vm1193_vm13, %v1919_v25  ;;  %v2399_v25 = vld [vmem:[%s4352_s26 + $0x1a8] sm:$0xff] }
 0x6d5   : > { %2451 = vmatpush.msra.mxu3 %v2399_v25 }
 0x6d7   : > { %2452 = vmatpush.msra.mxu3 %v2395_v17 }
 0x710   : > { %v1955_v29 = vpop.f32.mrf.mxu2 }
 0x711   : > { %v1967_v5 = vadd.f32 %v1955_v29, %v1693_v23  ;;  %v2396_v23 = vld [vmem:[%s4352_s26 + $0x190] sm:$0xff]  ;;  %v2397_v29 = vld [vmem:[%s4352_s26 + $0x198] sm:$0xff] }
 0x712   : > { %v2222_v16 = vpop.f32.mrf.mxu1  ;;  %2481 = vmatpush.msrb.mxu0 %v2396_v23  ;;  %2510 = vmatpush.msra.mxu1 %v2397_v29 }
 0x713   : > { %v2234_v18 = vadd.f32 %v2222_v16, %v1967_v5  ;;  %v2390_v5 = vld [vmem:[%s4352_s26 + $0x160] sm:$0xff]  ;;  %v2391_v16 = vld [vmem:[%s4352_s26 + $0x168] sm:$0xff] }
 0x714   : > { %2424 = vmatpush.msra.mxu2 %v2390_v5  ;;  %2453 = vmatpush.msra.mxu3 %v2391_v16 }
 0x715   : > { %v2238_v14 = vadd.f32 %v3575_v19, %v2234_v18  ;;  %v2392_v18 = vld [vmem:[%s4352_s26 + $0x170] sm:$0xff]  ;;  %v2386_v19 = vld [vmem:[%s4352_s26 + $0x140] sm:$0xff] }
 0x716   : > { %2482 = vmatpush.msrb.mxu0 %v2392_v18  ;;  %2425 = vmatpush.msra.mxu2 %v2386_v19 }
 0x717   : > { %v4932_v35 = vadd.f32 %v3489_v43, %v2238_v14  ;;  %v2387_v14 = vld [vmem:[%s4352_s26 + $0x148] sm:$0xff] }
 0x718   : > { %v1958_v45 = vpop.f32.mrf.mxu2  ;;  %2454 = vmatpush.msra.mxu3 %v2387_v14 }
 0x719   : > { %v1968_v63 = vadd.f32 %v1958_v45, %v1696_v50  ;;  %2252 = vadd.xlane.f32.xlu0 %v4932_v35  ;;  %v2388_v50 = vld [vmem:[%s4352_s26 + $0x150] sm:$0xff]  ;;  %v2389_v45 = vld [vmem:[%s4352_s26 + $0x158] sm:$0xff] }
 0x71a   : > { %v2225_v21 = vpop.f32.mrf.mxu1  ;;  %2483 = vmatpush.msrb.mxu0 %v2388_v50 }
 0x71b   : > { %v2235_v6 = vadd.f32 %v2225_v21, %v1968_v63  ;;  %v2382_v63 = vld [vmem:[%s4352_s26 + $0x120] sm:$0xff]  ;;  %v2383_v21 = vld [vmem:[%s4352_s26 + $0x128] sm:$0xff] }
 0x71c   : > { %2426 = vmatpush.msra.mxu2 %v2382_v63  ;;  %2455 = vmatpush.msra.mxu3 %v2383_v21 }
 0x71d   : > { %v2239_v12 = vadd.f32 %v3576_v11, %v2235_v6  ;;  %v2384_v6 = vld [vmem:[%s4352_s26 + $0x130] sm:$0xff]  ;;  %v2385_v11 = vld [vmem:[%s4352_s26 + $0x138] sm:$0xff] }
 0x71e   : > { %2484 = vmatpush.msrb.mxu0 %v2384_v6  ;;  %v5039_v6 = vld [vmem:[%s780_s24] ss:$0 sm:$0xff]  ;;  %s5276_s24 = sld [smem:[#allocation31_spill]] }
 0x71f   : > { %v4936_v36 = vadd.f32 %v3489_v43, %v2239_v12  ;;  %v2378_v12 = vld [vmem:[%s4352_s26 + $0x100] sm:$0xff] }
 0x720   : > { %v1961_v38 = vpop.f32.mrf.mxu2  ;;  %2427 = vmatpush.msra.mxu2 %v2378_v12 }
 0x721   : > { %v1969_v39 = vadd.f32 %v1961_v38, %v1699_v32  ;;  %2254 = vadd.xlane.f32.xlu1 %v4936_v36  ;;  %v2379_v32 = vld [vmem:[%s4352_s26 + $0x108] sm:$0xff]  ;;  %v2380_v38 = vld [vmem:[%s4352_s26 + $0x110] sm:$0xff] }
 0x722   : > { %v2228_v41 = vpop.f32.mrf.mxu1  ;;  %2456 = vmatpush.msra.mxu3 %v2379_v32  ;;  %2485 = vmatpush.msrb.mxu0 %v2380_v38  ;;  %v5044_v38 = vld [vmem:[%s789_s15] ss:$0 sm:$0xff] }
 0x723   : > { %v2236_v33 = vadd.f32 %v2228_v41, %v1969_v39  ;;  %v2381_v39 = vld [vmem:[%s4352_s26 + $0x118] sm:$0xff]  ;;  %v2374_v41 = vld [vmem:[%s4352_s26 + $0xe0] sm:$0xff] }
 0x724   : > { %2428 = vmatpush.msra.mxu2 %v2374_v41  ;;  %p3255_p3 = scmp.ne.s32.totalorder %s5276_s24, 1 }
 0x725   : > { %v2240_v44 = vadd.f32 %v3577_v7, %v2236_v33  ;;  %v2375_v33 = vld [vmem:[%s4352_s26 + $0xe8] sm:$0xff]  ;;  %v2376_v7 = vld [vmem:[%s4352_s26 + $0xf0] sm:$0xff]  ;;  %s5277_s23 = sld [smem:[#allocation41_spill]] (!%p3255_p3) }
 0x726   : > { %2457 = vmatpush.msra.mxu3 %v2375_v33  ;;  %2486 = vmatpush.msrb.mxu0 %v2376_v7  ;;  %s5278_s11 = sld [smem:[#allocation42_spill]] (!%p3255_p3) }
 0x727   : > { %v4939_v62 = vadd.f32 %v3489_v43, %v2240_v44  ;;  %v2377_v44 = vld [vmem:[%s4352_s26 + $0xf8] sm:$0xff]  ;;  %s5279_s3 = sld [smem:[#allocation44_spill]] (!%p3255_p3) }
 0x729   : > { %2256 = vadd.xlane.f32.xlu1 %v4939_v62 }
 0x72a   : > { %v2231_v47 = vpop.f32.mrf.mxu1 }
 0x757   : > { %v1964_v37 = vpop.f32.mrf.mxu2 }
 0x758   : > { %v1970_v46 = vadd.f32 %v1964_v37, %v1702_v8  ;;  %v2370_v8 = vld [vmem:[%s4352_s26 + $0xc0] sm:$0xff]  ;;  %v2371_v37 = vld [vmem:[%s4352_s26 + $0xc8] sm:$0xff] }
 0x759   : > { %2429 = vmatpush.msra.mxu2 %v2370_v8  ;;  %2458 = vmatpush.msra.mxu3 %v2371_v37 }
 0x75a   : > { %v2237_v27 = vadd.f32 %v2231_v47, %v1970_v46  ;;  %v2372_v46 = vld [vmem:[%s4352_s26 + $0xd0] sm:$0xff]  ;;  %v2373_v47 = vld [vmem:[%s4352_s26 + $0xd8] sm:$0xff] }
 0x75b   : > { %2487 = vmatpush.msrb.mxu0 %v2372_v46 }
 0x75c   : > { %v2241_v52 = vadd.f32 %v3578_v51, %v2237_v27  ;;  %v2366_v27 = vld [vmem:[%s4352_s26 + $0xa0] sm:$0xff]  ;;  %v2367_v51 = vld [vmem:[%s4352_s26 + $0xa8] sm:$0xff] }
 0x75d   : > { %2430 = vmatpush.msra.mxu2 %v2366_v27  ;;  %2459 = vmatpush.msra.mxu3 %v2367_v51 }
 0x75e   : > { %v4943_v54 = vadd.f32 %v3489_v43, %v2241_v52  ;;  %v2393_v43 = vld [vmem:[%s4352_s26 + $0x178] sm:$0xff]  ;;  %v2368_v52 = vld [vmem:[%s4352_s26 + $0xb0] sm:$0xff] }
 0x75f   : > { %2511 = vmatpush.msra.mxu1 %v2393_v43  ;;  %2488 = vmatpush.msrb.mxu0 %v2368_v52 }
 0x760   : > { %2258 = vadd.xlane.f32.xlu2 %v4943_v54 }
 0x761   : > { %2512 = vmatpush.msra.mxu1 %v2389_v45 }
 0x763   : > { %2513 = vmatpush.msra.mxu1 %v2385_v11 }
 0x765   : > { %2514 = vmatpush.msra.mxu1 %v2381_v39 }
 0x767   : > { %2515 = vmatpush.msra.mxu1 %v2377_v44 }
 0x769   : > { %2516 = vmatpush.msra.mxu1 %v2373_v47 }
 0x78c   : > { %v2253_v53 = vpop.xlane.xlu0 %2252 }
 0x78d   : > { %v2260_v28 = vmul.f32 %v2253_v53, %v4385_v20  ;;  %v2369_v53 = vld [vmem:[%s4352_s26 + $0xb8] sm:$0xff] }
 0x78e   : > { %2517 = vmatpush.msra.mxu1 %v2369_v53 }
 0x78f   : > { %v4948_v48 = vsub.f32 %v4932_v35, %v2260_v28  ;;  %v2362_v28 = vld [vmem:[%s4352_s26 + $0x80] sm:$0xff] }
 0x790   : > { %2431 = vmatpush.msra.mxu2 %v2362_v28 }
 0x791   : > { %v2268_v31 = vmul.f32 %v4948_v48, %v4948_v48 }
 0x793   : > { %2272 = vadd.xlane.f32.xlu1 %v2268_v31  ;;  %v2363_v31 = vld [vmem:[%s4352_s26 + $0x88] sm:$0xff] }
 0x794   : > { %v2255_v55 = vpop.xlane.xlu1 %2254  ;;  %2460 = vmatpush.msra.mxu3 %v2363_v31 }
 0x795   : > { %v2261_v56 = vmul.f32 %v2255_v55, %v4385_v20  ;;  %v2364_v55 = vld [vmem:[%s4352_s26 + $0x90] sm:$0xff] }
 0x796   : > { %2489 = vmatpush.msrb.mxu0 %v2364_v55 }
 0x797   : > { %v4954_v58 = vsub.f32 %v4936_v36, %v2261_v56  ;;  %v2365_v56 = vld [vmem:[%s4352_s26 + $0x98] sm:$0xff] }
 0x798   : > { %2518 = vmatpush.msra.mxu1 %v2365_v56 }
 0x799   : > { %v2269_v40 = vmul.f32 %v4954_v58, %v4954_v58 }
 0x79b   : > { %2274 = vadd.xlane.f32.xlu2 %v2269_v40  ;;  %v2358_v40 = vld [vmem:[%s4352_s26 + $0x60] sm:$0xff] }
 0x79c   : > { %v2257_v30 = vpop.xlane.xlu1 %2256  ;;  %2432 = vmatpush.msra.mxu2 %v2358_v40  ;;  %v2599_v40 = vld [vmem:[%s4354_s28 + $0x178] sm:$0xff] }
 0x79d   : > { %v2262_v13 = vmul.f32 %v2257_v30, %v4385_v20  ;;  %v2359_v30 = vld [vmem:[%s4352_s26 + $0x68] sm:$0xff] }
 0x79e   : > { %2461 = vmatpush.msra.mxu3 %v2359_v30  ;;  %2433 = vmatpush.msra.mxu2 %v2354_v9  ;;  %v2615_v30 = vld [vmem:[%s4354_s28 + $0x1f8] sm:$0xff] }
 0x79f   : > { %v4960_v60 = vsub.f32 %v4939_v62, %v2262_v13  ;;  %v2360_v13 = vld [vmem:[%s4352_s26 + $0x70] sm:$0xff] }
 0x7a0   : > { %2490 = vmatpush.msrb.mxu0 %v2360_v13  ;;  %2462 = vmatpush.msra.mxu3 %v2355_v10  ;;  %v2598_v13 = vld [vmem:[%s4354_s28 + $0x170] sm:$0xff]  ;;  %v2613_v10 = vld [vmem:[%s4354_s28 + $0x1e8] sm:$0xff] }
 0x7a1   : > { %v2270_v49 = vmul.f32 %v4960_v60, %v4960_v60  ;;  %2434 = vmatpush.msra.mxu2 %v2350_v2 }
 0x7a2   : > { %2491 = vmatpush.msrb.mxu0 %v2356_v0  ;;  %2463 = vmatpush.msra.mxu3 %v2351_v61  ;;  %v2567_v0 = vld [vmem:[%s4354_s28 + $0x78] sm:$0xff]  ;;  %v2566_v61 = vld [vmem:[%s4354_s28 + $0x70] sm:$0xff] }
 0x7a3   : > { %2276 = vadd.xlane.f32.xlu1 %v2270_v49  ;;  %v2361_v49 = vld [vmem:[%s4352_s26 + $0x78] sm:$0xff] }
 0x7a4   : > { %2519 = vmatpush.msra.mxu1 %v2361_v49  ;;  %2492 = vmatpush.msrb.mxu0 %v2352_v59  ;;  %v2597_v49 = vld [vmem:[%s4354_s28 + $0x168] sm:$0xff]  ;;  %v2582_v59 = vld [vmem:[%s4354_s28 + $0xf0] sm:$0xff] }
 0x7a6   : > { %2520 = vmatpush.msra.mxu1 %v2357_v1  ;;  %v2583_v1 = vld [vmem:[%s4354_s28 + $0xf8] sm:$0xff] }
 0x7a8   : > { %2521 = vmatpush.msra.mxu1 %v2353_v4  ;;  %v2596_v4 = vld [vmem:[%s4354_s28 + $0x160] sm:$0xff] }
 0x7aa   : > { %2522 = vmatpush.msra.mxu1 %v2349_v26  ;;  %v2581_v26 = vld [vmem:[%s4354_s28 + $0xe8] sm:$0xff] }
 0x7ac   : > { %2707 = vmatpush.msrb.mxu1 %v2615_v30 }
 0x7d3   : > { %v2259_v3 = vpop.xlane.xlu2 %2258 }
 0x7d4   : > { %v2263_v42 = vmul.f32 %v2259_v3, %v4385_v20  ;;  %v2346_v3 = vld [vmem:[%s4352_s26] sm:$0xff] }
 0x7d5   : > { %2435 = vmatpush.msra.mxu2 %v2346_v3  ;;  %v2612_v3 = vld [vmem:[%s4354_s28 + $0x1e0] sm:$0xff] }
 0x7d6   : > { %v4974_v34 = vsub.f32 %v4943_v54, %v2263_v42  ;;  %v2347_v42 = vld [vmem:[%s4352_s26 + $0x8] sm:$0xff] }
 0x7d7   : > { %2464 = vmatpush.msra.mxu3 %v2347_v42  ;;  %2620 = vmatpush.msrb.mxu2 %v2567_v0  ;;  %v2601_v0 = vld [vmem:[%s4354_s28 + $0x188] sm:$0xff] }
 0x7d8   : > { %v2271_v57 = vmul.f32 %v4974_v34, %v4974_v34 }
 0x7d9   : > { %2649 = vmatpush.msrb.mxu3 %v2583_v1  ;;  %2621 = vmatpush.msrb.mxu2 %v2566_v61  ;;  %v2555_v1 = vld [vmem:[%s4354_s28 + $0x18] sm:$0xff]  ;;  %v2584_v61 = vld [vmem:[%s4354_s28 + $0x100] sm:$0xff] }
 0x7da   : > { %2278 = vadd.xlane.f32.xlu2 %v2271_v57  ;;  %v2348_v57 = vld [vmem:[%s4352_s26 + $0x10] sm:$0xff] }
 0x7db   : > { %2493 = vmatpush.msrb.mxu0 %v2348_v57  ;;  %v2565_v57 = vld [vmem:[%s4354_s28 + $0x68] sm:$0xff]  ;;  %2650 = vmatpush.msrb.mxu3 %v2582_v59  ;;  %v2600_v59 = vld [vmem:[%s4354_s28 + $0x180] sm:$0xff] }
 0x7dc   : > { %2622 = vmatpush.msrb.mxu2 %v2565_v57  ;;  %v2569_v57 = vld [vmem:[%s4354_s28 + $0x88] sm:$0xff] }
 0x7dd   : > { %2678 = vmatpush.msra.mxu0 %v2599_v40  ;;  %2651 = vmatpush.msrb.mxu3 %v2581_v26  ;;  %v2552_v26 = vld [vmem:[%s4354_s28] sm:$0xff] }
 0x7df   : > { %2679 = vmatpush.msra.mxu0 %v2598_v13 }
 0x7e1   : > { %2680 = vmatpush.msra.mxu0 %v2597_v49  ;;  %v2573_v49 = vld [vmem:[%s4354_s28 + $0xa8] sm:$0xff] }
 0x7e3   : > { %2681 = vmatpush.msra.mxu0 %v2596_v4  ;;  %v2554_v4 = vld [vmem:[%s4354_s28 + $0x10] sm:$0xff] }
 0x806   : > { %v2273_v25 = vpop.xlane.xlu1 %2272 }
 0x807   : > { %v2280_v22 = vmul.f32 %v2273_v25, %v4385_v20  ;;  %v2595_v25 = vld [vmem:[%s4354_s28 + $0x158] sm:$0xff] }
 0x808   : > { %2682 = vmatpush.msra.mxu0 %v2595_v25  ;;  %v2568_v25 = vld [vmem:[%s4354_s28 + $0x80] sm:$0xff] }
 0x809   : > { %v2284_v24 = vadd.f32 1e-05, %v2280_v22  ;;  %v2611_v22 = vld [vmem:[%s4354_s28 + $0x1d8] sm:$0xff] }
 0x80b   : > { %3567 = vrsqrt.f32 %v2284_v24  ;;  %vm2294_vm9 = vweird.f32 %v2284_v24 }
 0x80e   : > { %v2275_v15 = vpop.xlane.xlu2 %2274 }
 0x80f   : > { %v2281_v17 = vmul.f32 %v2275_v15, %v4385_v20  ;;  %v2580_v15 = vld [vmem:[%s4354_s28 + $0xe0] sm:$0xff] }
 0x810   : > { %2652 = vmatpush.msrb.mxu3 %v2580_v15 }
 0x811   : > { %v3568_v23 = vpop.eup %3567  ;;  %v2285_v29 = vadd.f32 1e-05, %v2281_v17  ;;  %v2594_v17 = vld [vmem:[%s4354_s28 + $0x150] sm:$0xff] }
 0x812   : > { %v2289_v5 = vmul.f32 %v3568_v23, %v2284_v24  ;;  %vm2295_vm13 = vweird.f32 %v3568_v23  ;;  %v2564_v24 = vld [vmem:[%s4354_s28 + $0x60] sm:$0xff]  ;;  %2683 = vmatpush.msra.mxu0 %v2594_v17 }
 0x813   : > { %3569 = vrsqrt.f32 %v2285_v29  ;;  %vm2296_vm1 = vmor %vm2294_vm9, %vm2295_vm13  ;;  %vm2304_vm4 = vweird.f32 %v2285_v29  ;;  %2623 = vmatpush.msrb.mxu2 %v2564_v24 }
 0x814   : > { %v2290_v16 = vmul.f32 %v3568_v23, %v2289_v5  ;;  %v2579_v5 = vld [vmem:[%s4354_s28 + $0xd8] sm:$0xff] }
 0x815   : > { %2653 = vmatpush.msrb.mxu3 %v2579_v5 }
 0x816   : > { %v2291_v18 = vmul.f32 0.5, %v2290_v16  ;;  %v2277_v43 = vpop.xlane.xlu1 %2276  ;;  %v2593_v16 = vld [vmem:[%s4354_s28 + $0x148] sm:$0xff] }
 0x817   : > { %v2282_v19 = vmul.f32 %v2277_v43, %v4385_v20  ;;  %v2562_v43 = vld [vmem:[%s4354_s28 + $0x50] sm:$0xff]  ;;  %2684 = vmatpush.msra.mxu0 %v2593_v16 }
 0x818   : > { %v2292_v14 = vsub.f32 1.5, %v2291_v18  ;;  %v2609_v18 = vld [vmem:[%s4354_s28 + $0x1c8] sm:$0xff] }
 0x819   : > { %v3570_v50 = vpop.eup %3569  ;;  %v2286_v45 = vadd.f32 1e-05, %v2282_v19  ;;  %v2578_v19 = vld [vmem:[%s4354_s28 + $0xd0] sm:$0xff] }
 0x81a   : > { %v2293_v63 = vmul.f32 %v3568_v23, %v2292_v14  ;;  %v2299_v21 = vmul.f32 %v3570_v50, %v2285_v29  ;;  %vm2305_vm2 = vweird.f32 %v3570_v50  ;;  %v2563_v29 = vld [vmem:[%s4354_s28 + $0x58] sm:$0xff]  ;;  %v2592_v14 = vld [vmem:[%s4354_s28 + $0x140] sm:$0xff]  ;;  %2654 = vmatpush.msrb.mxu3 %v2578_v19 }
 0x81b   : > { %3571 = vrsqrt.f32 %v2286_v45  ;;  %vm2306_vm5 = vmor %vm2304_vm4, %vm2305_vm2  ;;  %vm2314_vm8 = vweird.f32 %v2286_v45  ;;  %2624 = vmatpush.msrb.mxu2 %v2563_v29  ;;  %2685 = vmatpush.msra.mxu0 %v2592_v14 }
 0x81c   : > { %v2297_v11 = vsel %vm2296_vm1, %v3568_v23, %v2293_v63  ;;  %v2300_v12 = vmul.f32 %v3570_v50, %v2299_v21  ;;  %v2610_v23 = vld [vmem:[%s4354_s28 + $0x1d0] sm:$0xff]  ;;  %v2561_v63 = vld [vmem:[%s4354_s28 + $0x48] sm:$0xff] }
 0x81d   : > { %v2328_v32 = vmul.f32 %v2297_v11, %v4948_v48  ;;  %v2577_v21 = vld [vmem:[%s4354_s28 + $0xc8] sm:$0xff]  ;;  %2625 = vmatpush.msrb.mxu2 %v2562_v43 }
 0x81e   : > { %v2301_v39 = vmul.f32 0.5, %v2300_v12  ;;  %v2591_v12 = vld [vmem:[%s4354_s28 + $0x138] sm:$0xff]  ;;  %2655 = vmatpush.msrb.mxu3 %v2577_v21 }
 0x81f   : > { %v2335_v41 = vmul.f32 %v5039_v6, %v2328_v32  ;;  %v2607_v32 = vld [vmem:[%s4354_s28 + $0x1b8] sm:$0xff]  ;;  %2626 = vmatpush.msrb.mxu2 %v2561_v63  ;;  %2686 = vmatpush.msra.mxu0 %v2591_v12 }
 0x820   : > { %v2302_v33 = vsub.f32 1.5, %v2301_v39  ;;  %v2560_v39 = vld [vmem:[%s4354_s28 + $0x40] sm:$0xff] }
 0x821   : > { %v3572_v7 = vpop.eup %3571  ;;  %v2342_v44 = vadd.f32 %v5044_v38, %v2335_v41  ;;  %v2576_v41 = vld [vmem:[%s4354_s28 + $0xc0] sm:$0xff]  ;;  %2627 = vmatpush.msrb.mxu2 %v2560_v39 }
 0x822   : > { %v2303_v8 = vmul.f32 %v3570_v50, %v2302_v33  ;;  %v2309_v37 = vmul.f32 %v3572_v7, %v2286_v45  ;;  %vm2315_vm7 = vweird.f32 %v3572_v7  ;;  %2656 = vmatpush.msrb.mxu3 %v2576_v41 }
 0x823   : > { %2436 = vmatmul.f32.vlgmr.msra.gmra.mxu2 %v2342_v44  ;;  %2465 = vmatmul.f32.vlgmr.msra.gmra.mxu3 %v2342_v44  ;;  %vm2316_vm10 = vmor %vm2314_vm8, %vm2315_vm7 }
 0x824   : > { %v2307_v46 = vsel %vm2306_vm5, %v3570_v50, %v2303_v8  ;;  %v2310_v47 = vmul.f32 %v3572_v7, %v2309_v37  ;;  %2494 = vmatmul.f32.vlgmr.msrb.gmra.mxu0 %v2342_v44  ;;  %2523 = vmatmul.f32.vlgmr.msra.gmra.mxu1 %v2342_v44  ;;  %v2608_v50 = vld [vmem:[%s4354_s28 + $0x1c0] sm:$0xff]  ;;  %v2606_v44 = vld [vmem:[%s4354_s28 + $0x1b0] sm:$0xff]  ;;  %v2559_v8 = vld [vmem:[%s4354_s28 + $0x38] sm:$0xff] }
 0x825   : > { %v2329_v48 = vmul.f32 %v2307_v46, %v4954_v58  ;;  %v2575_v37 = vld [vmem:[%s4354_s28 + $0xb8] sm:$0xff]  ;;  %2628 = vmatpush.msrb.mxu2 %v2559_v8 }
 0x826   : > { %v2311_v27 = vmul.f32 0.5, %v2310_v47  ;;  %v2589_v47 = vld [vmem:[%s4354_s28 + $0x128] sm:$0xff]  ;;  %2657 = vmatpush.msrb.mxu3 %v2575_v37 }
 0x827   : > { %v2336_v51 = vmul.f32 %v5039_v6, %v2329_v48  ;;  %v2605_v48 = vld [vmem:[%s4354_s28 + $0x1a8] sm:$0xff] }
 0x828   : > { %v2312_v52 = vsub.f32 1.5, %v2311_v27  ;;  %v2558_v27 = vld [vmem:[%s4354_s28 + $0x30] sm:$0xff] }
 0x829   : > { %v2343_v53 = vadd.f32 %v5044_v38, %v2336_v51  ;;  %v2574_v51 = vld [vmem:[%s4354_s28 + $0xb0] sm:$0xff]  ;;  %2629 = vmatpush.msrb.mxu2 %v2558_v27 }
 0x82a   : > { %v2313_v28 = vmul.f32 %v3572_v7, %v2312_v52  ;;  %2658 = vmatpush.msrb.mxu3 %v2574_v51 }
 0x82b   : > { %2439 = vmatmul.f32.gmra.mxu2 %v2343_v53  ;;  %2468 = vmatmul.f32.gmra.mxu3 %v2343_v53 }
 0x82c   : > { %v2317_v31 = vsel %vm2316_vm10, %v3572_v7, %v2313_v28  ;;  %2497 = vmatmul.f32.gmra.mxu0 %v2343_v53  ;;  %2526 = vmatmul.f32.gmra.mxu1 %v2343_v53  ;;  %v2590_v7 = vld [vmem:[%s4354_s28 + $0x130] sm:$0xff]  ;;  %v2588_v53 = vld [vmem:[%s4354_s28 + $0x120] sm:$0xff] }
 0x82d   : > { %v2330_v58 = vmul.f32 %v2317_v31, %v4960_v60  ;;  %v2614_v60 = vld [vmem:[%s4354_s28 + $0x1f0] sm:$0xff]  ;;  %2687 = vmatpush.msra.mxu0 %v2590_v7  ;;  %v2604_v28 = vld [vmem:[%s4354_s28 + $0x1a0] sm:$0xff]  ;;  %2659 = vmatpush.msrb.mxu3 %v2573_v49 }
 0x82e   : > { %2708 = vmatpush.msrb.mxu1 %v2614_v60  ;;  %v2557_v60 = vld [vmem:[%s4354_s28 + $0x28] sm:$0xff] }
 0x82f   : > { %v2337_v55 = vmul.f32 %v5039_v6, %v2330_v58  ;;  %2688 = vmatpush.msra.mxu0 %v2589_v47  ;;  %v2587_v58 = vld [vmem:[%s4354_s28 + $0x118] sm:$0xff]  ;;  %2630 = vmatpush.msrb.mxu2 %v2557_v60 }
 0x830   : > { %2709 = vmatpush.msrb.mxu1 %v2613_v10  ;;  %v2585_v10 = vld [vmem:[%s4354_s28 + $0x108] sm:$0xff] }
 0x831   : > { %v2344_v56 = vadd.f32 %v5044_v38, %v2337_v55  ;;  %v2603_v55 = vld [vmem:[%s4354_s28 + $0x198] sm:$0xff]  ;;  %2689 = vmatpush.msra.mxu0 %v2588_v53 }
 0x832   : > { %2710 = vmatpush.msrb.mxu1 %v2612_v3  ;;  %v2570_v3 = vld [vmem:[%s4354_s28 + $0x90] sm:$0xff] }
 0x833   : > { %2442 = vmatmul.f32.gmra.mxu2 %v2344_v56  ;;  %2471 = vmatmul.f32.gmra.mxu3 %v2344_v56 }
 0x834   : > { %2500 = vmatmul.f32.gmra.mxu0 %v2344_v56  ;;  %2529 = vmatmul.f32.gmra.mxu1 %v2344_v56 }
 0x835   : > { %2711 = vmatpush.msrb.mxu1 %v2611_v22  ;;  %2690 = vmatpush.msra.mxu0 %v2587_v58  ;;  %v2410_v22 = vld [vmem:[%s4376_s29] sm:$0xf] }
 0x836   : > { %v2414_v24 = vperm.slane %v2410_v22, 2  ;;  %v2415_v15 = vperm.slane %v2410_v22, 3  ;;  %v2412_v16 = vperm.slane %v2410_v22, 0 }
 0x837   : > { %2712 = vmatpush.msrb.mxu1 %v2610_v23 }
 0x839   : > { %2713 = vmatpush.msrb.mxu1 %v2609_v18  ;;  %v2413_v18 = vperm.slane %v2410_v22, 1 }
 0x83b   : > { %2714 = vmatpush.msrb.mxu1 %v2608_v50 }
 0x83d   : > { %2715 = vmatpush.msrb.mxu1 %v2607_v32 }
 0x83f   : > { %2716 = vmatpush.msrb.mxu1 %v2606_v44 }
 0x841   : > { %2717 = vmatpush.msrb.mxu1 %v2605_v48 }
 0x843   : > { %2718 = vmatpush.msrb.mxu1 %v2604_v28 }
 0x845   : > { %2719 = vmatpush.msrb.mxu1 %v2603_v55 }
 0x84d   : > { %v2279_v9 = vpop.xlane.xlu2 %2278 }
 0x84e   : > { %v2283_v2 = vmul.f32 %v2279_v9, %v4385_v20  ;;  %v2586_v9 = vld [vmem:[%s4354_s28 + $0x110] sm:$0xff] }
 0x84f   : > { %2691 = vmatpush.msra.mxu0 %v2586_v9 }
 0x850   : > { %v5067_v42 = vadd.f32 1e-05, %v2283_v2  ;;  %v2571_v2 = vld [vmem:[%s4354_s28 + $0x98] sm:$0xff] }
 0x851   : > { %2692 = vmatpush.msra.mxu0 %v2585_v10 }
 0x852   : > { %3573 = vrsqrt.f32 %v5067_v42  ;;  %vm2324_vm12 = vweird.f32 %v5067_v42 }
 0x853   : > { %2693 = vmatpush.msra.mxu0 %v2584_v61 }
 0x858   : > { %v3574_v45 = vpop.eup %3573 }
 0x859   : > { %v2319_v11 = vmul.f32 %v3574_v45, %v5067_v42  ;;  %vm2325_vm11 = vweird.f32 %v3574_v45  ;;  %v2553_v42 = vld [vmem:[%s4354_s28 + $0x8] sm:$0xff] }
 0x85a   : > { %vm2326_vm14 = vmor %vm2324_vm12, %vm2325_vm11 }
 0x85b   : > { %v2320_v33 = vmul.f32 %v3574_v45, %v2319_v11 }
 0x85d   : > { %v2321_v46 = vmul.f32 0.5, %v2320_v33 }
 0x85f   : > { %v2322_v52 = vsub.f32 1.5, %v2321_v46 }
 0x861   : > { %v2323_v31 = vmul.f32 %v3574_v45, %v2322_v52 }
 0x863   : > { %v2327_v56 = vsel %vm2326_vm14, %v3574_v45, %v2323_v31 }
 0x864   : > { %v2331_v40 = vmul.f32 %v2327_v56, %v4974_v34  ;;  %v2602_v34 = vld [vmem:[%s4354_s28 + $0x190] sm:$0xff] }
 0x865   : > { %2720 = vmatpush.msrb.mxu1 %v2602_v34 }
 0x866   : > { %v2338_v30 = vmul.f32 %v5039_v6, %v2331_v40  ;;  %v2556_v6 = vld [vmem:[%s4354_s28 + $0x20] sm:$0xff] }
 0x867   : > { %2631 = vmatpush.msrb.mxu2 %v2556_v6  ;;  %2721 = vmatpush.msrb.mxu1 %v2601_v0 }
 0x868   : > { %v2345_v13 = vadd.f32 %v5044_v38, %v2338_v30  ;;  %v2572_v38 = vld [vmem:[%s4354_s28 + $0xa0] sm:$0xff] }
 0x869   : > { %2660 = vmatpush.msrb.mxu3 %v2572_v38  ;;  %2632 = vmatpush.msrb.mxu2 %v2555_v1 }
 0x86a   : > { %2445 = vmatmul.f32.gmra.mxu2 %v2345_v13  ;;  %2474 = vmatmul.f32.gmra.mxu3 %v2345_v13 }
 0x86b   : > { %2503 = vmatmul.f32.gmra.mxu0 %v2345_v13  ;;  %2532 = vmatmul.f32.gmra.mxu1 %v2345_v13 }
 0x86c   : > { %2661 = vmatpush.msrb.mxu3 %v2571_v2  ;;  %2722 = vmatpush.msrb.mxu1 %v2600_v59 }
 0x86d   : > { %2633 = vmatpush.msrb.mxu2 %v2554_v4  ;;  %v3492_v4 = vld [vmem:[%s908_s16] ss:$0 sm:$0xff] }
 0x86e   : > { %2662 = vmatpush.msrb.mxu3 %v2570_v3 }
 0x86f   : > { %2634 = vmatpush.msrb.mxu2 %v2553_v42 }
 0x870   : > { %2663 = vmatpush.msrb.mxu3 %v2569_v57 }
 0x871   : > { %2635 = vmatpush.msrb.mxu2 %v2552_v26 }
 0x872   : > { %2664 = vmatpush.msrb.mxu3 %v2568_v25 }
 0x8a1   : > { %v2495_v17 = vpop.f32.mrf.mxu0  ;;  %v2524_v23 = vpop.f32.mrf.mxu1 }
 0x8a2   : > { %v2496_v29 = vadd.f32 %v2495_v17, %v2414_v24  ;;  %v2525_v5 = vadd.f32 %v2524_v23, %v2415_v15 }
 0x8a4   : > { %v2538_v43 = vmax.f32 %v2496_v29, 0.0  ;;  %v2539_v19 = vmax.f32 %v2525_v5, 0.0 }
 0x8a6   : > { %2694 = vmatmul.f32.vlgmr.msra.gmra.mxu0 %v2538_v43  ;;  %2723 = vmatmul.f32.vlgmr.msrb.gmra.mxu1 %v2539_v19  ;;  %v2437_v14 = vpop.f32.mrf.mxu2  ;;  %v2466_v50 = vpop.f32.mrf.mxu3 }
 0x8a7   : > { %v2438_v45 = vadd.f32 %v2437_v14, %v2412_v16  ;;  %v2467_v63 = vadd.f32 %v2466_v50, %v2413_v18 }
 0x8a9   : > { %v2536_v21 = vmax.f32 %v2438_v45, 0.0  ;;  %v2537_v11 = vmax.f32 %v2467_v63, 0.0  ;;  %v2498_v12 = vpop.f32.mrf.mxu0  ;;  %v2527_v32 = vpop.f32.mrf.mxu1 }
 0x8aa   : > { %v2499_v39 = vadd.f32 %v2498_v12, %v2414_v24  ;;  %v2528_v41 = vadd.f32 %v2527_v32, %v2415_v15 }
 0x8ab   : > { %2636 = vmatmul.f32.vlgmr.msrb.gmra.mxu2 %v2536_v21  ;;  %2665 = vmatmul.f32.vlgmr.msrb.gmra.mxu3 %v2537_v11 }
 0x8ac   : > { %v2542_v33 = vmax.f32 %v2499_v39, 0.0  ;;  %v2543_v7 = vmax.f32 %v2528_v41, 0.0 }
 0x8ae   : > { %2697 = vmatmul.f32.gmra.mxu0 %v2542_v33  ;;  %2726 = vmatmul.f32.gmra.mxu1 %v2543_v7  ;;  %v2440_v44 = vpop.f32.mrf.mxu2  ;;  %v2469_v8 = vpop.f32.mrf.mxu3 }
 0x8af   : > { %v2441_v37 = vadd.f32 %v2440_v44, %v2412_v16  ;;  %v2470_v46 = vadd.f32 %v2469_v8, %v2413_v18 }
 0x8b1   : > { %v2540_v47 = vmax.f32 %v2441_v37, 0.0  ;;  %v2541_v48 = vmax.f32 %v2470_v46, 0.0  ;;  %v2501_v27 = vpop.f32.mrf.mxu0  ;;  %v2530_v51 = vpop.f32.mrf.mxu1 }
 0x8b2   : > { %v2502_v52 = vadd.f32 %v2501_v27, %v2414_v24  ;;  %v2531_v53 = vadd.f32 %v2530_v51, %v2415_v15 }
 0x8b3   : > { %2639 = vmatmul.f32.gmra.mxu2 %v2540_v47  ;;  %2668 = vmatmul.f32.gmra.mxu3 %v2541_v48 }
 0x8b4   : > { %v2546_v28 = vmax.f32 %v2502_v52, 0.0  ;;  %v2547_v31 = vmax.f32 %v2531_v53, 0.0 }
 0x8b6   : > { %2700 = vmatmul.f32.gmra.mxu0 %v2546_v28  ;;  %2729 = vmatmul.f32.gmra.mxu1 %v2547_v31  ;;  %v2443_v58 = vpop.f32.mrf.mxu2  ;;  %v2472_v55 = vpop.f32.mrf.mxu3 }
 0x8b7   : > { %v2444_v56 = vadd.f32 %v2443_v58, %v2412_v16  ;;  %v2473_v40 = vadd.f32 %v2472_v55, %v2413_v18 }
 0x8b9   : > { %v2544_v30 = vmax.f32 %v2444_v56, 0.0  ;;  %v2545_v13 = vmax.f32 %v2473_v40, 0.0 }
 0x8bb   : > { %2642 = vmatmul.f32.gmra.mxu2 %v2544_v30  ;;  %2671 = vmatmul.f32.gmra.mxu3 %v2545_v13 }
 0x8e8   : > { %v2504_v60 = vpop.f32.mrf.mxu0  ;;  %v2533_v49 = vpop.f32.mrf.mxu1 }
 0x8e9   : > { %v2505_v9 = vadd.f32 %v2504_v60, %v2414_v24  ;;  %v2534_v34 = vadd.f32 %v2533_v49, %v2415_v15 }
 0x8eb   : > { %v2550_v6 = vmax.f32 %v2505_v9, 0.0  ;;  %v2551_v38 = vmax.f32 %v2534_v34, 0.0 }
 0x8ed   : > { %2703 = vmatmul.f32.gmra.mxu0 %v2550_v6  ;;  %2732 = vmatmul.f32.gmra.mxu1 %v2551_v38  ;;  %v2446_v10 = vpop.f32.mrf.mxu2  ;;  %v2475_v0 = vpop.f32.mrf.mxu3 }
 0x8ee   : > { %v2447_v1 = vadd.f32 %v2446_v10, %v2412_v16  ;;  %v2476_v2 = vadd.f32 %v2475_v0, %v2413_v18 }
 0x8f0   : > { %v2548_v61 = vmax.f32 %v2447_v1, 0.0  ;;  %v2549_v59 = vmax.f32 %v2476_v2, 0.0 }
 0x8f2   : > { %2645 = vmatmul.f32.gmra.mxu2 %v2548_v61  ;;  %2674 = vmatmul.f32.gmra.mxu3 %v2549_v59 }
 0x923   : > { %v2695_v3 = vpop.f32.mrf.mxu0  ;;  %v2724_v25 = vpop.f32.mrf.mxu1 }
 0x92b   : > { %v2698_v16 = vpop.f32.mrf.mxu0  ;;  %v2727_v43 = vpop.f32.mrf.mxu1 }
 0x92e   : > { %v2637_v42 = vpop.f32.mrf.mxu2  ;;  %v2666_v57 = vpop.f32.mrf.mxu3 }
 0x92f   : > { %v2638_v26 = vadd.f32 %v3492_v4, %v2637_v42 }
 0x931   : > { %v2667_v22 = vadd.f32 %v2666_v57, %v2638_v26 }
 0x933   : > { %v2696_v24 = vadd.f32 %v2695_v3, %v2667_v22  ;;  %v2701_v12 = vpop.f32.mrf.mxu0  ;;  %v2730_v39 = vpop.f32.mrf.mxu1 }
 0x935   : > { %v2725_v15 = vadd.f32 %v2724_v25, %v2696_v24 }
 0x936   : > { %v2640_v17 = vpop.f32.mrf.mxu2  ;;  %v2669_v23 = vpop.f32.mrf.mxu3 }
 0x937   : > { %v2736_v29 = vadd.f32 %v2725_v15, %v4932_v35  ;;  %v2641_v5 = vadd.f32 %v3492_v4, %v2640_v17 }
 0x939   : > { %2740 = vst [vmem:[#allocation2 + $0x10] sm:$0xff] %v2736_v29  ;;  %v2670_v18 = vadd.f32 %v2669_v23, %v2641_v5 }
 0x93b   : > { %v2699_v19 = vadd.f32 %v2698_v16, %v2670_v18 }
 0x93d   : > { %v2728_v14 = vadd.f32 %v2727_v43, %v2699_v19 }
 0x93e   : > { %v2643_v50 = vpop.f32.mrf.mxu2  ;;  %v2672_v21 = vpop.f32.mrf.mxu3 }
 0x93f   : > { %v2737_v45 = vadd.f32 %v2728_v14, %v4936_v36  ;;  %v2644_v63 = vadd.f32 %v3492_v4, %v2643_v50 }
 0x941   : > { %2741 = vst [vmem:[#allocation2] sm:$0xff] %v2737_v45  ;;  %v2673_v11 = vadd.f32 %v2672_v21, %v2644_v63 }
 0x943   : > { %v2702_v32 = vadd.f32 %v2701_v12, %v2673_v11 }
 0x945   : > { %v2731_v41 = vadd.f32 %v2730_v39, %v2702_v32 }
 0x947   : > { %v2738_v35 = vadd.f32 %v2731_v41, %v4939_v62 }
 0x949   : > { %2742 = vst [vmem:[#allocation2 + $0x18] sm:$0xff] %v2738_v35 }
 0x96a   : > { %v2704_v37 = vpop.f32.mrf.mxu0  ;;  %v2733_v47 = vpop.f32.mrf.mxu1 }
 0x975   : > { %v2646_v33 = vpop.f32.mrf.mxu2  ;;  %v2675_v44 = vpop.f32.mrf.mxu3 }
 0x976   : > { %v2647_v7 = vadd.f32 %v3492_v4, %v2646_v33 }
 0x978   : > { %v2676_v8 = vadd.f32 %v2675_v44, %v2647_v7 }
 0x97a   : > { %v2705_v46 = vadd.f32 %v2704_v37, %v2676_v8 }
 0x97c   : > { %v2734_v48 = vadd.f32 %v2733_v47, %v2705_v46  ;;  %2747 = sbr.rel (%p3255_p3) target bundleno = 2843 (0xb1b), region = 136 }
 0x97e   : > { %v2739_v36 = vadd.f32 %v2734_v48, %v4943_v54 }
 0x980   : > { %2743 = vst [vmem:[#allocation2 + $0x8] sm:$0xff] %v2739_v36 }
 0x981   : > { %2750 = vadd.xlane.f32.xlu1 %v2736_v29  ;;  %2754 = vadd.xlane.f32.xlu0 %v2738_v35  ;;  %v2859_v62 = vld [vmem:[#allocation20 + $0x78] sm:$0xff]  ;;  %v2858_v34 = vld [vmem:[#allocation20 + $0x70] sm:$0xff]  ;;  %v2857_v6 = vld [vmem:[#allocation20 + $0x68] sm:$0xff] }
 0x982   : > { %2864 = vmatpush.msra.mxu0 %v2859_v62  ;;  %3272 = vmatpush.msra.mxu2 %v2859_v62  ;;  %v2856_v38 = vld [vmem:[#allocation20 + $0x60] sm:$0xff]  ;;  %v2855_v10 = vld [vmem:[#allocation20 + $0x58] sm:$0xff]  ;;  %v2854_v0 = vld [vmem:[#allocation20 + $0x50] sm:$0xff] }
 0x983   : > { %3271 = vmatpush.msra.mxu1 %v2859_v62  ;;  %3273 = vmatpush.msra.mxu3 %v2859_v62  ;;  %v2853_v1 = vld [vmem:[#allocation20 + $0x48] sm:$0xff]  ;;  %v2852_v2 = vld [vmem:[#allocation20 + $0x40] sm:$0xff]  ;;  %v2851_v61 = vld [vmem:[#allocation20 + $0x38] sm:$0xff] }
 0x984   : > { %2865 = vmatpush.msra.mxu0 %v2858_v34  ;;  %3275 = vmatpush.msra.mxu2 %v2858_v34  ;;  %v2850_v59 = vld [vmem:[#allocation20 + $0x30] sm:$0xff]  ;;  %v2849_v4 = vld [vmem:[#allocation20 + $0x28] sm:$0xff]  ;;  %v2848_v3 = vld [vmem:[#allocation20 + $0x20] sm:$0xff] }
 0x985   : > { %3274 = vmatpush.msra.mxu1 %v2858_v34  ;;  %3276 = vmatpush.msra.mxu3 %v2858_v34  ;;  %v2847_v42 = vld [vmem:[#allocation20 + $0x18] sm:$0xff]  ;;  %v2846_v57 = vld [vmem:[#allocation20 + $0x10] sm:$0xff]  ;;  %v2845_v26 = vld [vmem:[#allocation20 + $0x8] sm:$0xff] }
 0x986   : > { %2866 = vmatpush.msra.mxu0 %v2857_v6  ;;  %3278 = vmatpush.msra.mxu2 %v2857_v6  ;;  %v2844_v25 = vld [vmem:[#allocation20] sm:$0xff]  ;;  %v3579_v46 = vld [vmem:[%s5277_s23] ss:$0 sm:$0xff] }
 0x987   : > { %3277 = vmatpush.msra.mxu1 %v2857_v6  ;;  %3279 = vmatpush.msra.mxu3 %v2857_v6 }
 0x988   : > { %2867 = vmatpush.msra.mxu0 %v2856_v38  ;;  %3281 = vmatpush.msra.mxu2 %v2856_v38 }
 0x989   : > { %2752 = vadd.xlane.f32.xlu1 %v2737_v45  ;;  %2756 = vadd.xlane.f32.xlu0 %v2739_v36 }
 0x98a   : > { %3280 = vmatpush.msra.mxu1 %v2856_v38  ;;  %3282 = vmatpush.msra.mxu3 %v2856_v38 }
 0x98b   : > { %2868 = vmatpush.msra.mxu0 %v2855_v10  ;;  %3284 = vmatpush.msra.mxu2 %v2855_v10 }
 0x98c   : > { %3283 = vmatpush.msra.mxu1 %v2855_v10  ;;  %3285 = vmatpush.msra.mxu3 %v2855_v10 }
 0x98d   : > { %2869 = vmatpush.msra.mxu0 %v2854_v0  ;;  %3287 = vmatpush.msra.mxu2 %v2854_v0 }
 0x98e   : > { %3286 = vmatpush.msra.mxu1 %v2854_v0  ;;  %3288 = vmatpush.msra.mxu3 %v2854_v0 }
 0x98f   : > { %2870 = vmatpush.msra.mxu0 %v2853_v1  ;;  %3290 = vmatpush.msra.mxu2 %v2853_v1 }
 0x990   : > { %3289 = vmatpush.msra.mxu1 %v2853_v1  ;;  %3291 = vmatpush.msra.mxu3 %v2853_v1 }
 0x991   : > { %2871 = vmatpush.msra.mxu0 %v2852_v2  ;;  %3293 = vmatpush.msra.mxu2 %v2852_v2 }
 0x992   : > { %3292 = vmatpush.msra.mxu1 %v2852_v2  ;;  %3294 = vmatpush.msra.mxu3 %v2852_v2 }
 0x993   : > { %2872 = vmatpush.msra.mxu0 %v2851_v61  ;;  %3296 = vmatpush.msra.mxu2 %v2851_v61 }
 0x994   : > { %3295 = vmatpush.msra.mxu1 %v2851_v61  ;;  %3297 = vmatpush.msra.mxu3 %v2851_v61  ;;  %v3581_v61 = vld [vmem:[%s5279_s3] ss:$0 sm:$0xff] }
 0x995   : > { %2873 = vmatpush.msra.mxu0 %v2850_v59  ;;  %3299 = vmatpush.msra.mxu2 %v2850_v59 }
 0x996   : > { %3298 = vmatpush.msra.mxu1 %v2850_v59  ;;  %3300 = vmatpush.msra.mxu3 %v2850_v59 }
 0x997   : > { %2874 = vmatpush.msra.mxu0 %v2849_v4  ;;  %3302 = vmatpush.msra.mxu2 %v2849_v4 }
 0x998   : > { %3301 = vmatpush.msra.mxu1 %v2849_v4  ;;  %3303 = vmatpush.msra.mxu3 %v2849_v4 }
 0x999   : > { %2875 = vmatpush.msra.mxu0 %v2848_v3  ;;  %3305 = vmatpush.msra.mxu2 %v2848_v3 }
 0x99a   : > { %3304 = vmatpush.msra.mxu1 %v2848_v3  ;;  %3306 = vmatpush.msra.mxu3 %v2848_v3 }
 0x99b   : > { %2876 = vmatpush.msra.mxu0 %v2847_v42  ;;  %3308 = vmatpush.msra.mxu2 %v2847_v42 }
 0x99c   : > { %3307 = vmatpush.msra.mxu1 %v2847_v42  ;;  %3309 = vmatpush.msra.mxu3 %v2847_v42 }
 0x99d   : > { %2877 = vmatpush.msra.mxu0 %v2846_v57  ;;  %3311 = vmatpush.msra.mxu2 %v2846_v57 }
 0x99e   : > { %3310 = vmatpush.msra.mxu1 %v2846_v57  ;;  %3312 = vmatpush.msra.mxu3 %v2846_v57 }
 0x99f   : > { %2878 = vmatpush.msra.mxu0 %v2845_v26  ;;  %3314 = vmatpush.msra.mxu2 %v2845_v26 }
 0x9a0   : > { %3313 = vmatpush.msra.mxu1 %v2845_v26  ;;  %3315 = vmatpush.msra.mxu3 %v2845_v26 }
 0x9a1   : > { %2879 = vmatpush.msra.mxu0 %v2844_v25  ;;  %3317 = vmatpush.msra.mxu2 %v2844_v25 }
 0x9a2   : > { %3316 = vmatpush.msra.mxu1 %v2844_v25  ;;  %3318 = vmatpush.msra.mxu3 %v2844_v25 }
 0x9f4   : > { %v2751_v27 = vpop.xlane.xlu1 %2750  ;;  %v2755_v51 = vpop.xlane.xlu0 %2754 }
 0x9f5   : > { %v2758_v52 = vmul.f32 %v2751_v27, %v4385_v20  ;;  %v2760_v53 = vmul.f32 %v2755_v51, %v4385_v20  ;;  %v3580_v27 = vld [vmem:[%s5278_s11] ss:$0 sm:$0xff] }
 0x9f7   : > { %v5140_v54 = vsub.f32 %v2736_v29, %v2758_v52  ;;  %v5142_v28 = vsub.f32 %v2738_v35, %v2760_v53 }
 0x9f9   : > { %v2766_v31 = vmul.f32 %v5140_v54, %v5140_v54  ;;  %v2768_v58 = vmul.f32 %v5142_v28, %v5142_v28 }
 0x9fb   : > { %2770 = vadd.xlane.f32.xlu0 %v2766_v31  ;;  %2774 = vadd.xlane.f32.xlu2 %v2768_v58 }
 0x9fc   : > { %v2753_v55 = vpop.xlane.xlu1 %2752  ;;  %v2757_v56 = vpop.xlane.xlu0 %2756 }
 0x9fd   : > { %v2759_v40 = vmul.f32 %v2753_v55, %v4385_v20  ;;  %v2761_v30 = vmul.f32 %v2757_v56, %v4385_v20 }
 0x9ff   : > { %v5150_v13 = vsub.f32 %v2737_v45, %v2759_v40  ;;  %v5152_v60 = vsub.f32 %v2739_v36, %v2761_v30 }
 0xa01   : > { %v2767_v49 = vmul.f32 %v5150_v13, %v5150_v13  ;;  %v2769_v9 = vmul.f32 %v5152_v60, %v5152_v60 }
 0xa03   : > { %2772 = vadd.xlane.f32.xlu1 %v2767_v49  ;;  %2776 = vadd.xlane.f32.xlu2 %v2769_v9 }
 0xa6e   : > { %v2775_v22 = vpop.xlane.xlu2 %2774  ;;  %v2771_v24 = vpop.xlane.xlu0 %2770 }
 0xa6f   : > { %v2780_v15 = vmul.f32 %v2775_v22, %v4385_v20  ;;  %v2778_v17 = vmul.f32 %v2771_v24, %v4385_v20 }
 0xa71   : > { %v2784_v23 = vadd.f32 1e-05, %v2780_v15  ;;  %v2782_v29 = vadd.f32 1e-05, %v2778_v17 }
 0xa73   : > { %3582 = vrsqrt.f32 %v2784_v23  ;;  %vm2792_vm0 = vweird.f32 %v2782_v29  ;;  %vm2812_vm6 = vweird.f32 %v2784_v23 }
 0xa74   : > { %3584 = vrsqrt.f32 %v2782_v29 }
 0xa76   : > { %v2773_v5 = vpop.xlane.xlu1 %2772  ;;  %v2777_v16 = vpop.xlane.xlu2 %2776 }
 0xa77   : > { %v2779_v18 = vmul.f32 %v2773_v5, %v4385_v20  ;;  %v2781_v43 = vmul.f32 %v2777_v16, %v4385_v20 }
 0xa79   : > { %v3583_v19 = vpop.eup %3582  ;;  %v2783_v14 = vadd.f32 1e-05, %v2779_v18  ;;  %v2785_v50 = vadd.f32 1e-05, %v2781_v43 }
 0xa7a   : > { %v3585_v45 = vpop.eup %3584  ;;  %v2807_v63 = vmul.f32 %v3583_v19, %v2784_v23  ;;  %vm2813_vm15 = vweird.f32 %v3583_v19 }
 0xa7b   : > { %v2787_v21 = vmul.f32 %v3585_v45, %v2782_v29  ;;  %3586 = vrsqrt.f32 %v2783_v14  ;;  %vm2793_vm3 = vweird.f32 %v3585_v45  ;;  %vm2814_vm13 = vmor %vm2812_vm6, %vm2813_vm15  ;;  %vm2802_vm1 = vweird.f32 %v2783_v14 }
 0xa7c   : > { %v2808_v11 = vmul.f32 %v3583_v19, %v2807_v63  ;;  %3588 = vrsqrt.f32 %v2785_v50  ;;  %vm2794_vm9 = vmor %vm2792_vm0, %vm2793_vm3  ;;  %vm2822_vm7 = vweird.f32 %v2785_v50 }
 0xa7d   : > { %v2788_v12 = vmul.f32 %v3585_v45, %v2787_v21 }
 0xa7e   : > { %v2809_v32 = vmul.f32 0.5, %v2808_v11 }
 0xa7f   : > { %v2789_v39 = vmul.f32 0.5, %v2788_v12 }
 0xa80   : > { %v2810_v41 = vsub.f32 1.5, %v2809_v32 }
 0xa81   : > { %v3587_v35 = vpop.eup %3586  ;;  %v2790_v33 = vsub.f32 1.5, %v2789_v39 }
 0xa82   : > { %v3589_v7 = vpop.eup %3588  ;;  %v2811_v20 = vmul.f32 %v3583_v19, %v2810_v41  ;;  %v2797_v44 = vmul.f32 %v3587_v35, %v2783_v14  ;;  %vm2803_vm2 = vweird.f32 %v3587_v35 }
 0xa83   : > { %v2791_v8 = vmul.f32 %v3585_v45, %v2790_v33  ;;  %v2817_v37 = vmul.f32 %v3589_v7, %v2785_v50  ;;  %vm2823_vm4 = vweird.f32 %v3589_v7  ;;  %vm2804_vm5 = vmor %vm2802_vm1, %vm2803_vm2 }
 0xa84   : > { %v2798_v47 = vmul.f32 %v3587_v35, %v2797_v44  ;;  %v2815_v48 = vsel %vm2814_vm13, %v3583_v19, %v2811_v20  ;;  %vm2824_vm8 = vmor %vm2822_vm7, %vm2823_vm4 }
 0xa85   : > { %v2818_v36 = vmul.f32 %v3589_v7, %v2817_v37  ;;  %v2795_v62 = vsel %vm2794_vm9, %v3585_v45, %v2791_v8  ;;  %v2828_v51 = vmul.f32 %v2815_v48, %v5142_v28 }
 0xa86   : > { %v2799_v52 = vmul.f32 0.5, %v2798_v47  ;;  %v2826_v53 = vmul.f32 %v2795_v62, %v5140_v54 }
 0xa87   : > { %v2819_v31 = vmul.f32 0.5, %v2818_v36  ;;  %v2835_v58 = vmul.f32 %v3579_v46, %v2828_v51 }
 0xa88   : > { %v2800_v55 = vsub.f32 1.5, %v2799_v52  ;;  %v2833_v56 = vmul.f32 %v3579_v46, %v2826_v53 }
 0xa89   : > { %v2820_v40 = vsub.f32 1.5, %v2819_v31  ;;  %v2842_v30 = vadd.f32 %v3580_v27, %v2835_v58 }
 0xa8a   : > { %v2801_v49 = vmul.f32 %v3587_v35, %v2800_v55  ;;  %v2840_v9 = vadd.f32 %v3580_v27, %v2833_v56 }
 0xa8b   : > { %v2821_v34 = vmul.f32 %v3589_v7, %v2820_v40  ;;  %2886 = vmatmul.f32.vlgmr.msra.gmra.mxu2 %v2842_v30 }
 0xa8c   : > { %2880 = vmatmul.f32.vlgmr.msra.gmra.mxu0 %v2840_v9  ;;  %v2805_v28 = vsel %vm2804_vm5, %v3587_v35, %v2801_v49 }
 0xa8d   : > { %v2827_v54 = vmul.f32 %v2805_v28, %v5150_v13  ;;  %v2825_v6 = vsel %vm2824_vm8, %v3589_v7, %v2821_v34 }
 0xa8e   : > { %v2829_v38 = vmul.f32 %v2825_v6, %v5152_v60 }
 0xa8f   : > { %v2834_v10 = vmul.f32 %v3579_v46, %v2827_v54 }
 0xa90   : > { %v2836_v0 = vmul.f32 %v3579_v46, %v2829_v38 }
 0xa91   : > { %v2841_v1 = vadd.f32 %v3580_v27, %v2834_v10 }
 0xa92   : > { %v2843_v2 = vadd.f32 %v3580_v27, %v2836_v0 }
 0xa93   : > { %2883 = vmatmul.f32.vlgmr.msra.gmra.mxu1 %v2841_v1 }
 0xa94   : > { %2889 = vmatmul.f32.vlgmr.msra.gmra.mxu3 %v2843_v2 }
 0xb09   : > { %v2881_v59 = vpop.f32.mrf.mxu0 }
 0xb0a   : > { %v2882_v4 = vadd.f32 %v3581_v61, %v2881_v59 }
 0xb0c   : > { %2893 = vst [vmem:[#allocation21] sm:$0xff] %v2882_v4 }
 0xb0e   : > { %v2887_v3 = vpop.f32.mrf.mxu2 }
 0xb0f   : > { %v2888_v42 = vadd.f32 %v3581_v61, %v2887_v3 }
 0xb10   : > { %v2884_v57 = vpop.f32.mrf.mxu1 }
 0xb11   : > { %2895 = vst [vmem:[#allocation21 + $0x10] sm:$0xff] %v2888_v42  ;;  %v2885_v13 = vadd.f32 %v3581_v61, %v2884_v57 }
 0xb13   : > { %2894 = vst [vmem:[#allocation21 + $0x8] sm:$0xff] %v2885_v13 }
 0xb17   : > { %v2890_v60 = vpop.f32.mrf.mxu3 }
 0xb18   : > { %v2891_v26 = vadd.f32 %v3581_v61, %v2890_v60 }
 0xb1a   : > { %2896 = vst [vmem:[#allocation21 + $0x18] sm:$0xff] %v2891_v26 }
 0xb1b PF: > { %p3392_p4 = scmp.eq.s32.totalorder %s4157_s27, 1  ;;  %s5280_s17 = sld [smem:[#allocation45_spill]] }
 0xb1c   : > { %s4040_s18 = smov [#allocation21]   ;;  %s4041_s21 = smov 128  }
 0xb1d   : > { %s2905_s29 = sshll.u32 %s4040_s18, 4  ;;  %s4042_s9 = smov 8   ;;  %s2906_s29 = int_to_ptr.vmem [resolvable:$true] %s2905_s29 }
 0xb21   : > { %s2907_s12 = sshll.u32 %s5280_s17, 4  ;;  %s2908_s12 = int_to_ptr.hbm [resolvable:$true] %s2907_s12 }
 0xb22   : > { %3349 = dma.vmem_to_hbm [thread:$0]  (%p3392_p4), %s2906_s29, 512, %s2908_s12, [#allocation5], %s4041_s21, %s4041_s21, %s4042_s9  }
 0xb23   : > { %4001 = dma.done.wait (%p3392_p4), [#allocation5], 512  }
 0xb24   : > { %4003 = vsyncadd (%p3392_p4), [#allocation5], 4294966784 }
 0xb25 PF: > { %s5281_s14 = sld [smem:[#allocation32_spill]]  ;;  %s5285_s21 = smov %s4010_s22 }
 0xb26   : > { %s5282_s0 = sld [smem:[#allocation30_spill]]  ;;  %s5287_s24 = smov %s4022_s25 }
 0xb27   : > { %s5283_s23 = sld [smem:[#allocation34_spill]] }
 0xb28   : > { %s5284_s27 = sld [smem:[#allocation33_spill]] }
 0xb2b   : > { %s43_s26 = sadd.s32 1, %s5281_s14  }
 0xb2c   : > { %p40_p5 = scmp.ge.s32.totalorder %s43_s26, 4   ;;  %s5286_s22 = smov %s5282_s0 }
 0xb2e   : > { %s5288_s25 = smov %s5284_s27  ;;  %42 = sbr.rel (!%p40_p5) target bundleno = 26 (0x1a), region = 242 }
 0xb33   :  { %2924 = vsyncpa [#allocation4], 1 }
 0xb34   :  { %2926 = vsyncpa [#allocation4 + $0x1], 1 }
 0xb35   :  { %2927 = vsyncpa [#allocation7], 1 }
 0xb36   :  { %2929 = vsyncpa [#allocation7 + $0x1], 1 }
 0xb37   :  { %2930 = vsyncpa [#allocation10], 1 }
 0xb38   :  { %2932 = vsyncpa [#allocation10 + $0x1], 1 }
 0xb39   :  { %2933 = vsyncpa [#allocation13], 1 }
 0xb3a   :  { %2935 = vsyncpa [#allocation13 + $0x1], 1 }
 0xb3b   :  { %2936 = vsyncpa [#allocation16], 1 }
 0xb3c   :  { %2938 = vsyncpa [#allocation16 + $0x1], 1 }
 0xb3d   :  { %2939 = vsyncpa [#allocation19], 1 }
 0xb3e   :  { %2941 = vsyncpa [#allocation19 + $0x1], 1 }
 0xb3f   :  { %2942 = vsyncpa [#allocation5], 1 }
 0xb40   :  { %2944 = vsyncpa [#allocation5 + $0x1], 1 }

</bundles_post_ra>
